<compile_context>
chip_gen: v7x
topology: tpu7x:2x2x1
jax: 0.10.0
libtpu: 0.0.40
codegen_flags: <defaults>
</compile_context>

<pallas_src>
import jax
import jax.numpy as jnp
from jax import lax
from jax.experimental import pallas as pl
from jax.experimental.pallas import tpu as pltpu

EPS = 1e-6


# -----------------------------------------------------------------------------
# Pallas kernel
# -----------------------------------------------------------------------------
def sfam_kernel(xl_ref, xr_ref,
                lnl_w_ref, lnl_b_ref, lnr_w_ref, lnr_b_ref,
                wlr_ref, blr_ref,
                out_l_ref, out_r_ref):
    xl = xl_ref[0]                       # (H, W, C)
    xr = xr_ref[0]
    H, W, C = xl.shape
    HW = H * W

    def layernorm(x, w, b):
        # single-pass stats: var = E[x^2] - mu^2
        mu = jnp.mean(x, axis=-1, keepdims=True)
        ms = jnp.mean(x * x, axis=-1, keepdims=True)
        var = ms - mu * mu
        return (x - mu) * lax.rsqrt(var + EPS) * w + b

    # norm_l affine already carries the c^-0.5 attention scale (host fold).
    q_l = layernorm(xl, lnl_w_ref[...], lnl_b_ref[...])
    q_r = layernorm(xr, lnr_w_ref[...], lnr_b_ref[...])

    # Fused l_proj2 / r_proj2: one (HW, 2C) x (2C, 2C) MXU matmul with a
    # block-diagonal weight built on the host; gamma/beta are pre-folded into
    # the weight columns so no post-scale of the attention outputs is needed.
    xcat = jnp.concatenate([xl, xr], axis=-1).reshape(HW, 2 * C)
    v = jnp.dot(xcat, wlr_ref[...],
                preferred_element_type=jnp.float32) + blr_ref[...]
    v = v.reshape(H, W, 2 * C)
    v_l = v[..., :C]                     # = l_proj2(x_l) * gamma
    v_r = v[..., C:]                     # = r_proj2(x_r) * beta

    def softmax_last(a):
        m = jnp.max(a, axis=-1, keepdims=True)
        e = jnp.exp(a - m)
        return e / jnp.sum(e, axis=-1, keepdims=True)

    # attention and its transpose (swap einsum operands -> no XLU transpose).
    att = jnp.einsum('hwc,hvc->hwv', q_l, q_r,
                     preferred_element_type=jnp.float32)        # (H, W, W)
    att_t = jnp.einsum('hwc,hvc->hwv', q_r, q_l,
                       preferred_element_type=jnp.float32)      # = att^T

    f_r2l = jnp.einsum('hwv,hvc->hwc', softmax_last(att), v_r,
                       preferred_element_type=jnp.float32)
    f_l2r = jnp.einsum('hwv,hvc->hwc', softmax_last(att_t), v_l,
                       preferred_element_type=jnp.float32)

    out_l_ref[0] = xl + f_r2l
    out_r_ref[0] = xr + f_l2r


def sfam_forward(xl_nhwc, xr_nhwc, kparams):
    B, H, W, C = xl_nhwc.shape

    def full_spec(shape):
        nd = len(shape)
        return pl.BlockSpec(shape, lambda b, _nd=nd: (0,) * _nd)

    img_spec = pl.BlockSpec((1, H, W, C), lambda b: (b, 0, 0, 0))
    in_specs = [img_spec, img_spec] + [full_spec(p.shape) for p in kparams]

    out_l, out_r = pl.pallas_call(
        sfam_kernel,
        out_shape=(jax.ShapeDtypeStruct((B, H, W, C), jnp.float32),
                   jax.ShapeDtypeStruct((B, H, W, C), jnp.float32)),
        grid=(B,),
        in_specs=in_specs,
        out_specs=(img_spec, img_spec),
        compiler_params=pltpu.CompilerParams(
            dimension_semantics=("parallel",),
            vmem_limit_bytes=32 * 1024 * 1024),
    )(xl_nhwc, xr_nhwc, *kparams)
    return out_l, out_r


# -----------------------------------------------------------------------------
# Parameter init (deterministic) + host-side layout conversion / folding
# -----------------------------------------------------------------------------
def init_params(key, c):
    ks = jax.random.split(key, 16)
    rn = lambda k, shape, s=0.2: s * jax.random.normal(k, shape, jnp.float32)
    return dict(
        nl_w=1.0 + rn(ks[0], (c,)), nl_b=rn(ks[1], (c,)),
        nr_w=1.0 + rn(ks[2], (c,)), nr_b=rn(ks[3], (c,)),
        # l_proj1 / r_proj1 exist in the module but are unused in its forward.
        l1_w=rn(ks[4], (c, c, 1, 1)), l1_b=rn(ks[5], (c,)),
        r1_w=rn(ks[6], (c, c, 1, 1)), r1_b=rn(ks[7], (c,)),
        l2_w=rn(ks[8], (c, c, 1, 1)), l2_b=rn(ks[9], (c,)),
        r2_w=rn(ks[10], (c, c, 1, 1)), r2_b=rn(ks[11], (c,)),
        beta=rn(ks[12], (c,)), gamma=rn(ks[13], (c,)),   # torch inits these to 0
    )


def to_kernel_params(tp, c):
    scale = c ** (-0.5)
    # torch 1x1 conv weight (O, I, 1, 1) -> (I, O) matrix for x_row @ W.
    wl = jnp.transpose(tp["l2_w"][:, :, 0, 0])
    wr = jnp.transpose(tp["r2_w"][:, :, 0, 0])
    # Fold gamma into l_proj2 (feeds F_l2r) and beta into r_proj2 (feeds F_r2l):
    #   (softmax @ V) * s  ==  softmax @ (V * s)   for per-channel s.
    wl = wl * tp["gamma"][None, :]
    wr = wr * tp["beta"][None, :]
    bl = tp["l2_b"] * tp["gamma"]
    br = tp["r2_b"] * tp["beta"]
    wlr = (jnp.zeros((2 * c, 2 * c), jnp.float32)
           .at[:c, :c].set(wl).at[c:, c:].set(wr))       # block-diagonal fusion
    blr = jnp.concatenate([bl, br]).reshape(1, 2 * c)
    return (
        (tp["nl_w"] * scale).reshape(1, c),              # fold c^-0.5 into norm_l
        (tp["nl_b"] * scale).reshape(1, c),
        tp["nr_w"].reshape(1, c), tp["nr_b"].reshape(1, c),
        wlr, blr,
    )


# -----------------------------------------------------------------------------
# Pure-JAX reference (NCHW, mirrors the PyTorch module) for verification
# -----------------------------------------------------------------------------
def conv1x1_ref(x, w, b):
    out = lax.conv_general_dilated(
        x, w, window_strides=(1, 1), padding=[(0, 0), (0, 0)],
        dimension_numbers=("NCHW", "OIHW", "NCHW"),
        precision=lax.Precision.HIGHEST)
    return out + b[None, :, None, None]


def layernorm2d_ref(x, w, b):
    mu = jnp.mean(x, axis=1, keepdims=True)
    var = jnp.mean((x - mu) ** 2, axis=1, keepdims=True)
    return (x - mu) / jnp.sqrt(var + EPS) * w[None, :, None, None] + b[None, :, None, None]


def sfam_ref(x_l, x_r, p):
    c = x_l.shape[1]
    scale = c ** (-0.5)
    # Select.forward is undefined in the spec -> identity pass-through.
    q_l = layernorm2d_ref(x_l, p["nl_w"], p["nl_b"])
    q_r = layernorm2d_ref(x_r, p["nr_w"], p["nr_b"])
    v_l = jnp.transpose(conv1x1_ref(x_l, p["l2_w"], p["l2_b"]), (0, 2, 3, 1))
    v_r = jnp.transpose(conv1x1_ref(x_r, p["r2_w"], p["r2_b"]), (0, 2, 3, 1))
    Q_l = jnp.transpose(q_l, (0, 2, 3, 1))        # (B, H, W, C)
    Q_r_T = jnp.transpose(q_r, (0, 2, 1, 3))      # (B, H, C, W)
    att = jnp.matmul(Q_l, Q_r_T, precision=lax.Precision.HIGHEST) * scale
    f_r2l = jnp.matmul(jax.nn.softmax(att, axis=-1), v_r,
                       precision=lax.Precision.HIGHEST)
    f_l2r = jnp.matmul(jax.nn.softmax(jnp.swapaxes(att, -1, -2), axis=-1), v_l,
                       precision=lax.Precision.HIGHEST)
    f_r2l = jnp.transpose(f_r2l, (0, 3, 1, 2)) * p["beta"][None, :, None, None]
    f_l2r = jnp.transpose(f_l2r, (0, 3, 1, 2)) * p["gamma"][None, :, None, None]
    return x_l + f_r2l, x_r + f_l2r


# -----------------------------------------------------------------------------
if __name__ == "__main__":
    B, C, H, W = 2, 4, 16, 16
    key = jax.random.PRNGKey(0)
    kl, kr, kp = jax.random.split(key, 3)

    x_l = jax.random.normal(kl, (B, C, H, W), jnp.float32)
    x_r = jax.random.normal(kr, (B, C, H, W), jnp.float32)
    tp = init_params(kp, C)
    kparams = to_kernel_params(tp, C)

    xl_nhwc = jnp.transpose(x_l, (0, 2, 3, 1))
    xr_nhwc = jnp.transpose(x_r, (0, 2, 3, 1))
    out_l, out_r = sfam_forward(xl_nhwc, xr_nhwc, kparams)
    out_l, out_r = jax.block_until_ready((out_l, out_r))

    ref_l, ref_r = sfam_ref(x_l, x_r, tp)
    err_l = float(jnp.max(jnp.abs(jnp.transpose(out_l, (0, 3, 1, 2)) - ref_l)))
    err_r = float(jnp.max(jnp.abs(jnp.transpose(out_r, (0, 3, 1, 2)) - ref_r)))
    assert max(err_l, err_r) < 1e-4, (
        f"kernel/ref mismatch: err_l={err_l}, err_r={err_r}")
    print("KERNEL_OK")
</pallas_src>

<mosaic_0001>
module attributes {stable_mosaic.version = 11 : i64} {
  func.func @sfam_kernel(%arg0: i32, %arg1: memref<1x16x16x4xf32, #tpu.memory_space<vmem>>, %arg2: memref<1x16x16x4xf32, #tpu.memory_space<vmem>>, %arg3: memref<1x4xf32, #tpu.memory_space<vmem>>, %arg4: memref<1x4xf32, #tpu.memory_space<vmem>>, %arg5: memref<1x4xf32, #tpu.memory_space<vmem>>, %arg6: memref<1x4xf32, #tpu.memory_space<vmem>>, %arg7: memref<8x8xf32, #tpu.memory_space<vmem>>, %arg8: memref<1x8xf32, #tpu.memory_space<vmem>>, %arg9: memref<1x16x16x4xf32, #tpu.memory_space<vmem>>, %arg10: memref<1x16x16x4xf32, #tpu.memory_space<vmem>>) attributes {dimension_semantics = [#tpu.dimension_semantics<parallel>], iteration_bounds = array<i64: 2>, scalar_prefetch = 0 : i64, scratch_operands = 0 : i64, tpu.core_type = #tpu.core_type<tc>, window_params = [{transform_indices = @transform_0, window_bounds = array<i64: 1, 16, 16, 4>}, {transform_indices = @transform_1, window_bounds = array<i64: 1, 16, 16, 4>}, {pipeline_mode = #tpu.pipeline_mode<synchronous>, transform_indices = @transform_2, window_bounds = array<i64: 1, 4>}, {pipeline_mode = #tpu.pipeline_mode<synchronous>, transform_indices = @transform_3, window_bounds = array<i64: 1, 4>}, {pipeline_mode = #tpu.pipeline_mode<synchronous>, transform_indices = @transform_4, window_bounds = array<i64: 1, 4>}, {pipeline_mode = #tpu.pipeline_mode<synchronous>, transform_indices = @transform_5, window_bounds = array<i64: 1, 4>}, {pipeline_mode = #tpu.pipeline_mode<synchronous>, transform_indices = @transform_6, window_bounds = array<i64: 8, 8>}, {pipeline_mode = #tpu.pipeline_mode<synchronous>, transform_indices = @transform_7, window_bounds = array<i64: 1, 8>}, {transform_indices = @transform_8, window_bounds = array<i64: 1, 16, 16, 4>}, {transform_indices = @transform_9, window_bounds = array<i64: 1, 16, 16, 4>}]} {
    %c0 = arith.constant 0 : index
    %c0_0 = arith.constant 0 : index
    %c0_1 = arith.constant 0 : index
    %c0_2 = arith.constant 0 : index
    %0 = vector.load %arg1[%c0, %c0_0, %c0_1, %c0_2] : memref<1x16x16x4xf32, #tpu.memory_space<vmem>>, vector<1x16x16x4xf32>
    %1 = vector.shape_cast %0 : vector<1x16x16x4xf32> to vector<16x16x4xf32>
    %c0_3 = arith.constant 0 : index
    %c0_4 = arith.constant 0 : index
    %c0_5 = arith.constant 0 : index
    %c0_6 = arith.constant 0 : index
    %2 = vector.load %arg2[%c0_3, %c0_4, %c0_5, %c0_6] : memref<1x16x16x4xf32, #tpu.memory_space<vmem>>, vector<1x16x16x4xf32>
    %3 = vector.shape_cast %2 : vector<1x16x16x4xf32> to vector<16x16x4xf32>
    %c0_7 = arith.constant 0 : index
    %c0_8 = arith.constant 0 : index
    %4 = vector.load %arg3[%c0_7, %c0_8] : memref<1x4xf32, #tpu.memory_space<vmem>>, vector<1x4xf32>
    %c0_9 = arith.constant 0 : index
    %c0_10 = arith.constant 0 : index
    %5 = vector.load %arg4[%c0_9, %c0_10] : memref<1x4xf32, #tpu.memory_space<vmem>>, vector<1x4xf32>
    %cst = arith.constant dense<0.000000e+00> : vector<16x16xf32>
    %6 = vector.multi_reduction <add>, %1, %cst [2] : vector<16x16x4xf32> to vector<16x16xf32>
    %7 = vector.shape_cast %6 : vector<16x16xf32> to vector<16x16x1xf32>
    %cst_11 = arith.constant 4.000000e+00 : f32
    %8 = vector.broadcast %cst_11 : f32 to vector<16x16x1xf32>
    %9 = arith.divf %7, %8 : vector<16x16x1xf32>
    %10 = arith.mulf %1, %1 : vector<16x16x4xf32>
    %cst_12 = arith.constant dense<0.000000e+00> : vector<16x16xf32>
    %11 = vector.multi_reduction <add>, %10, %cst_12 [2] : vector<16x16x4xf32> to vector<16x16xf32>
    %12 = vector.shape_cast %11 : vector<16x16xf32> to vector<16x16x1xf32>
    %cst_13 = arith.constant 4.000000e+00 : f32
    %13 = vector.broadcast %cst_13 : f32 to vector<16x16x1xf32>
    %14 = arith.divf %12, %13 : vector<16x16x1xf32>
    %15 = arith.mulf %9, %9 : vector<16x16x1xf32>
    %16 = arith.subf %14, %15 : vector<16x16x1xf32>
    %17 = vector.broadcast %9 : vector<16x16x1xf32> to vector<16x16x4xf32>
    %18 = arith.subf %1, %17 : vector<16x16x4xf32>
    %cst_14 = arith.constant 9.99999997E-7 : f32
    %19 = vector.broadcast %cst_14 : f32 to vector<16x16x1xf32>
    %20 = arith.addf %16, %19 : vector<16x16x1xf32>
    %21 = math.rsqrt %20 : vector<16x16x1xf32>
    %22 = vector.broadcast %21 : vector<16x16x1xf32> to vector<16x16x4xf32>
    %23 = arith.mulf %18, %22 : vector<16x16x4xf32>
    %24 = vector.shape_cast %4 : vector<1x4xf32> to vector<1x1x4xf32>
    %25 = vector.broadcast %24 : vector<1x1x4xf32> to vector<16x16x4xf32>
    %26 = arith.mulf %23, %25 : vector<16x16x4xf32>
    %27 = vector.shape_cast %5 : vector<1x4xf32> to vector<1x1x4xf32>
    %28 = vector.broadcast %27 : vector<1x1x4xf32> to vector<16x16x4xf32>
    %29 = arith.addf %26, %28 : vector<16x16x4xf32>
    %c0_15 = arith.constant 0 : index
    %c0_16 = arith.constant 0 : index
    %30 = vector.load %arg5[%c0_15, %c0_16] : memref<1x4xf32, #tpu.memory_space<vmem>>, vector<1x4xf32>
    %c0_17 = arith.constant 0 : index
    %c0_18 = arith.constant 0 : index
    %31 = vector.load %arg6[%c0_17, %c0_18] : memref<1x4xf32, #tpu.memory_space<vmem>>, vector<1x4xf32>
    %cst_19 = arith.constant dense<0.000000e+00> : vector<16x16xf32>
    %32 = vector.multi_reduction <add>, %3, %cst_19 [2] : vector<16x16x4xf32> to vector<16x16xf32>
    %33 = vector.shape_cast %32 : vector<16x16xf32> to vector<16x16x1xf32>
    %cst_20 = arith.constant 4.000000e+00 : f32
    %34 = vector.broadcast %cst_20 : f32 to vector<16x16x1xf32>
    %35 = arith.divf %33, %34 : vector<16x16x1xf32>
    %36 = arith.mulf %3, %3 : vector<16x16x4xf32>
    %cst_21 = arith.constant dense<0.000000e+00> : vector<16x16xf32>
    %37 = vector.multi_reduction <add>, %36, %cst_21 [2] : vector<16x16x4xf32> to vector<16x16xf32>
    %38 = vector.shape_cast %37 : vector<16x16xf32> to vector<16x16x1xf32>
    %cst_22 = arith.constant 4.000000e+00 : f32
    %39 = vector.broadcast %cst_22 : f32 to vector<16x16x1xf32>
    %40 = arith.divf %38, %39 : vector<16x16x1xf32>
    %41 = arith.mulf %35, %35 : vector<16x16x1xf32>
    %42 = arith.subf %40, %41 : vector<16x16x1xf32>
    %43 = vector.broadcast %35 : vector<16x16x1xf32> to vector<16x16x4xf32>
    %44 = arith.subf %3, %43 : vector<16x16x4xf32>
    %cst_23 = arith.constant 9.99999997E-7 : f32
    %45 = vector.broadcast %cst_23 : f32 to vector<16x16x1xf32>
    %46 = arith.addf %42, %45 : vector<16x16x1xf32>
    %47 = math.rsqrt %46 : vector<16x16x1xf32>
    %48 = vector.broadcast %47 : vector<16x16x1xf32> to vector<16x16x4xf32>
    %49 = arith.mulf %44, %48 : vector<16x16x4xf32>
    %50 = vector.shape_cast %30 : vector<1x4xf32> to vector<1x1x4xf32>
    %51 = vector.broadcast %50 : vector<1x1x4xf32> to vector<16x16x4xf32>
    %52 = arith.mulf %49, %51 : vector<16x16x4xf32>
    %53 = vector.shape_cast %31 : vector<1x4xf32> to vector<1x1x4xf32>
    %54 = vector.broadcast %53 : vector<1x1x4xf32> to vector<16x16x4xf32>
    %55 = arith.addf %52, %54 : vector<16x16x4xf32>
    %56 = tpu.concatenate %1, %3 in 2 : vector<16x16x4xf32>, vector<16x16x4xf32> -> vector<16x16x8xf32>
    %57 = vector.shape_cast %56 : vector<16x16x8xf32> to vector<256x8xf32>
    %c0_24 = arith.constant 0 : index
    %c0_25 = arith.constant 0 : index
    %58 = vector.load %arg7[%c0_24, %c0_25] : memref<8x8xf32, #tpu.memory_space<vmem>>, vector<8x8xf32>
    %cst_26 = arith.constant dense<0.000000e+00> : vector<256x8xf32>
    %59 = tpu.matmul %57, %58, %cst_26 {dimension_numbers = #tpu.dot_dimension_numbers<[1], [0], [0], [1], [0, 0, 1, 1], [], []>} : vector<256x8xf32>, vector<8x8xf32>, vector<256x8xf32> -> vector<256x8xf32>
    %c0_27 = arith.constant 0 : index
    %c0_28 = arith.constant 0 : index
    %60 = vector.load %arg8[%c0_27, %c0_28] : memref<1x8xf32, #tpu.memory_space<vmem>>, vector<1x8xf32>
    %61 = vector.broadcast %60 : vector<1x8xf32> to vector<256x8xf32>
    %62 = arith.addf %59, %61 : vector<256x8xf32>
    %63 = vector.shape_cast %62 : vector<256x8xf32> to vector<16x16x8xf32>
    %64 = vector.extract_strided_slice %63 {offsets = [0, 0, 0], sizes = [16, 16, 4], strides = [1, 1, 1]} : vector<16x16x8xf32> to vector<16x16x4xf32>
    %65 = vector.extract_strided_slice %63 {offsets = [0, 0, 4], sizes = [16, 16, 4], strides = [1, 1, 1]} : vector<16x16x8xf32> to vector<16x16x4xf32>
    "tpu.trace_start"() <{level = 10 : i32, message = "hwc,hvc->hwv"}> : () -> ()
    %cst_29 = arith.constant dense<0.000000e+00> : vector<16x16x16xf32>
    %66 = tpu.matmul %29, %55, %cst_29 {dimension_numbers = #tpu.dot_dimension_numbers<[2], [2], [1], [1], [0, 0, 0, 1, 1, 1], [0], [0]>} : vector<16x16x4xf32>, vector<16x16x4xf32>, vector<16x16x16xf32> -> vector<16x16x16xf32>
    %cst_30 = arith.constant dense<0.000000e+00> : vector<16x16x16xf32>
    %67 = tpu.matmul %55, %29, %cst_30 {dimension_numbers = #tpu.dot_dimension_numbers<[2], [2], [1], [1], [0, 0, 0, 1, 1, 1], [0], [0]>} : vector<16x16x4xf32>, vector<16x16x4xf32>, vector<16x16x16xf32> -> vector<16x16x16xf32>
    "tpu.trace_stop"() : () -> ()
    %cst_31 = arith.constant dense<0xFF800000> : vector<16x16xf32>
    %68 = vector.multi_reduction <maximumf>, %66, %cst_31 [2] : vector<16x16x16xf32> to vector<16x16xf32>
    %69 = vector.shape_cast %68 : vector<16x16xf32> to vector<16x16x1xf32>
    %70 = vector.broadcast %69 : vector<16x16x1xf32> to vector<16x16x16xf32>
    %71 = arith.subf %66, %70 : vector<16x16x16xf32>
    %72 = math.exp %71 : vector<16x16x16xf32>
    %cst_32 = arith.constant dense<0.000000e+00> : vector<16x16xf32>
    %73 = vector.multi_reduction <add>, %72, %cst_32 [2] : vector<16x16x16xf32> to vector<16x16xf32>
    %74 = vector.shape_cast %73 : vector<16x16xf32> to vector<16x16x1xf32>
    %75 = vector.broadcast %74 : vector<16x16x1xf32> to vector<16x16x16xf32>
    %76 = arith.divf %72, %75 : vector<16x16x16xf32>
    "tpu.trace_start"() <{level = 10 : i32, message = "hwv,hvc->hwc"}> : () -> ()
    %cst_33 = arith.constant dense<0.000000e+00> : vector<16x16x4xf32>
    %77 = tpu.matmul %76, %65, %cst_33 {dimension_numbers = #tpu.dot_dimension_numbers<[2], [1], [1], [2], [0, 0, 0, 1, 1, 2], [0], [0]>} : vector<16x16x16xf32>, vector<16x16x4xf32>, vector<16x16x4xf32> -> vector<16x16x4xf32>
    "tpu.trace_stop"() : () -> ()
    %cst_34 = arith.constant dense<0xFF800000> : vector<16x16xf32>
    %78 = vector.multi_reduction <maximumf>, %67, %cst_34 [2] : vector<16x16x16xf32> to vector<16x16xf32>
    %79 = vector.shape_cast %78 : vector<16x16xf32> to vector<16x16x1xf32>
    %80 = vector.broadcast %79 : vector<16x16x1xf32> to vector<16x16x16xf32>
    %81 = arith.subf %67, %80 : vector<16x16x16xf32>
    %82 = math.exp %81 : vector<16x16x16xf32>
    %cst_35 = arith.constant dense<0.000000e+00> : vector<16x16xf32>
    %83 = vector.multi_reduction <add>, %82, %cst_35 [2] : vector<16x16x16xf32> to vector<16x16xf32>
    %84 = vector.shape_cast %83 : vector<16x16xf32> to vector<16x16x1xf32>
    %85 = vector.broadcast %84 : vector<16x16x1xf32> to vector<16x16x16xf32>
    %86 = arith.divf %82, %85 : vector<16x16x16xf32>
    "tpu.trace_start"() <{level = 10 : i32, message = "hwv,hvc->hwc"}> : () -> ()
    %cst_36 = arith.constant dense<0.000000e+00> : vector<16x16x4xf32>
    %87 = tpu.matmul %86, %64, %cst_36 {dimension_numbers = #tpu.dot_dimension_numbers<[2], [1], [1], [2], [0, 0, 0, 1, 1, 2], [0], [0]>} : vector<16x16x16xf32>, vector<16x16x4xf32>, vector<16x16x4xf32> -> vector<16x16x4xf32>
    "tpu.trace_stop"() : () -> ()
    %88 = arith.addf %1, %77 : vector<16x16x4xf32>
    %c0_37 = arith.constant 0 : index
    %c0_38 = arith.constant 0 : index
    %c0_39 = arith.constant 0 : index
    %c0_40 = arith.constant 0 : index
    %89 = vector.load %arg9[%c0_37, %c0_38, %c0_39, %c0_40] : memref<1x16x16x4xf32, #tpu.memory_space<vmem>>, vector<1x16x16x4xf32>
    %90 = vector.shape_cast %89 : vector<1x16x16x4xf32> to vector<16x16x4xf32>
    %91 = vector.shape_cast %88 : vector<16x16x4xf32> to vector<1x16x16x4xf32>
    tpu.vector_store %arg9[%c0_37, %c0_38, %c0_39, %c0_40], %91 {strides = array<i32>} : memref<1x16x16x4xf32, #tpu.memory_space<vmem>>, vector<1x16x16x4xf32>,
    %92 = arith.addf %3, %87 : vector<16x16x4xf32>
    %c0_41 = arith.constant 0 : index
    %c0_42 = arith.constant 0 : index
    %c0_43 = arith.constant 0 : index
    %c0_44 = arith.constant 0 : index
    %93 = vector.load %arg10[%c0_41, %c0_42, %c0_43, %c0_44] : memref<1x16x16x4xf32, #tpu.memory_space<vmem>>, vector<1x16x16x4xf32>
    %94 = vector.shape_cast %93 : vector<1x16x16x4xf32> to vector<16x16x4xf32>
    %95 = vector.shape_cast %92 : vector<16x16x4xf32> to vector<1x16x16x4xf32>
    tpu.vector_store %arg10[%c0_41, %c0_42, %c0_43, %c0_44], %95 {strides = array<i32>} : memref<1x16x16x4xf32, #tpu.memory_space<vmem>>, vector<1x16x16x4xf32>,
    return
  }
  func.func @transform_0(%arg0: i32) -> (i32, i32, i32, i32) {
    %c0_i32 = arith.constant 0 : i32
    %c0_i32_0 = arith.constant 0 : i32
    %c0_i32_1 = arith.constant 0 : i32
    %c0_i32_2 = arith.constant 0 : i32
    return %arg0, %c0_i32, %c0_i32_0, %c0_i32_1 : i32, i32, i32, i32
  }
  func.func @transform_1(%arg0: i32) -> (i32, i32, i32, i32) {
    %c0_i32 = arith.constant 0 : i32
    %c0_i32_0 = arith.constant 0 : i32
    %c0_i32_1 = arith.constant 0 : i32
    %c0_i32_2 = arith.constant 0 : i32
    return %arg0, %c0_i32, %c0_i32_0, %c0_i32_1 : i32, i32, i32, i32
  }
  func.func @transform_2(%arg0: i32) -> (i32, i32) {
    %c0_i32 = arith.constant 0 : i32
    %c0_i32_0 = arith.constant 0 : i32
    %c0_i32_1 = arith.constant 0 : i32
    return %c0_i32, %c0_i32_0 : i32, i32
  }
  func.func @transform_3(%arg0: i32) -> (i32, i32) {
    %c0_i32 = arith.constant 0 : i32
    %c0_i32_0 = arith.constant 0 : i32
    %c0_i32_1 = arith.constant 0 : i32
    return %c0_i32, %c0_i32_0 : i32, i32
  }
  func.func @transform_4(%arg0: i32) -> (i32, i32) {
    %c0_i32 = arith.constant 0 : i32
    %c0_i32_0 = arith.constant 0 : i32
    %c0_i32_1 = arith.constant 0 : i32
    return %c0_i32, %c0_i32_0 : i32, i32
  }
  func.func @transform_5(%arg0: i32) -> (i32, i32) {
    %c0_i32 = arith.constant 0 : i32
    %c0_i32_0 = arith.constant 0 : i32
    %c0_i32_1 = arith.constant 0 : i32
    return %c0_i32, %c0_i32_0 : i32, i32
  }
  func.func @transform_6(%arg0: i32) -> (i32, i32) {
    %c0_i32 = arith.constant 0 : i32
    %c0_i32_0 = arith.constant 0 : i32
    %c0_i32_1 = arith.constant 0 : i32
    return %c0_i32, %c0_i32_0 : i32, i32
  }
  func.func @transform_7(%arg0: i32) -> (i32, i32) {
    %c0_i32 = arith.constant 0 : i32
    %c0_i32_0 = arith.constant 0 : i32
    %c0_i32_1 = arith.constant 0 : i32
    return %c0_i32, %c0_i32_0 : i32, i32
  }
  func.func @transform_8(%arg0: i32) -> (i32, i32, i32, i32) {
    %c0_i32 = arith.constant 0 : i32
    %c0_i32_0 = arith.constant 0 : i32
    %c0_i32_1 = arith.constant 0 : i32
    %c0_i32_2 = arith.constant 0 : i32
    return %arg0, %c0_i32, %c0_i32_0, %c0_i32_1 : i32, i32, i32, i32
  }
  func.func @transform_9(%arg0: i32) -> (i32, i32, i32, i32) {
    %c0_i32 = arith.constant 0 : i32
    %c0_i32_0 = arith.constant 0 : i32
    %c0_i32_1 = arith.constant 0 : i32
    %c0_i32_2 = arith.constant 0 : i32
    return %arg0, %c0_i32, %c0_i32_0, %c0_i32_1 : i32, i32, i32, i32
  }
}

</mosaic_0001>

<bundles_post_ra>
// kernel: tpu_custom_call.1
= control target key start
LH: loop header
LB: loop body
LE: loop exit
PB: predicated region body
PF: predicated region fallthrough
CT: control target
= control target key end

     0   :  { %s10267_s30 = smov 0   ;;  %s13409_s0 = inlined_call_operand.vmem [shape: f32[2,16,16,4], index: 0, kind: input, shape index: {}]   ;;  %s13410_s1 = inlined_call_operand.vmem [shape: f32[2,16,16,4], index: 1, kind: input, shape index: {}]   ;;  %s13411_s2 = inlined_call_operand.vmem [shape: f32[1,4], index: 2, kind: input, shape index: {}]   ;;  %s13412_s3 = inlined_call_operand.vmem [shape: f32[1,4], index: 3, kind: input, shape index: {}]   ;;  %s13413_s4 = inlined_call_operand.vmem [shape: f32[1,4], index: 4, kind: input, shape index: {}]   ;;  %s13414_s5 = inlined_call_operand.vmem [shape: f32[1,4], index: 5, kind: input, shape index: {}]   ;;  %s13415_s6 = inlined_call_operand.vmem [shape: f32[8,8], index: 6, kind: input, shape index: {}]   ;;  %s13416_s7 = inlined_call_operand.vmem [shape: f32[1,8], index: 7, kind: input, shape index: {}]   ;;  %s13417_s8 = inlined_call_operand.vmem [shape: f32[2,16,16,4], index: 8, kind: output, shape index: {0}]   ;;  %s13418_s9 = inlined_call_operand.vmem [shape: f32[2,16,16,4], index: 9, kind: output, shape index: {1}]  }
   0x1 LB: > { %s8283_s10 = sadd.s32 4294967295, %s10213_s30   ;;  %p8287_p0 = scmp.ge.s32.totalorder %s10213_s30, 1  ;;  %s10213_s30 = sphi %s10267_s30, %s20_s30  }
   0x2   : > { %p300_p1 = scmp.lt.s32.totalorder %s10213_s30, 3 }
   0x4   : > { %p301_p2 = pnand %p8287_p0, %p300_p1 }
   0x6   : > { %304 = sbr.rel (%p301_p2) target bundleno = 2255 (0x8cf), region = 52 }
   0xd   : > { %p346_p3 = scmp.lt.s32.totalorder %s8283_s10, 1  ;;  %vm432_vm0 = vcmask 31744   ;;  %s10215_s18 = smov 4   ;;  %vm1716_vm2 = vcmask 64512   ;;  %vm4630_vm3 = vcmask 130048  }
   0xe   : > { %vm10549_vm1 = vmpackc.low %vm432_vm0, %vm432_vm0  ;;  %s10216_s13 = smov 124  }
   0xf   : > { %s13939_s10 = smov (!%p346_p3, %s8283_s10), 1 }
  0x10   : > { %s10275_s11 = sshll.u32 %s13939_s10, 8 }
  0x11   : > { %s10281_s14 = scalar_lea.vmem %s13410_s1, %s10275_s11  ;;  %s10310_s17 = scalar_lea.vmem %s13409_s0, %s10275_s11 }
  0x12   : > { %v10284_v0 = vld [vmem:[%s10281_s14 + $0x18] sm:$0xff]  ;;  %v10287_v1 = vld [vmem:[%s10281_s14] sm:$0xff]  ;;  %v10290_v2 = vld [vmem:[%s10281_s14 + $0x8] sm:$0xff]  ;;  %s12891_s19 = scalar_lea.vmem %s13417_s8, %s10275_s11  ;;  %s13308_s22 = scalar_lea.vmem %s13418_s9, %s10275_s11 }
  0x13   : > { %v1001_v3 = vsel %vm432_vm0, %v10284_v0, 0.0  ;;  %v992_v4 = vsel %vm432_vm0, %v10287_v1, 0.0  ;;  %v1120_v5 = vmul.f32 %v10287_v1, %v10287_v1  ;;  %v995_v7 = vsel %vm432_vm0, %v10290_v2, 0.0  ;;  %v10304_v9 = vld [vmem:[%s10281_s14 + $0x10] sm:$0xff]  ;;  %v10318_v13 = vld [vmem:[%s10310_s17] sm:$0xff]  ;;  %v10326_v17 = vld [vmem:[%s10310_s17 + $0x8] sm:$0xff] }
  0x14   : > { %1002 = vadd.xlane.f32.xlu1 %v1001_v3  ;;  %993 = vadd.xlane.f32.xlu0 %v992_v4  ;;  %v1121_v8 = vmul.f32 %v10290_v2, %v10290_v2  ;;  %v998_v11 = vsel %vm432_vm0, %v10304_v9, 0.0  ;;  %v1122_v12 = vmul.f32 %v10304_v9, %v10304_v9  ;;  %v433_v15 = vsel %vm432_vm0, %v10318_v13, 0.0  ;;  %v10338_v24 = vld [vmem:[%s10281_s14 + $0x28] sm:$0xff]  ;;  %v10341_v25 = vld [vmem:[%s10281_s14 + $0x20] sm:$0xff]  ;;  %v10350_v29 = vld [vmem:[%s10310_s17 + $0x10] sm:$0xff] }
  0x15   : > { %v1152_v6 = vsel %vm432_vm0, %v1120_v5, 0.0  ;;  %v1123_v16 = vmul.f32 %v10284_v0, %v10284_v0  ;;  %v436_v18 = vsel %vm432_vm0, %v10326_v17, 0.0  ;;  %v563_v20 = vmul.f32 %v10326_v17, %v10326_v17  ;;  %v10358_v33 = vld [vmem:[%s10310_s17 + $0x18] sm:$0xff]  ;;  %v10373_v41 = vld [vmem:[%s10281_s14 + $0x30] sm:$0xff]  ;;  %v10382_v45 = vld [vmem:[%s10310_s17 + $0x20] sm:$0xff] }
  0x16   : > { %v1155_v10 = vsel %vm432_vm0, %v1121_v8, 0.0  ;;  %v1158_v14 = vsel %vm432_vm0, %v1122_v12, 0.0  ;;  %v562_v21 = vmul.f32 %v10318_v13, %v10318_v13  ;;  %v1007_v26 = vsel %vm432_vm0, %v10338_v24, 0.0  ;;  %v10370_v40 = vld [vmem:[%s10281_s14 + $0x38] sm:$0xff]  ;;  %v10390_v49 = vld [vmem:[%s10310_s17 + $0x28] sm:$0xff]  ;;  %v10405_v57 = vld [vmem:[%s10281_s14 + $0x40] sm:$0xff] }
  0x17   : > { %v1161_v19 = vsel %vm432_vm0, %v1123_v16, 0.0  ;;  %v597_v22 = vsel %vm432_vm0, %v563_v20, 0.0  ;;  %v1004_v27 = vsel %vm432_vm0, %v10341_v25, 0.0  ;;  %v1124_v28 = vmul.f32 %v10341_v25, %v10341_v25  ;;  %v10402_v56 = vld [vmem:[%s10281_s14 + $0x48] sm:$0xff]  ;;  %v10414_v61 = vld [vmem:[%s10310_s17 + $0x30] sm:$0xff]  ;;  %v10422_v4 = vld [vmem:[%s10310_s17 + $0x38] sm:$0xff] }
  0x18   : > { %1153 = vadd.xlane.f32.xlu1 %v1152_v6  ;;  %996 = vadd.xlane.f32.xlu0 %v995_v7  ;;  %v594_v23 = vsel %vm432_vm0, %v562_v21, 0.0  ;;  %v439_v31 = vsel %vm432_vm0, %v10350_v29, 0.0  ;;  %v1125_v32 = vmul.f32 %v10338_v24, %v10338_v24  ;;  %v442_v34 = vsel %vm432_vm0, %v10358_v33, 0.0  ;;  %v10434_v12 = vld [vmem:[%s10281_s14 + $0x58] sm:$0xff] }
  0x19   : > { %v1164_v30 = vsel %vm432_vm0, %v1124_v28, 0.0  ;;  %v565_v36 = vmul.f32 %v10358_v33, %v10358_v33  ;;  %v564_v37 = vmul.f32 %v10350_v29, %v10350_v29  ;;  %v1013_v42 = vsel %vm432_vm0, %v10370_v40, 0.0 }
  0x1a   : > { %v1167_v35 = vsel %vm432_vm0, %v1125_v32, 0.0  ;;  %v1010_v43 = vsel %vm432_vm0, %v10373_v41, 0.0  ;;  %v1126_v44 = vmul.f32 %v10373_v41, %v10373_v41  ;;  %v445_v47 = vsel %vm432_vm0, %v10382_v45, 0.0 }
  0x1b   : > { %v603_v38 = vsel %vm432_vm0, %v565_v36, 0.0  ;;  %v600_v39 = vsel %vm432_vm0, %v564_v37, 0.0  ;;  %v1127_v48 = vmul.f32 %v10370_v40, %v10370_v40  ;;  %v448_v50 = vsel %vm432_vm0, %v10390_v49, 0.0 }
  0x1c   : > { %1156 = vadd.xlane.f32.xlu1 %v1155_v10  ;;  %999 = vadd.xlane.f32.xlu0 %v998_v11  ;;  %v1170_v46 = vsel %vm432_vm0, %v1126_v44, 0.0  ;;  %v567_v52 = vmul.f32 %v10390_v49, %v10390_v49  ;;  %v566_v53 = vmul.f32 %v10382_v45, %v10382_v45  ;;  %v1019_v58 = vsel %vm432_vm0, %v10402_v56, 0.0 }
  0x1d   : > { %v1173_v51 = vsel %vm432_vm0, %v1127_v48, 0.0  ;;  %v1016_v59 = vsel %vm432_vm0, %v10405_v57, 0.0  ;;  %v1128_v60 = vmul.f32 %v10405_v57, %v10405_v57  ;;  %v451_v63 = vsel %vm432_vm0, %v10414_v61, 0.0 }
  0x1e   : > { %v609_v54 = vsel %vm432_vm0, %v567_v52, 0.0  ;;  %v606_v55 = vsel %vm432_vm0, %v566_v53, 0.0  ;;  %v1129_v3 = vmul.f32 %v10402_v56, %v10402_v56  ;;  %v454_v5 = vsel %vm432_vm0, %v10422_v4, 0.0 }
  0x1f   : > { %v1176_v62 = vsel %vm432_vm0, %v1128_v60, 0.0  ;;  %v569_v7 = vmul.f32 %v10422_v4, %v10422_v4  ;;  %v568_v8 = vmul.f32 %v10414_v61, %v10414_v61 }
  0x20   : > { %1159 = vadd.xlane.f32.xlu1 %v1158_v14  ;;  %434 = vadd.xlane.f32.xlu0 %v433_v15  ;;  %v1179_v6 = vsel %vm432_vm0, %v1129_v3, 0.0  ;;  %v10437_v14 = vld [vmem:[%s10281_s14 + $0x50] sm:$0xff]  ;;  %v1025_v15 = vsel %vm432_vm0, %v10434_v12, 0.0 }
  0x21   : > { %v615_v10 = vsel %vm432_vm0, %v569_v7, 0.0  ;;  %v612_v11 = vsel %vm432_vm0, %v568_v8, 0.0  ;;  %v1022_v16 = vsel %vm432_vm0, %v10437_v14, 0.0 }
  0x24   : > { %437 = vadd.xlane.f32.xlu1 %v436_v18  ;;  %1162 = vadd.xlane.f32.xlu0 %v1161_v19  ;;  %v1130_v18 = vmul.f32 %v10437_v14, %v10437_v14  ;;  %v10446_v19 = vld [vmem:[%s10310_s17 + $0x40] sm:$0xff] }
  0x25   : > { %v457_v21 = vsel %vm432_vm0, %v10446_v19, 0.0 }
  0x26   : > { %v1182_v20 = vsel %vm432_vm0, %v1130_v18, 0.0 }
  0x28   : > { %598 = vadd.xlane.f32.xlu1 %v597_v22  ;;  %595 = vadd.xlane.f32.xlu0 %v594_v23  ;;  %v1131_v22 = vmul.f32 %v10434_v12, %v10434_v12  ;;  %v10454_v23 = vld [vmem:[%s10310_s17 + $0x48] sm:$0xff] }
  0x29   : > { %v571_v28 = vmul.f32 %v10454_v23, %v10454_v23 }
  0x2c   : > { %1008 = vadd.xlane.f32.xlu1 %v1007_v26  ;;  %1005 = vadd.xlane.f32.xlu0 %v1004_v27  ;;  %v460_v26 = vsel %vm432_vm0, %v10454_v23, 0.0  ;;  %v1185_v27 = vsel %vm432_vm0, %v1131_v22, 0.0 }
  0x30   : > { %1165 = vadd.xlane.f32.xlu1 %v1164_v30  ;;  %440 = vadd.xlane.f32.xlu0 %v439_v31  ;;  %v570_v30 = vmul.f32 %v10446_v19, %v10446_v19  ;;  %v621_v31 = vsel %vm432_vm0, %v571_v28, 0.0 }
  0x32   : > { %v618_v32 = vsel %vm432_vm0, %v570_v30, 0.0 }
  0x34   : > { %443 = vadd.xlane.f32.xlu1 %v442_v34  ;;  %1168 = vadd.xlane.f32.xlu0 %v1167_v35  ;;  %v10466_v34 = vld [vmem:[%s10281_s14 + $0x68] sm:$0xff]  ;;  %v10469_v35 = vld [vmem:[%s10281_s14 + $0x60] sm:$0xff] }
  0x35   : > { %v1031_v36 = vsel %vm432_vm0, %v10466_v34, 0.0  ;;  %v1028_v37 = vsel %vm432_vm0, %v10469_v35, 0.0 }
  0x38   : > { %604 = vadd.xlane.f32.xlu1 %v603_v38  ;;  %601 = vadd.xlane.f32.xlu0 %v600_v39  ;;  %v1708_v38 = vld [vmem:[%s13415_s6] sm:$0xff]  ;;  %v1132_v39 = vmul.f32 %v10469_v35, %v10469_v35 }
  0x39   : > { %8820 = vmatprep.subr.mxu0 %v1708_v38 }
  0x3a   : > { %8821 = vmatpush3.msra.mxu0 %v1708_v38  ;;  %v1188_v44 = vsel %vm432_vm0, %v1132_v39, 0.0 }
  0x3c   : > { %1014 = vadd.xlane.f32.xlu1 %v1013_v42  ;;  %1011 = vadd.xlane.f32.xlu0 %v1010_v43  ;;  %v10485_v42 = vld [vmem:[%s10310_s17 + $0x50] sm:$0xff] }
  0x3d   : > { %v463_v43 = vsel %vm432_vm0, %v10485_v42, 0.0 }
  0x40   : > { %1171 = vadd.xlane.f32.xlu1 %v1170_v46  ;;  %446 = vadd.xlane.f32.xlu0 %v445_v47  ;;  %v1133_v46 = vmul.f32 %v10466_v34, %v10466_v34  ;;  %v10493_v47 = vld [vmem:[%s10310_s17 + $0x58] sm:$0xff] }
  0x41   : > { %v466_v52 = vsel %vm432_vm0, %v10493_v47, 0.0  ;;  %v573_v3 = vmul.f32 %v10493_v47, %v10493_v47 }
  0x42   : > { %v1191_v53 = vsel %vm432_vm0, %v1133_v46, 0.0 }
  0x44   : > { %449 = vadd.xlane.f32.xlu1 %v448_v50  ;;  %1174 = vadd.xlane.f32.xlu0 %v1173_v51 }
  0x48   : > { %610 = vadd.xlane.f32.xlu1 %v609_v54  ;;  %607 = vadd.xlane.f32.xlu0 %v606_v55  ;;  %v572_v54 = vmul.f32 %v10485_v42, %v10485_v42 }
  0x4c   : > { %1020 = vadd.xlane.f32.xlu1 %v1019_v58  ;;  %1017 = vadd.xlane.f32.xlu0 %v1016_v59 }
  0x50   : > { %1177 = vadd.xlane.f32.xlu1 %v1176_v62  ;;  %452 = vadd.xlane.f32.xlu0 %v451_v63  ;;  %v624_v63 = vsel %vm432_vm0, %v572_v54, 0.0 }
  0x54   : > { %455 = vadd.xlane.f32.xlu1 %v454_v5  ;;  %1180 = vadd.xlane.f32.xlu0 %v1179_v6 }
  0x58   : > { %616 = vadd.xlane.f32.xlu1 %v615_v10  ;;  %613 = vadd.xlane.f32.xlu0 %v612_v11 }
  0x5c   : > { %1026 = vadd.xlane.f32.xlu1 %v1025_v15  ;;  %1023 = vadd.xlane.f32.xlu0 %v1022_v16  ;;  %v627_v16 = vsel %vm432_vm0, %v573_v3, 0.0 }
  0x60   : > { %1183 = vadd.xlane.f32.xlu1 %v1182_v20  ;;  %458 = vadd.xlane.f32.xlu0 %v457_v21 }
  0x64   : > { %461 = vadd.xlane.f32.xlu1 %v460_v26  ;;  %1186 = vadd.xlane.f32.xlu0 %v1185_v27 }
  0x68   : > { %622 = vadd.xlane.f32.xlu1 %v621_v31  ;;  %619 = vadd.xlane.f32.xlu0 %v618_v32 }
  0x6c   : > { %1032 = vadd.xlane.f32.xlu1 %v1031_v36  ;;  %1029 = vadd.xlane.f32.xlu0 %v1028_v37 }
  0x7d   : > { %1582 = vrot.lane.b32.xlu1 %v10290_v2, %s10215_s18 }
  0x82   : > { %1580 = vrot.lane.b32.xlu0 %v10287_v1, %s10215_s18 }
  0xa1   : > { %v1003_v48 = vpop.xlane.xlu1 %1002  ;;  %v994_v50 = vpop.xlane.xlu0 %993  ;;  %464 = vadd.xlane.f32.xlu1 %v463_v43  ;;  %1189 = vadd.xlane.f32.xlu0 %v1188_v44 }
  0xa2   : > { %v1088_v51 = vmul.f32 0.25, %v994_v50  ;;  %v10504_v26 = vmul.f32 0.25, %v1003_v48 }
  0xa4   : > { %v1280_v55 = vmul.f32 %v1088_v51, %v1088_v51  ;;  %v1283_v37 = vmul.f32 %v10504_v26, %v10504_v26  ;;  %v1344_v48 = vsub.f32 %v10287_v1, %v1088_v51  ;;  %v10522_v1 = vld [vmem:[%s13413_s4] ss:$0 sm:$0xff] }
  0xa5   : > { %v1154_v58 = vpop.xlane.xlu1 %1153  ;;  %v997_v59 = vpop.xlane.xlu0 %996  ;;  %467 = vadd.xlane.f32.xlu1 %v466_v52  ;;  %1192 = vadd.xlane.f32.xlu0 %v1191_v53 }
  0xa6   : > { %v1248_v60 = vmul.f32 0.25, %v1154_v58  ;;  %v1089_v62 = vmul.f32 0.25, %v997_v59 }
  0xa8   : > { %v1312_v5 = vsub.f32 %v1248_v60, %v1280_v55  ;;  %v1281_v6 = vmul.f32 %v1089_v62, %v1089_v62  ;;  %v1345_v51 = vsub.f32 %v10290_v2, %v1089_v62 }
  0xa9   : > { %v1157_v7 = vpop.xlane.xlu1 %1156  ;;  %v1000_v8 = vpop.xlane.xlu0 %999  ;;  %625 = vadd.xlane.f32.xlu0 %v624_v63 }
  0xaa   : > { %v1376_v10 = vadd.f32 1e-06, %v1312_v5  ;;  %v1249_v11 = vmul.f32 0.25, %v1157_v7  ;;  %v1090_v15 = vmul.f32 0.25, %v1000_v8 }
  0xac   : > { %9728 = vrsqrt.f32 %v1376_v10  ;;  %v1313_v18 = vsub.f32 %v1249_v11, %v1281_v6  ;;  %v1282_v20 = vmul.f32 %v1090_v15, %v1090_v15  ;;  %v1346_v2 = vsub.f32 %v10304_v9, %v1090_v15 }
  0xad   : > { %v1160_v21 = vpop.xlane.xlu1 %1159  ;;  %628 = vadd.xlane.f32.xlu0 %v627_v16  ;;  %v435_v22 = vpop.xlane.xlu0 %434  ;;  %v1347_v15 = vsub.f32 %v10284_v0, %v10504_v26 }
  0xae   : > { %v1377_v27 = vadd.f32 1e-06, %v1313_v18  ;;  %v1250_v28 = vmul.f32 0.25, %v1160_v21  ;;  %v10506_v31 = vmul.f32 0.25, %v435_v22  ;;  %v10533_v21 = vld [vmem:[%s13414_s5] ss:$0 sm:$0xff] }
  0xb0   : > { %9730 = vrsqrt.f32 %v1377_v27  ;;  %v1314_v30 = vsub.f32 %v1250_v28, %v1282_v20  ;;  %v722_v44 = vmul.f32 %v10506_v31, %v10506_v31 }
  0xb1   : > { %v438_v32 = vpop.xlane.xlu1 %437  ;;  %v1163_v36 = vpop.xlane.xlu0 %1162 }
  0xb2   : > { %v1378_v38 = vadd.f32 1e-06, %v1314_v30  ;;  %v10510_v39 = vmul.f32 0.25, %v438_v32  ;;  %v1251_v43 = vmul.f32 0.25, %v1163_v36 }
  0xb4   : > { %9732 = vrsqrt.f32 %v1378_v38  ;;  %v1315_v46 = vsub.f32 %v1251_v43, %v1283_v37  ;;  %v723_v54 = vmul.f32 %v10510_v39, %v10510_v39 }
  0xb5   : > { %v599_v50 = vpop.xlane.xlu1 %598  ;;  %v596_v52 = vpop.xlane.xlu0 %595 }
  0xb6   : > { %v9729_v53 = vpop.eup %9728  ;;  %v1379_v55 = vadd.f32 1e-06, %v1315_v46  ;;  %v691_v58 = vmul.f32 0.25, %v599_v50  ;;  %v690_v59 = vmul.f32 0.25, %v596_v52  ;;  %1584 = vrot.lane.b32.xlu1 %v10304_v9, %s10215_s18 }
  0xb7   : > { %v1440_v60 = vmul.f32 %v9729_v53, %v1344_v48 }
  0xb8   : > { %9734 = vrsqrt.f32 %v1379_v55  ;;  %v755_v63 = vsub.f32 %v691_v58, %v723_v54  ;;  %v754_v3 = vsub.f32 %v690_v59, %v722_v44 }
  0xb9   : > { %v1009_v5 = vpop.xlane.xlu1 %1008  ;;  %v1006_v6 = vpop.xlane.xlu0 %1005  ;;  %v1478_v18 = vmul.f32 %v10522_v1, %v1440_v60 }
  0xba   : > { %v9731_v7 = vpop.eup %9730  ;;  %v819_v8 = vadd.f32 1e-06, %v755_v63  ;;  %v818_v10 = vadd.f32 1e-06, %v754_v3  ;;  %v10525_v11 = vmul.f32 0.25, %v1006_v6  ;;  %v10537_v30 = vmul.f32 0.25, %v1009_v5 }
  0xbb   : > { %v1441_v16 = vmul.f32 %v9731_v7, %v1345_v51  ;;  %v10540_v36 = vadd.f32 %v10533_v21, %v1478_v18  ;;  %v786_v3 = vsub.f32 %v10318_v13, %v10506_v31  ;;  %v787_v51 = vsub.f32 %v10326_v17, %v10510_v39 }
  0xbc   : > { %9736 = vrsqrt.f32 %v819_v8  ;;  %v1284_v20 = vmul.f32 %v10525_v11, %v10525_v11  ;;  %v1285_v53 = vmul.f32 %v10537_v30, %v10537_v30 }
  0xbd   : > { %9738 = vrsqrt.f32 %v818_v10  ;;  %v1166_v62 = vpop.xlane.xlu1 %1165  ;;  %v441_v22 = vpop.xlane.xlu0 %440  ;;  %v1479_v27 = vmul.f32 %v10522_v1, %v1441_v16  ;;  %13571 = vst [vmem:[#allocation2_spill] sm:$0xff] %v10540_v36 }
  0xbe   : > { %v9733_v28 = vpop.eup %9732  ;;  %v1252_v32 = vmul.f32 0.25, %v1166_v62  ;;  %v10545_v44 = vmul.f32 0.25, %v441_v22 }
  0xbf   : > { %v10543_v37 = vadd.f32 %v10533_v21, %v1479_v27  ;;  %v1442_v38 = vmul.f32 %v9733_v28, %v1346_v2  ;;  %v10591_v28 = vld [vmem:[%s13412_s3] ss:$0 sm:$0xff] }
  0xc0   : > { %v1316_v43 = vsub.f32 %v1252_v32, %v1284_v20  ;;  %v724_v60 = vmul.f32 %v10545_v44, %v10545_v44  ;;  %v10580_v20 = vld [vmem:[%s13411_s2] ss:$0 sm:$0xff] }
  0xc1   : > { %13572 = vst [vmem:[#allocation3_spill] sm:$0xff] %v10543_v37  ;;  %v444_v46 = vpop.xlane.xlu1 %443  ;;  %v1169_v48 = vpop.xlane.xlu0 %1168  ;;  %v9318_v50 = vpack.c.bf16 %v10543_v37, %v10540_v36  ;;  %v1480_v59 = vmul.f32 %v10522_v1, %v1442_v38 }
  0xc2   : > { %v9735_v52 = vpop.eup %9734  ;;  %v1380_v54 = vadd.f32 1e-06, %v1316_v43  ;;  %v10559_v55 = vmul.f32 0.25, %v444_v46  ;;  %v1253_v58 = vmul.f32 0.25, %v1169_v48 }
  0xc3   : > { %9320 = vmatprep.subr.msk.bf16.mxu1 %vm10549_vm1, %v9318_v50  ;;  %1586 = vrot.lane.b32.xlu0 %v10284_v0, %s10215_s18  ;;  %v1443_v26 = vmul.f32 %v9735_v52, %v1347_v15  ;;  %v10583_v2 = vadd.f32 %v10533_v21, %v1480_v59 }
  0xc4   : > { %9740 = vrsqrt.f32 %v1380_v54  ;;  %v1317_v63 = vsub.f32 %v1253_v58, %v1285_v53  ;;  %9323 = vmatpush3.bf16.xpose.msk.msra.mxu1 %vm10549_vm1, %v9318_v50  ;;  %v725_v8 = vmul.f32 %v10559_v55, %v10559_v55 }
  0xc5   : > { %v605_v5 = vpop.xlane.xlu1 %604  ;;  %v602_v6 = vpop.xlane.xlu0 %601  ;;  %v1481_v0 = vmul.f32 %v10522_v1, %v1443_v26  ;;  %13575 = vst [vmem:[#allocation4_spill] sm:$0xff] %v10583_v2  ;;  %v1348_v26 = vsub.f32 %v10341_v25, %v10525_v11  ;;  %v1349_v11 = vsub.f32 %v10338_v24, %v10537_v30 }
  0xc6   : > { %v9737_v7 = vpop.eup %9736  ;;  %v1381_v10 = vadd.f32 1e-06, %v1317_v63  ;;  %v693_v16 = vmul.f32 0.25, %v605_v5  ;;  %v692_v18 = vmul.f32 0.25, %v602_v6 }
  0xc7   : > { %v9739_v31 = vpop.eup %9738  ;;  %v10586_v39 = vadd.f32 %v10533_v21, %v1481_v0  ;;  %v883_v62 = vmul.f32 %v9737_v7, %v787_v51 }
  0xc8   : > { %9742 = vrsqrt.f32 %v1381_v10  ;;  %v757_v22 = vsub.f32 %v693_v16, %v725_v8  ;;  %v756_v27 = vsub.f32 %v692_v18, %v724_v60  ;;  %v882_v32 = vmul.f32 %v9739_v31, %v786_v3 }
  0xc9   : > { %13576 = vst [vmem:[#allocation5_spill] sm:$0xff] %v10586_v39  ;;  %v1015_v38 = vpop.xlane.xlu1 %1014  ;;  %v1012_v43 = vpop.xlane.xlu0 %1011  ;;  %v9324_v15 = vpack.c.bf16 %v10586_v39, %v10583_v2  ;;  %v921_v46 = vmul.f32 %v10580_v20, %v883_v62 }
  0xca   : > { %v821_v48 = vadd.f32 1e-06, %v757_v22  ;;  %v820_v50 = vadd.f32 1e-06, %v756_v27  ;;  %v10596_v52 = vmul.f32 0.25, %v1012_v43  ;;  %v920_v53 = vmul.f32 %v10580_v20, %v882_v32 }
  0xcb   : > { %9326 = vmatprep.subr.msk.bf16.mxu1 %vm10549_vm1, %v9324_v15  ;;  %v959_v54 = vadd.f32 %v10591_v28, %v921_v46  ;;  %v10607_v51 = vmul.f32 0.25, %v1015_v38  ;;  %v10627_v46 = vld [vmem:[%s10281_s14 + $0x70] sm:$0xff] }
  0xcc   : > { %9744 = vrsqrt.f32 %v821_v48  ;;  %v1286_v58 = vmul.f32 %v10596_v52, %v10596_v52  ;;  %v958_v60 = vadd.f32 %v10591_v28, %v920_v53  ;;  %v789_v48 = vsub.f32 %v10358_v33, %v10559_v55 }
  0xcd   : > { %9746 = vrsqrt.f32 %v820_v50  ;;  %v1172_v59 = vpop.xlane.xlu1 %1171  ;;  %v447_v63 = vpop.xlane.xlu0 %446  ;;  %v1287_v31 = vmul.f32 %v10607_v51, %v10607_v51 }
  0xce   : > { %v9741_v3 = vpop.eup %9740  ;;  %v1254_v5 = vmul.f32 0.25, %v1172_v59  ;;  %8874 = vmatprep.mubr.msk.f32.mxu1 %vm432_vm0, %v958_v60  ;;  %v10610_v6 = vpack.c.bf16 %v959_v54, %v958_v60  ;;  %v10612_v8 = vmul.f32 0.25, %v447_v63 }
  0xcf   : > { %v1444_v0 = vmul.f32 %v9741_v3, %v1348_v26  ;;  %8875 = vmatmul.mubr.msk.f32.vlgmr.msra.gmra.mrb[0].mxu1 %vm432_vm0, %v959_v54 }
  0xd0   : > { %13577 = vst [vmem:[#allocation6_spill] sm:$0xff] %v10610_v6  ;;  %v1318_v7 = vsub.f32 %v1254_v5, %v1286_v58  ;;  %9329 = vmatpush3.bf16.xpose.msk.msra.mxu1 %vm10549_vm1, %v9324_v15  ;;  %v726_v30 = vmul.f32 %v10612_v8, %v10612_v8  ;;  %v788_v15 = vsub.f32 %v10350_v29, %v10545_v44 }
  0xd1   : > { %v450_v10 = vpop.xlane.xlu1 %449  ;;  %v1175_v16 = vpop.xlane.xlu0 %1174  ;;  %v1482_v38 = vmul.f32 %v10522_v1, %v1444_v0  ;;  %v1034_v0 = vsel %vm432_vm0, %v10627_v46, 0.0 }
  0xd2   : > { %v9743_v18 = vpop.eup %9742  ;;  %v1382_v62 = vadd.f32 1e-06, %v1318_v7  ;;  %v10621_v22 = vmul.f32 0.25, %v450_v10  ;;  %v1255_v27 = vmul.f32 0.25, %v1175_v16 }
  0xd3   : > { %v1445_v32 = vmul.f32 %v9743_v18, %v1349_v11  ;;  %v10639_v44 = vadd.f32 %v10533_v21, %v1482_v38 }
  0xd4   : > { %9748 = vrsqrt.f32 %v1382_v62  ;;  %v1319_v43 = vsub.f32 %v1255_v27, %v1287_v31  ;;  %v727_v26 = vmul.f32 %v10621_v22, %v10621_v22 }
  0xd5   : > { %v611_v50 = vpop.xlane.xlu1 %610  ;;  %v608_v53 = vpop.xlane.xlu0 %607  ;;  %v1483_v54 = vmul.f32 %v10522_v1, %v1445_v32  ;;  %13578 = vst [vmem:[#allocation7_spill] sm:$0xff] %v10639_v44 }
  0xd6   : > { %v9745_v58 = vpop.eup %9744  ;;  %v1383_v59 = vadd.f32 1e-06, %v1319_v43  ;;  %v695_v60 = vmul.f32 0.25, %v611_v50  ;;  %v694_v63 = vmul.f32 0.25, %v608_v53 }
  0xd7   : > { %v9747_v3 = vpop.eup %9746  ;;  %v885_v5 = vmul.f32 %v9745_v58, %v789_v48  ;;  %v10642_v33 = vadd.f32 %v10533_v21, %v1483_v54  ;;  %v1350_v48 = vsub.f32 %v10373_v41, %v10596_v52  ;;  %v1351_v52 = vsub.f32 %v10370_v40, %v10607_v51 }
  0xd8   : > { %9750 = vrsqrt.f32 %v1383_v59  ;;  %v759_v55 = vsub.f32 %v695_v60, %v727_v26  ;;  %v758_v7 = vsub.f32 %v694_v63, %v726_v30  ;;  %v884_v11 = vmul.f32 %v9747_v3, %v788_v15  ;;  %v10656_v15 = vld [vmem:[%s10281_s14 + $0x78] sm:$0xff] }
  0xd9   : > { %13579 = vst [vmem:[#allocation8_spill] sm:$0xff] %v10642_v33  ;;  %v1021_v10 = vpop.xlane.xlu1 %1020  ;;  %v1018_v16 = vpop.xlane.xlu0 %1017  ;;  %v9330_v18 = vpack.c.bf16 %v10642_v33, %v10639_v44  ;;  %v923_v31 = vmul.f32 %v10580_v20, %v885_v5  ;;  %v1037_v60 = vsel %vm432_vm0, %v10656_v15, 0.0 }
  0xda   : > { %v823_v62 = vadd.f32 1e-06, %v759_v55  ;;  %v822_v27 = vadd.f32 1e-06, %v758_v7  ;;  %v10647_v32 = vmul.f32 0.25, %v1018_v16  ;;  %1035 = vadd.xlane.f32.xlu1 %v1034_v0  ;;  %v922_v38 = vmul.f32 %v10580_v20, %v884_v11 }
  0xdb   : > { %9332 = vmatprep.subr.msk.bf16.mxu1 %vm10549_vm1, %v9330_v18  ;;  %v961_v30 = vadd.f32 %v10591_v28, %v923_v31  ;;  %v10661_v26 = vmul.f32 0.25, %v1021_v10 }
  0xdc   : > { %9752 = vrsqrt.f32 %v823_v62  ;;  %v1288_v43 = vmul.f32 %v10647_v32, %v10647_v32  ;;  %v960_v53 = vadd.f32 %v10591_v28, %v922_v38 }
  0xdd   : > { %9754 = vrsqrt.f32 %v822_v27  ;;  %v1178_v50 = vpop.xlane.xlu1 %1177  ;;  %v453_v54 = vpop.xlane.xlu0 %452  ;;  %v1289_v10 = vmul.f32 %v10661_v26, %v10661_v26 }
  0xde   : > { %v9749_v58 = vpop.eup %9748  ;;  %v1256_v59 = vmul.f32 0.25, %v1178_v50  ;;  %8881 = vmatprep.mubr.msk.f32.mxu1 %vm432_vm0, %v960_v53  ;;  %v10666_v3 = vpack.c.bf16 %v961_v30, %v960_v53  ;;  %v10668_v0 = vmul.f32 0.25, %v453_v54 }
  0xdf   : > { %v1446_v63 = vmul.f32 %v9749_v58, %v1350_v48  ;;  %8882 = vmatmul.mubr.msk.f32.vlgmr.msra.gmra.mrb[2].mxu1 %vm432_vm0, %v961_v30 }
  0xe0   : > { %13580 = vst [vmem:[#allocation9_spill] sm:$0xff] %v10666_v3  ;;  %v1320_v5 = vsub.f32 %v1256_v59, %v1288_v43  ;;  %9335 = vmatpush3.bf16.xpose.msk.msra.mxu1 %vm10549_vm1, %v9330_v18  ;;  %v728_v51 = vmul.f32 %v10668_v0, %v10668_v0  ;;  %v790_v18 = vsub.f32 %v10382_v45, %v10612_v8 }
  0xe1   : > { %v456_v55 = vpop.xlane.xlu1 %455  ;;  %v1181_v7 = vpop.xlane.xlu0 %1180  ;;  %v1484_v38 = vmul.f32 %v10522_v1, %v1446_v63  ;;  %v791_v43 = vsub.f32 %v10390_v49, %v10621_v22 }
  0xe2   : > { %v9751_v11 = vpop.eup %9750  ;;  %v1384_v16 = vadd.f32 1e-06, %v1320_v5  ;;  %v10677_v31 = vmul.f32 0.25, %v456_v55  ;;  %v1257_v62 = vmul.f32 0.25, %v1181_v7  ;;  %1038 = vadd.xlane.f32.xlu0 %v1037_v60 }
  0xe3   : > { %v1447_v27 = vmul.f32 %v9751_v11, %v1351_v52  ;;  %v10690_v55 = vadd.f32 %v10533_v21, %v1484_v38 }
  0xe4   : > { %9756 = vrsqrt.f32 %v1384_v16  ;;  %v1321_v30 = vsub.f32 %v1257_v62, %v1289_v10  ;;  %v729_v58 = vmul.f32 %v10677_v31, %v10677_v31 }
  0xe5   : > { %v617_v48 = vpop.xlane.xlu1 %616  ;;  %v614_v50 = vpop.xlane.xlu0 %613  ;;  %v1485_v53 = vmul.f32 %v10522_v1, %v1447_v27  ;;  %13581 = vst [vmem:[#allocation10_spill] sm:$0xff] %v10690_v55 }
  0xe6   : > { %v9753_v54 = vpop.eup %9752  ;;  %v1385_v59 = vadd.f32 1e-06, %v1321_v30  ;;  %v697_v60 = vmul.f32 0.25, %v617_v48  ;;  %v696_v63 = vmul.f32 0.25, %v614_v50 }
  0xe7   : > { %v9755_v5 = vpop.eup %9754  ;;  %v887_v52 = vmul.f32 %v9753_v54, %v791_v43  ;;  %v10693_v45 = vadd.f32 %v10533_v21, %v1485_v53  ;;  %v1352_v43 = vsub.f32 %v10405_v57, %v10647_v32  ;;  %v1353_v57 = vsub.f32 %v10402_v56, %v10661_v26 }
  0xe8   : > { %9758 = vrsqrt.f32 %v1385_v59  ;;  %v761_v49 = vsub.f32 %v697_v60, %v729_v58  ;;  %v760_v8 = vsub.f32 %v696_v63, %v728_v51  ;;  %v886_v22 = vmul.f32 %v9755_v5, %v790_v18 }
  0xe9   : > { %13582 = vst [vmem:[#allocation11_spill] sm:$0xff] %v10693_v45  ;;  %v1027_v7 = vpop.xlane.xlu1 %1026  ;;  %v1024_v11 = vpop.xlane.xlu0 %1023  ;;  %v9336_v10 = vpack.c.bf16 %v10693_v45, %v10690_v55  ;;  %v925_v16 = vmul.f32 %v10580_v20, %v887_v52  ;;  %v792_v26 = vsub.f32 %v10414_v61, %v10668_v0 }
  0xea   : > { %v825_v62 = vadd.f32 1e-06, %v761_v49  ;;  %v824_v27 = vadd.f32 1e-06, %v760_v8  ;;  %v10698_v30 = vmul.f32 0.25, %v1024_v11  ;;  %v924_v38 = vmul.f32 %v10580_v20, %v886_v22 }
  0xeb   : > { %1588 = vrot.lane.b32.xlu1 %v10341_v25, %s10215_s18  ;;  %9338 = vmatprep.subr.msk.bf16.mxu1 %vm10549_vm1, %v9336_v10  ;;  %v963_v51 = vadd.f32 %v10591_v28, %v925_v16  ;;  %v10711_v54 = vmul.f32 0.25, %v1027_v7 }
  0xec   : > { %9760 = vrsqrt.f32 %v825_v62  ;;  %v1290_v18 = vmul.f32 %v10698_v30, %v10698_v30  ;;  %v962_v50 = vadd.f32 %v10591_v28, %v924_v38 }
  0xed   : > { %9762 = vrsqrt.f32 %v824_v27  ;;  %v1184_v48 = vpop.xlane.xlu1 %1183  ;;  %v459_v53 = vpop.xlane.xlu0 %458  ;;  %v1291_v8 = vmul.f32 %v10711_v54, %v10711_v54 }
  0xee   : > { %v9757_v25 = vpop.eup %9756  ;;  %v1258_v58 = vmul.f32 0.25, %v1184_v48  ;;  %8888 = vmatprep.mubr.msk.f32.mxu1 %vm432_vm0, %v962_v50  ;;  %v10714_v60 = vpack.c.bf16 %v963_v51, %v962_v50  ;;  %v10716_v5 = vmul.f32 0.25, %v459_v53 }
  0xef   : > { %v1448_v59 = vmul.f32 %v9757_v25, %v1352_v43  ;;  %8889 = vmatmul.mubr.msk.f32.vlgmr.msra.gmra.mrb[4].mxu1 %vm432_vm0, %v963_v51 }
  0xf0   : > { %13583 = vst [vmem:[#allocation12_spill] sm:$0xff] %v10714_v60  ;;  %v1322_v63 = vsub.f32 %v1258_v58, %v1290_v18  ;;  %9341 = vmatpush3.bf16.xpose.msk.msra.mxu1 %vm10549_vm1, %v9336_v10  ;;  %v730_v27 = vmul.f32 %v10716_v5, %v10716_v5  ;;  %v793_v10 = vsub.f32 %v10422_v4, %v10677_v31  ;;  %v11252_v60 = vld [vmem:[%s10310_s17 + $0xb8] sm:$0xff] }
  0xf1   : > { %v462_v32 = vpop.xlane.xlu1 %461  ;;  %v1187_v52 = vpop.xlane.xlu0 %1186  ;;  %v1486_v62 = vmul.f32 %v10522_v1, %v1448_v59 }
  0xf2   : > { %v9759_v49 = vpop.eup %9758  ;;  %v1386_v22 = vadd.f32 1e-06, %v1322_v63  ;;  %v539_v7 = vmul.f32 0.25, %v462_v32  ;;  %v1259_v11 = vmul.f32 0.25, %v1187_v52 }
  0xf3   : > { %v1449_v16 = vmul.f32 %v9759_v49, %v1353_v57  ;;  %v10734_v63 = vadd.f32 %v10533_v21, %v1486_v62 }
  0xf4   : > { %9764 = vrsqrt.f32 %v1386_v22  ;;  %v1323_v56 = vsub.f32 %v1259_v11, %v1291_v8  ;;  %v731_v48 = vmul.f32 %v539_v7, %v539_v7 }
  0xf5   : > { %v623_v38 = vpop.xlane.xlu1 %622  ;;  %v620_v51 = vpop.xlane.xlu0 %619  ;;  %v1487_v18 = vmul.f32 %v10522_v1, %v1449_v16  ;;  %13584 = vst [vmem:[#allocation13_spill] sm:$0xff] %v10734_v63 }
  0xf6   : > { %v9761_v43 = vpop.eup %9760  ;;  %v1387_v50 = vadd.f32 1e-06, %v1323_v56  ;;  %v699_v53 = vmul.f32 0.25, %v623_v38  ;;  %v698_v25 = vmul.f32 0.25, %v620_v51 }
  0xf7   : > { %v9763_v58 = vpop.eup %9762  ;;  %v889_v59 = vmul.f32 %v9761_v43, %v793_v10  ;;  %v10737_v57 = vadd.f32 %v10533_v21, %v1487_v18  ;;  %v795_v43 = vsub.f32 %v10454_v23, %v539_v7  ;;  %v10784_v7 = vld [vmem:[%s10310_s17 + $0x60] sm:$0xff] }
  0xf8   : > { %9766 = vrsqrt.f32 %v1387_v50  ;;  %v763_v61 = vsub.f32 %v699_v53, %v731_v48  ;;  %v762_v4 = vsub.f32 %v698_v25, %v730_v27  ;;  %1590 = vrot.lane.b32.xlu0 %v10338_v24, %s10215_s18  ;;  %v888_v0 = vmul.f32 %v9763_v58, %v792_v26 }
  0xf9   : > { %13585 = vst [vmem:[#allocation14_spill] sm:$0xff] %v10737_v57  ;;  %v10741_v31 = vpop.xlane.xlu1 %1032  ;;  %v10743_v32 = vpop.xlane.xlu0 %1029  ;;  %v9342_v52 = vpack.c.bf16 %v10737_v57, %v10734_v63  ;;  %v927_v49 = vmul.f32 %v10580_v20, %v889_v59  ;;  %v1354_v24 = vsub.f32 %v10437_v14, %v10698_v30  ;;  %v1355_v14 = vsub.f32 %v10434_v12, %v10711_v54 }
  0xfa   : > { %v827_v8 = vadd.f32 1e-06, %v763_v61  ;;  %v826_v22 = vadd.f32 1e-06, %v762_v4  ;;  %v926_v11 = vmul.f32 %v10580_v20, %v888_v0  ;;  %v794_v53 = vsub.f32 %v10446_v19, %v10716_v5 }
  0xfb   : > { %9344 = vmatprep.subr.msk.bf16.mxu1 %vm10549_vm1, %v9342_v52  ;;  %v965_v16 = vadd.f32 %v10591_v28, %v927_v49  ;;  %v469_v0 = vsel %vm432_vm0, %v10784_v7, 0.0 }
  0xfc   : > { %9768 = vrsqrt.f32 %v827_v8  ;;  %v964_v27 = vadd.f32 %v10591_v28, %v926_v11  ;;  %v10805_v11 = vld [vmem:[%s10310_s17 + $0x68] sm:$0xff] }
  0xfd   : > { %9770 = vrsqrt.f32 %v826_v22  ;;  %v1583_v62 = vpop.permute.xlu1 %1582  ;;  %v1581_v56 = vpop.permute.xlu0 %1580  ;;  %v1134_v22 = vmul.f32 %v10627_v46, %v10627_v46 }
  0xfe   : > { %v9765_v26 = vpop.eup %9764  ;;  %v1677_v10 = vsel %vm432_vm0, %v10326_v17, %v1583_v62  ;;  %v1676_v38 = vsel %vm432_vm0, %v10318_v13, %v1581_v56  ;;  %8895 = vmatprep.mubr.msk.f32.mxu1 %vm432_vm0, %v964_v27  ;;  %v10761_v18 = vpack.c.bf16 %v965_v16, %v964_v27  ;;  %v574_v62 = vmul.f32 %v10784_v7, %v10784_v7 }
  0xff   : > { %8822 = vmatprep.mubr.msk.f32.mxu0 %vm1716_vm2, %v1676_v38  ;;  %v1450_v51 = vmul.f32 %v9765_v26, %v1354_v24  ;;  %8896 = vmatmul.mubr.msk.f32.vlgmr.msra.gmra.mrb[6].mxu1 %vm432_vm0, %v965_v16  ;;  %v472_v16 = vsel %vm432_vm0, %v10805_v11, 0.0  ;;  %v1194_v24 = vsel %vm432_vm0, %v1134_v22, 0.0  ;;  %v575_v56 = vmul.f32 %v10805_v11, %v10805_v11 }
 0x100   : > { %13586 = vst [vmem:[#allocation15_spill] sm:$0xff] %v10761_v18  ;;  %8823 = vmatmul.mubr.msk.f32.vlgmr.msra.gmra.mrb[0].mxu0 %vm1716_vm2, %v1677_v10  ;;  %9347 = vmatpush3.bf16.xpose.msk.msra.mxu1 %vm10549_vm1, %v9342_v52  ;;  %v1135_v52 = vmul.f32 %v10656_v15, %v10656_v15  ;;  %v630_v27 = vsel %vm432_vm0, %v574_v62, 0.0  ;;  %v1100_v10 = vmul.f32 0.25, %v10743_v32 }
 0x101   : > { %v1488_v30 = vmul.f32 %v10522_v1, %v1450_v51  ;;  %v633_v26 = vsel %vm432_vm0, %v575_v56, 0.0  ;;  %v10112_v56 = vld [vmem:[%s10310_s17 + $0x18] sm:$0xff] }
 0x102   : > { %v9767_v17 = vpop.eup %9766  ;;  %v1197_v8 = vsel %vm432_vm0, %v1135_v52, 0.0 }
 0x103   : > { %v1451_v13 = vmul.f32 %v9767_v17, %v1355_v14  ;;  %v10775_v12 = vadd.f32 %v10533_v21, %v1488_v30  ;;  %v1101_v14 = vmul.f32 0.25, %v10741_v31  ;;  %v1292_v17 = vmul.f32 %v1100_v10, %v1100_v10 }
 0x105   : > { %v1489_v48 = vmul.f32 %v10522_v1, %v1451_v13  ;;  %13587 = vst [vmem:[#allocation16_spill] sm:$0xff] %v10775_v12 }
 0x106   : > { %v9769_v50 = vpop.eup %9768 }
 0x107   : > { %v9771_v25 = vpop.eup %9770  ;;  %v891_v58 = vmul.f32 %v9769_v50, %v795_v43  ;;  %v10778_v54 = vadd.f32 %v10533_v21, %v1489_v48 }
 0x108   : > { %v890_v59 = vmul.f32 %v9771_v25, %v794_v53  ;;  %v1293_v53 = vmul.f32 %v1101_v14, %v1101_v14 }
 0x109   : > { %13588 = vst [vmem:[#allocation17_spill] sm:$0xff] %v10778_v54  ;;  %v9348_v61 = vpack.c.bf16 %v10778_v54, %v10775_v12  ;;  %v929_v23 = vmul.f32 %v10580_v20, %v891_v58 }
 0x10a   : > { %v928_v4 = vmul.f32 %v10580_v20, %v890_v59 }
 0x10b   : > { %9350 = vmatprep.subr.msk.bf16.mxu1 %vm10549_vm1, %v9348_v61  ;;  %v967_v19 = vadd.f32 %v10591_v28, %v929_v23 }
 0x10c   : > { %v966_v5 = vadd.f32 %v10591_v28, %v928_v4 }
 0x10e   : > { %8902 = vmatprep.mubr.msk.f32.mxu1 %vm432_vm0, %v966_v5  ;;  %v10796_v49 = vpack.c.bf16 %v967_v19, %v966_v5 }
 0x10f   : > { %8903 = vmatmul.mubr.msk.f32.vlgmr.msra.gmra.mrb[8].mxu1 %vm432_vm0, %v967_v19  ;;  %470 = vadd.xlane.f32.xlu1 %v469_v0 }
 0x110   : > { %13589 = vst [vmem:[#allocation18_spill] sm:$0xff] %v10796_v49  ;;  %9353 = vmatpush3.bf16.xpose.msk.msra.mxu1 %vm10549_vm1, %v9348_v61 }
 0x113   : > { %1198 = vadd.xlane.f32.xlu1 %v1197_v8 }
 0x117   : > { %473 = vadd.xlane.f32.xlu1 %v472_v16  ;;  %1195 = vadd.xlane.f32.xlu0 %v1194_v24  ;;  %v1356_v16 = vsub.f32 %v10469_v35, %v1100_v10  ;;  %v10833_v35 = vld [vmem:[%s10281_s14 + $0x80] sm:$0xff] }
 0x11b   : > { %631 = vadd.xlane.f32.xlu0 %v630_v27 }
 0x11f   : > { %634 = vadd.xlane.f32.xlu0 %v633_v26 }
 0x128   : > { %1592 = vrot.lane.b32.xlu1 %v10373_v41, %s10215_s18 }
 0x12e   : > { %v465_v38 = vpop.xlane.xlu1 %464  ;;  %v1190_v51 = vpop.xlane.xlu0 %1189 }
 0x12f   : > { %v1260_v13 = vmul.f32 0.25, %v1190_v51  ;;  %v540_v43 = vmul.f32 0.25, %v465_v38  ;;  %v1357_v38 = vsub.f32 %v10466_v34, %v1101_v14  ;;  %v1040_v14 = vsel %vm432_vm0, %v10833_v35, 0.0 }
 0x131   : > { %v1324_v30 = vsub.f32 %v1260_v13, %v1292_v17  ;;  %v732_v41 = vmul.f32 %v540_v43, %v540_v43 }
 0x132   : > { %v468_v48 = vpop.xlane.xlu1 %467  ;;  %v1193_v50 = vpop.xlane.xlu0 %1192 }
 0x133   : > { %v1388_v25 = vadd.f32 1e-06, %v1324_v30  ;;  %v1261_v58 = vmul.f32 0.25, %v1193_v50  ;;  %v541_v23 = vmul.f32 0.25, %v468_v48  ;;  %v796_v30 = vsub.f32 %v10485_v42, %v540_v43 }
 0x135   : > { %9772 = vrsqrt.f32 %v1388_v25  ;;  %v1325_v59 = vsub.f32 %v1261_v58, %v1293_v53  ;;  %1594 = vrot.lane.b32.xlu0 %v10370_v40, %s10215_s18  ;;  %v733_v52 = vmul.f32 %v541_v23, %v541_v23  ;;  %v797_v25 = vsub.f32 %v10493_v47, %v541_v23  ;;  %v10849_v58 = vld [vmem:[%s10281_s14 + $0x90] sm:$0xff]  ;;  %v10859_v23 = vld [vmem:[%s10281_s14 + $0x98] sm:$0xff] }
 0x136   : > { %v1585_v32 = vpop.permute.xlu1 %1584  ;;  %v626_v61 = vpop.xlane.xlu0 %625 }
 0x137   : > { %v1389_v4 = vadd.f32 1e-06, %v1325_v59  ;;  %v1678_v31 = vsel %vm432_vm0, %v10350_v29, %v1585_v32  ;;  %v700_v19 = vmul.f32 0.25, %v626_v61  ;;  %v1046_v61 = vsel %vm432_vm0, %v10849_v58, 0.0 }
 0x138   : > { %8825 = vmatprep.mubr.msk.f32.mxu0 %vm1716_vm2, %v1678_v31 }
 0x139   : > { %9774 = vrsqrt.f32 %v1389_v4  ;;  %v764_v5 = vsub.f32 %v700_v19, %v732_v41  ;;  %v10862_v4 = vld [vmem:[%s10281_s14 + $0x88] sm:$0xff]  ;;  %v1049_v19 = vsel %vm432_vm0, %v10859_v23, 0.0 }
 0x13a   : > { %v629_v0 = vpop.xlane.xlu0 %628 }
 0x13b   : > { %v828_v8 = vadd.f32 1e-06, %v764_v5  ;;  %v701_v22 = vmul.f32 0.25, %v629_v0  ;;  %v1043_v5 = vsel %vm432_vm0, %v10862_v4, 0.0 }
 0x13d   : > { %9776 = vrsqrt.f32 %v828_v8  ;;  %v765_v40 = vsub.f32 %v701_v22, %v733_v52  ;;  %v10113_v52 = vld [vmem:[%s10281_s14 + $0x48] sm:$0xff]  ;;  %v10114_v22 = vld [vmem:[%s10281_s14 + $0x40] sm:$0xff] }
 0x13e   : > { %v1587_v24 = vpop.permute.xlu0 %1586 }
 0x13f   : > { %v9773_v62 = vpop.eup %9772  ;;  %v829_v27 = vadd.f32 1e-06, %v765_v40  ;;  %v1679_v29 = vsel %vm432_vm0, %v10112_v56, %v1587_v24  ;;  %v10116_v56 = vld [vmem:[%s10310_s17 + $0x28] sm:$0xff] }
 0x140   : > { %8826 = vmatmul.mubr.msk.f32.gmra.mrb[2].mxu0 %vm1716_vm2, %v1679_v29  ;;  %v1452_v26 = vmul.f32 %v9773_v62, %v1356_v16  ;;  %v10115_v16 = vld [vmem:[%s10310_s17 + $0x20] sm:$0xff] }
 0x141   : > { %9778 = vrsqrt.f32 %v829_v27 }
 0x142   : > { %v1490_v13 = vmul.f32 %v10522_v1, %v1452_v26  ;;  %v1136_v26 = vmul.f32 %v10833_v35, %v10833_v35 }
 0x143   : > { %v9775_v51 = vpop.eup %9774 }
 0x144   : > { %v1453_v17 = vmul.f32 %v9775_v51, %v1357_v38  ;;  %v10837_v50 = vadd.f32 %v10533_v21, %v1490_v13  ;;  %v10887_v38 = vld [vmem:[%s10310_s17 + $0x70] sm:$0xff]  ;;  %v1138_v13 = vmul.f32 %v10849_v58, %v10849_v58 }
 0x145   : > { %v475_v51 = vsel %vm432_vm0, %v10887_v38, 0.0 }
 0x146   : > { %v1491_v10 = vmul.f32 %v10522_v1, %v1453_v17  ;;  %13590 = vst [vmem:[#allocation19_spill] sm:$0xff] %v10837_v50  ;;  %v1200_v17 = vsel %vm432_vm0, %v1136_v26, 0.0 }
 0x147   : > { %v9777_v48 = vpop.eup %9776 }
 0x148   : > { %v10840_v53 = vadd.f32 %v10533_v21, %v1491_v10  ;;  %v892_v34 = vmul.f32 %v9777_v48, %v796_v30  ;;  %v1137_v30 = vmul.f32 %v10862_v4, %v10862_v4  ;;  %v1206_v10 = vsel %vm432_vm0, %v1138_v13, 0.0 }
 0x14a   : > { %13591 = vst [vmem:[#allocation20_spill] sm:$0xff] %v10840_v53  ;;  %v9354_v42 = vpack.c.bf16 %v10840_v53, %v10837_v50  ;;  %v930_v43 = vmul.f32 %v10580_v20, %v892_v34  ;;  %v1203_v48 = vsel %vm432_vm0, %v1137_v30, 0.0  ;;  %v1139_v34 = vmul.f32 %v10859_v23, %v10859_v23  ;;  %v10118_v30 = vld [vmem:[%s10310_s17 + $0x30] sm:$0xff]  ;;  %v11040_v53 = vld [vmem:[%s10310_s17 + $0x98] sm:$0xff] }
 0x14b   : > { %v9779_v59 = vpop.eup %9778 }
 0x14c   : > { %v893_v41 = vmul.f32 %v9779_v59, %v797_v25  ;;  %1041 = vadd.xlane.f32.xlu1 %v1040_v14  ;;  %9356 = vmatprep.subr.msk.bf16.mxu1 %vm10549_vm1, %v9354_v42  ;;  %v968_v32 = vadd.f32 %v10591_v28, %v930_v43  ;;  %v10901_v14 = vld [vmem:[%s10310_s17 + $0x78] sm:$0xff]  ;;  %v576_v43 = vmul.f32 %v10887_v38, %v10887_v38 }
 0x14d   : > { %v478_v25 = vsel %vm432_vm0, %v10901_v14, 0.0 }
 0x14e   : > { %8909 = vmatprep.mubr.msk.f32.mxu1 %vm432_vm0, %v968_v32  ;;  %v931_v47 = vmul.f32 %v10580_v20, %v893_v41  ;;  %v636_v59 = vsel %vm432_vm0, %v576_v43, 0.0  ;;  %v577_v41 = vmul.f32 %v10901_v14, %v10901_v14 }
 0x150   : > { %1047 = vadd.xlane.f32.xlu1 %v1046_v61  ;;  %v969_v31 = vadd.f32 %v10591_v28, %v931_v47 }
 0x152   : > { %8910 = vmatmul.mubr.msk.f32.vlgmr.msra.gmra.mrb[10].mxu1 %vm432_vm0, %v969_v31  ;;  %v10870_v0 = vpack.c.bf16 %v969_v31, %v968_v32  ;;  %v639_v32 = vsel %vm432_vm0, %v577_v41, 0.0 }
 0x153   : > { %9359 = vmatpush3.bf16.xpose.msk.msra.mxu1 %vm10549_vm1, %v9354_v42  ;;  %v1209_v42 = vsel %vm432_vm0, %v1139_v34, 0.0 }
 0x154   : > { %13592 = vst [vmem:[#allocation21_spill] sm:$0xff] %v10870_v0  ;;  %1050 = vadd.xlane.f32.xlu1 %v1049_v19  ;;  %1044 = vadd.xlane.f32.xlu0 %v1043_v5 }
 0x165   : > { %1598 = vrot.lane.b32.xlu1 %v10113_v52, %s10215_s18 }
 0x167   : > { %v1036_v8 = vpop.xlane.xlu1 %1035 }
 0x168   : > { %v1102_v52 = vmul.f32 0.25, %v1036_v8 }
 0x16a   : > { %1596 = vrot.lane.b32.xlu0 %v10114_v22, %s10215_s18  ;;  %v10117_v22 = vld [vmem:[%s10281_s14 + $0x50] sm:$0xff]  ;;  %v1294_v26 = vmul.f32 %v1102_v52, %v1102_v52 }
 0x16b   : > { %v1589_v40 = vpop.permute.xlu1 %1588 }
 0x16c   : > { %v1680_v24 = vsel %vm432_vm0, %v10115_v16, %v1589_v40 }
 0x16d   : > { %8828 = vmatprep.mubr.msk.f32.mxu0 %vm1716_vm2, %v1680_v24 }
 0x16f   : > { %v1039_v62 = vpop.xlane.xlu0 %1038 }
 0x170   : > { %v1103_v47 = vmul.f32 0.25, %v1039_v62 }
 0x172   : > { %v1295_v19 = vmul.f32 %v1103_v47, %v1103_v47 }
 0x173   : > { %v1591_v27 = vpop.permute.xlu0 %1590 }
 0x174   : > { %v1681_v29 = vsel %vm432_vm0, %v10116_v56, %v1591_v27 }
 0x175   : > { %8829 = vmatmul.mubr.msk.f32.gmra.mrb[4].mxu0 %vm1716_vm2, %v1681_v29 }
 0x189   : > { %476 = vadd.xlane.f32.xlu1 %v475_v51  ;;  %1201 = vadd.xlane.f32.xlu0 %v1200_v17 }
 0x18d   : > { %1207 = vadd.xlane.f32.xlu1 %v1206_v10  ;;  %1204 = vadd.xlane.f32.xlu0 %v1203_v48 }
 0x191   : > { %479 = vadd.xlane.f32.xlu1 %v478_v25  ;;  %1210 = vadd.xlane.f32.xlu0 %v1209_v42 }
 0x195   : > { %637 = vadd.xlane.f32.xlu0 %v636_v59 }
 0x199   : > { %640 = vadd.xlane.f32.xlu0 %v639_v32 }
 0x19c   : > { %v471_v61 = vpop.xlane.xlu1 %470 }
 0x19d   : > { %v542_v51 = vmul.f32 0.25, %v471_v61 }
 0x19f   : > { %v734_v48 = vmul.f32 %v542_v51, %v542_v51 }
 0x1a0   : > { %v1199_v31 = vpop.xlane.xlu1 %1198 }
 0x1a1   : > { %v1263_v5 = vmul.f32 0.25, %v1199_v31  ;;  %v10119_v31 = vld [vmem:[%s10281_s14 + $0x58] sm:$0xff] }
 0x1a2   : > { %1600 = vrot.lane.b32.xlu1 %v10117_v22, %s10215_s18  ;;  %v10914_v16 = vpop.f32.mrb[0].mxu1  ;;  %v1359_v22 = vsub.f32 %v10656_v15, %v1103_v47 }
 0x1a3   : > { %v1327_v40 = vsub.f32 %v1263_v5, %v1295_v19  ;;  %v10916_v24 = vpop.f32.mrb[1].mxu1 }
 0x1a4   : > { %13593 = vst [vmem:[#allocation22_spill] sm:$0xff] %v10916_v24  ;;  %v474_v27 = vpop.xlane.xlu1 %473  ;;  %v1196_v29 = vpop.xlane.xlu0 %1195 }
 0x1a5   : > { %v1391_v56 = vadd.f32 1e-06, %v1327_v40  ;;  %v1262_v17 = vmul.f32 0.25, %v1196_v29  ;;  %v543_v34 = vmul.f32 0.25, %v474_v27 }
 0x1a7   : > { %9780 = vrsqrt.f32 %v1391_v56  ;;  %v1326_v62 = vsub.f32 %v1262_v17, %v1294_v26  ;;  %v735_v41 = vmul.f32 %v543_v34, %v543_v34  ;;  %v10120_v56 = vld [vmem:[%s10310_s17 + $0x38] sm:$0xff] }
 0x1a8   : > { %v1593_v13 = vpop.permute.xlu1 %1592  ;;  %v632_v10 = vpop.xlane.xlu0 %631 }
 0x1a9   : > { %v1682_v8 = vsel %vm432_vm0, %v10118_v30, %v1593_v13  ;;  %v1390_v25 = vadd.f32 1e-06, %v1326_v62  ;;  %v702_v42 = vmul.f32 0.25, %v632_v10  ;;  %v1358_v13 = vsub.f32 %v10627_v46, %v1102_v52 }
 0x1aa   : > { %8831 = vmatprep.mubr.msk.f32.mxu0 %vm1716_vm2, %v1682_v8  ;;  %v798_v10 = vsub.f32 %v10784_v7, %v542_v51  ;;  %v799_v46 = vsub.f32 %v10805_v11, %v543_v34 }
 0x1ab   : > { %9782 = vrsqrt.f32 %v1390_v25  ;;  %v766_v43 = vsub.f32 %v702_v42, %v734_v48 }
 0x1ac   : > { %v635_v59 = vpop.xlane.xlu0 %634 }
 0x1ad   : > { %v830_v32 = vadd.f32 1e-06, %v766_v43  ;;  %v703_v61 = vmul.f32 0.25, %v635_v59 }
 0x1af   : > { %1602 = vrot.lane.b32.xlu0 %v10119_v31, %s10215_s18  ;;  %9784 = vrsqrt.f32 %v830_v32  ;;  %v767_v19 = vsub.f32 %v703_v61, %v735_v41 }
 0x1b0   : > { %v1595_v40 = vpop.permute.xlu0 %1594 }
 0x1b1   : > { %v9781_v5 = vpop.eup %9780  ;;  %v831_v27 = vadd.f32 1e-06, %v767_v19  ;;  %v1683_v29 = vsel %vm432_vm0, %v10120_v56, %v1595_v40 }
 0x1b2   : > { %v10926_v26 = vpop.f32.mrb[2].mxu1  ;;  %8832 = vmatmul.mubr.msk.f32.gmra.mrb[6].mxu0 %vm1716_vm2, %v1683_v29  ;;  %v1455_v17 = vmul.f32 %v9781_v5, %v1359_v22  ;;  %v10961_v22 = vld [vmem:[%s10281_s14 + $0xb0] sm:$0xff] }
 0x1b3   : > { %9786 = vrsqrt.f32 %v831_v27  ;;  %v10929_v62 = vpop.f32.mrb[3].mxu1  ;;  %v10971_v27 = vld [vmem:[%s10281_s14 + $0xb8] sm:$0xff] }
 0x1b4   : > { %v1493_v47 = vmul.f32 %v10522_v1, %v1455_v17  ;;  %v1061_v56 = vsel %vm432_vm0, %v10971_v27, 0.0  ;;  %v10983_v17 = vld [vmem:[%s13416_s7] ss:$0 sm:$0xff] }
 0x1b5   : > { %v9783_v30 = vpop.eup %9782 }
 0x1b6   : > { %v1454_v8 = vmul.f32 %v9783_v30, %v1358_v13  ;;  %v10939_v43 = vadd.f32 %v10533_v21, %v1493_v47 }
 0x1b8   : > { %v1492_v48 = vmul.f32 %v10522_v1, %v1454_v8  ;;  %13595 = vst [vmem:[#allocation24_spill] sm:$0xff] %v10939_v43 }
 0x1b9   : > { %v9785_v25 = vpop.eup %9784 }
 0x1ba   : > { %v10936_v42 = vadd.f32 %v10533_v21, %v1492_v48  ;;  %v894_v59 = vmul.f32 %v9785_v25, %v798_v10  ;;  %v10949_v21 = vld [vmem:[%s10281_s14 + $0xa0] sm:$0xff]  ;;  %v11021_v25 = vld [vmem:[%s10310_s17 + $0x90] sm:$0xff] }
 0x1bb   : > { %v1052_v19 = vsel %vm432_vm0, %v10949_v21, 0.0 }
 0x1bc   : > { %13594 = vst [vmem:[#allocation23_spill] sm:$0xff] %v10936_v42  ;;  %v9360_v52 = vpack.c.bf16 %v10939_v43, %v10936_v42  ;;  %v932_v41 = vmul.f32 %v10580_v20, %v894_v59 }
 0x1bd   : > { %v9787_v32 = vpop.eup %9786 }
 0x1be   : > { %v895_v51 = vmul.f32 %v9787_v32, %v799_v46  ;;  %9362 = vmatprep.subr.msk.bf16.mxu1 %vm10549_vm1, %v9360_v52  ;;  %v970_v1 = vadd.f32 %v10591_v28, %v932_v41  ;;  %v10121_v41 = vld [vmem:[%s10281_s14 + $0x68] sm:$0xff] }
 0x1c0   : > { %8916 = vmatprep.mubr.msk.f32.mxu1 %vm432_vm0, %v970_v1  ;;  %v933_v34 = vmul.f32 %v10580_v20, %v895_v51  ;;  %v1058_v20 = vsel %vm432_vm0, %v10961_v22, 0.0 }
 0x1c2   : > { %v10953_v61 = vpop.f32.mrb[4].mxu1  ;;  %v971_v31 = vadd.f32 %v10591_v28, %v933_v34  ;;  %v10974_v28 = vld [vmem:[%s10281_s14 + $0xa8] sm:$0xff] }
 0x1c3   : > { %13596 = vst [vmem:[#allocation25_spill] sm:$0xff] %v10953_v61  ;;  %v10958_v5 = vpop.f32.mrb[5].mxu1  ;;  %v1055_v29 = vsel %vm432_vm0, %v10974_v28, 0.0 }
 0x1c4   : > { %8917 = vmatmul.mubr.msk.f32.vlgmr.msra.gmra.mrb[12].mxu1 %vm432_vm0, %v971_v31  ;;  %v10964_v40 = vpack.c.bf16 %v971_v31, %v970_v1  ;;  %v10122_v31 = vld [vmem:[%s10281_s14 + $0x60] sm:$0xff] }
 0x1c5   : > { %9365 = vmatpush3.bf16.xpose.msk.msra.mxu1 %vm10549_vm1, %v9360_v52 }
 0x1c6   : > { %13597 = vst [vmem:[#allocation26_spill] sm:$0xff] %v10964_v40  ;;  %1053 = vadd.xlane.f32.xlu1 %v1052_v19 }
 0x1ca   : > { %1059 = vadd.xlane.f32.xlu1 %v1058_v20 }
 0x1ce   : > { %1062 = vadd.xlane.f32.xlu1 %v1061_v56  ;;  %1056 = vadd.xlane.f32.xlu0 %v1055_v29  ;;  %v10123_v56 = vld [vmem:[%s10310_s17 + $0x48] sm:$0xff] }
 0x1d2   : > { %v10985_v13 = vpop.f32.mrb[6].mxu1 }
 0x1d3   : > { %v8824_v30 = vpop.f32.mrb[0].mxu0  ;;  %v10987_v8 = vpop.f32.mrb[7].mxu1 }
 0x1d4   : > { %v10990_v47 = vadd.f32 %v8824_v30, %v10983_v17  ;;  %v1879_v10 = vpop.f32.mrb[1].mxu0  ;;  %v10124_v30 = vld [vmem:[%s10310_s17 + $0x40] sm:$0xff] }
 0x1d5   : > { %v10993_v48 = vadd.f32 %v10983_v17, %v1879_v10 }
 0x1d6   : > { %13598 = vst [vmem:[#allocation27_spill] sm:$0xff] %v10990_v47 }
 0x1d7   : > { %13599 = vst [vmem:[#allocation28_spill] sm:$0xff] %v10993_v48  ;;  %v10999_v59 = vpack.c.bf16 %v10990_v47, %v10993_v48 }
 0x1d9   : > { %13600 = vst [vmem:[#allocation29_spill] sm:$0xff] %v10999_v59  ;;  %v1042_v46 = vpop.xlane.xlu1 %1041  ;;  %v487_v59 = vsel %vm432_vm0, %v11021_v25, 0.0 }
 0x1dd   : > { %v1048_v52 = vpop.xlane.xlu1 %1047 }
 0x1df   : > { %1606 = vrot.lane.b32.xlu1 %v10121_v41, %s10215_s18  ;;  %v11018_v41 = vld [vmem:[%s10310_s17 + $0x80] sm:$0xff] }
 0x1e1   : > { %v11003_v32 = vpop.xlane.xlu1 %1050  ;;  %v1045_v51 = vpop.xlane.xlu0 %1044 }
 0x1e2   : > { %v11005_v1 = vpop.f32.mrb[8].mxu1  ;;  %v11084_v43 = vmul.f32 0.25, %v11003_v32 }
 0x1e3   : > { %13601 = vst [vmem:[#allocation30_spill] sm:$0xff] %v11005_v1  ;;  %v11007_v34 = vpop.f32.mrb[9].mxu1 }
 0x1e4   : > { %13602 = vst [vmem:[#allocation31_spill] sm:$0xff] %v11007_v34  ;;  %1604 = vrot.lane.b32.xlu0 %v10122_v31, %s10215_s18  ;;  %v481_v31 = vsel %vm432_vm0, %v11018_v41, 0.0  ;;  %v1299_v32 = vmul.f32 %v11084_v43, %v11084_v43 }
 0x1e5   : > { %v1599_v19 = vpop.permute.xlu1 %1598  ;;  %v1597_v20 = vpop.permute.xlu0 %1596 }
 0x1e6   : > { %v1685_v29 = vsel %vm432_vm0, %v10123_v56, %v1599_v19  ;;  %v1684_v10 = vsel %vm432_vm0, %v10124_v30, %v1597_v20  ;;  %v1141_v19 = vmul.f32 %v10974_v28, %v10974_v28  ;;  %v1140_v20 = vmul.f32 %v10949_v21, %v10949_v21 }
 0x1e7   : > { %8834 = vmatprep.mubr.msk.f32.mxu0 %vm1716_vm2, %v1684_v10  ;;  %v1143_v30 = vmul.f32 %v10971_v27, %v10971_v27  ;;  %v1142_v10 = vmul.f32 %v10961_v22, %v10961_v22 }
 0x1e8   : > { %8835 = vmatmul.mubr.msk.f32.gmra.mrb[8].mxu0 %vm1716_vm2, %v1685_v29  ;;  %v1215_v56 = vsel %vm432_vm0, %v1141_v19, 0.0  ;;  %v1212_v29 = vsel %vm432_vm0, %v1140_v20, 0.0  ;;  %v580_v20 = vmul.f32 %v11021_v25, %v11021_v25 }
 0x1e9   : > { %v1221_v48 = vsel %vm432_vm0, %v1143_v30, 0.0  ;;  %v1218_v47 = vsel %vm432_vm0, %v1142_v10, 0.0 }
 0x203   : > { %482 = vadd.xlane.f32.xlu1 %v481_v31  ;;  %488 = vadd.xlane.f32.xlu0 %v487_v59  ;;  %v11043_v31 = vld [vmem:[%s10310_s17 + $0x88] sm:$0xff]  ;;  %v490_v59 = vsel %vm432_vm0, %v11040_v53, 0.0 }
 0x204   : > { %v484_v19 = vsel %vm432_vm0, %v11043_v31, 0.0 }
 0x207   : > { %1216 = vadd.xlane.f32.xlu1 %v1215_v56  ;;  %1213 = vadd.xlane.f32.xlu0 %v1212_v29  ;;  %v578_v56 = vmul.f32 %v11018_v41, %v11018_v41  ;;  %v648_v29 = vsel %vm432_vm0, %v580_v20, 0.0 }
 0x209   : > { %v642_v30 = vsel %vm432_vm0, %v578_v56, 0.0 }
 0x20b   : > { %1222 = vadd.xlane.f32.xlu1 %v1221_v48  ;;  %1219 = vadd.xlane.f32.xlu0 %v1218_v47  ;;  %v579_v47 = vmul.f32 %v11043_v31, %v11043_v31  ;;  %v11057_v48 = vmul.f32 0.25, %v1042_v46  ;;  %v11070_v46 = vmul.f32 0.25, %v1048_v52 }
 0x20d   : > { %v645_v40 = vsel %vm432_vm0, %v579_v47, 0.0  ;;  %v1296_v20 = vmul.f32 %v11057_v48, %v11057_v48  ;;  %v1298_v52 = vmul.f32 %v11070_v46, %v11070_v46 }
 0x20f   : > { %491 = vadd.xlane.f32.xlu1 %v490_v59  ;;  %485 = vadd.xlane.f32.xlu0 %v484_v19  ;;  %v581_v59 = vmul.f32 %v11040_v53, %v11040_v53 }
 0x213   : > { %649 = vadd.xlane.f32.xlu1 %v648_v29  ;;  %643 = vadd.xlane.f32.xlu0 %v642_v30  ;;  %v8827_v10 = vpop.f32.mrb[2].mxu0  ;;  %v11072_v30 = vmul.f32 0.25, %v1045_v51 }
 0x214   : > { %v11060_v50 = vadd.f32 %v8827_v10, %v10983_v17  ;;  %v1889_v57 = vpop.f32.mrb[3].mxu0 }
 0x215   : > { %v11066_v19 = vadd.f32 %v10983_v17, %v1889_v57  ;;  %v651_v57 = vsel %vm432_vm0, %v581_v59, 0.0  ;;  %v1297_v10 = vmul.f32 %v11072_v30, %v11072_v30 }
 0x216   : > { %13603 = vst [vmem:[#allocation32_spill] sm:$0xff] %v11060_v50  ;;  %v477_v56 = vpop.xlane.xlu1 %476  ;;  %v1202_v29 = vpop.xlane.xlu0 %1201 }
 0x217   : > { %13604 = vst [vmem:[#allocation33_spill] sm:$0xff] %v11066_v19  ;;  %v11078_v47 = vpack.c.bf16 %v11060_v50, %v11066_v19  ;;  %v1264_v63 = vmul.f32 0.25, %v1202_v29  ;;  %646 = vadd.xlane.f32.xlu1 %v645_v40 }
 0x219   : > { %13605 = vst [vmem:[#allocation34_spill] sm:$0xff] %v11078_v47  ;;  %v1328_v33 = vsub.f32 %v1264_v63, %v1296_v20  ;;  %v11088_v63 = vmul.f32 0.25, %v477_v56  ;;  %v10125_v56 = vld [vmem:[%s10310_s17 + $0x50] sm:$0xff] }
 0x21a   : > { %v1208_v51 = vpop.xlane.xlu1 %1207  ;;  %v1205_v49 = vpop.xlane.xlu0 %1204 }
 0x21b   : > { %v1392_v44 = vadd.f32 1e-06, %v1328_v33  ;;  %v1266_v37 = vmul.f32 0.25, %v1208_v51  ;;  %v1265_v19 = vmul.f32 0.25, %v1205_v49  ;;  %652 = vadd.xlane.f32.xlu1 %v651_v57  ;;  %v736_v33 = vmul.f32 %v11088_v63, %v11088_v63 }
 0x21d   : > { %9788 = vrsqrt.f32 %v1392_v44  ;;  %v1330_v40 = vsub.f32 %v1266_v37, %v1298_v52  ;;  %v1329_v29 = vsub.f32 %v1265_v19, %v1297_v10 }
 0x21e   : > { %v480_v59 = vpop.xlane.xlu1 %479  ;;  %v1211_v20 = vpop.xlane.xlu0 %1210 }
 0x21f   : > { %v1394_v47 = vadd.f32 1e-06, %v1330_v40  ;;  %v1393_v50 = vadd.f32 1e-06, %v1329_v29  ;;  %v1267_v42 = vmul.f32 0.25, %v1211_v20  ;;  %v545_v49 = vmul.f32 0.25, %v480_v59 }
 0x220   : > { %v1360_v40 = vsub.f32 %v10833_v35, %v11057_v48 }
 0x221   : > { %9790 = vrsqrt.f32 %v1394_v47  ;;  %v1331_v54 = vsub.f32 %v1267_v42, %v1299_v32  ;;  %v10126_v32 = vld [vmem:[%s10281_s14 + $0x70] sm:$0xff] }
 0x222   : > { %9792 = vrsqrt.f32 %v1393_v50  ;;  %v1601_v44 = vpop.permute.xlu1 %1600  ;;  %v638_v37 = vpop.xlane.xlu0 %637 }
 0x223   : > { %v1395_v19 = vadd.f32 1e-06, %v1331_v54  ;;  %v1686_v10 = vsel %vm432_vm0, %v10125_v56, %v1601_v44  ;;  %v704_v57 = vmul.f32 0.25, %v638_v37  ;;  %v737_v54 = vmul.f32 %v545_v49, %v545_v49 }
 0x224   : > { %8837 = vmatprep.mubr.msk.f32.mxu0 %vm1716_vm2, %v1686_v10  ;;  %v1361_v56 = vsub.f32 %v10862_v4, %v11072_v30 }
 0x225   : > { %9794 = vrsqrt.f32 %v1395_v19  ;;  %v768_v52 = vsub.f32 %v704_v57, %v736_v33  ;;  %v11097_v51 = vpop.f32.mrb[10].mxu1  ;;  %v1362_v33 = vsub.f32 %v10849_v58, %v11070_v46  ;;  %v10127_v57 = vld [vmem:[%s10310_s17 + $0x58] sm:$0xff]  ;;  %v11117_v46 = vld [vmem:[%s13413_s4] ss:$0 sm:$0xff] }
 0x226   : > { %v11099_v42 = vpop.f32.mrb[11].mxu1  ;;  %v641_v47 = vpop.xlane.xlu0 %640 }
 0x227   : > { %v9789_v50 = vpop.eup %9788  ;;  %v832_v29 = vadd.f32 1e-06, %v768_v52  ;;  %v705_v59 = vmul.f32 0.25, %v641_v47 }
 0x228   : > { %v1456_v44 = vmul.f32 %v9789_v50, %v1360_v40  ;;  %v1363_v40 = vsub.f32 %v10859_v23, %v11084_v43  ;;  %v800_v43 = vsub.f32 %v10887_v38, %v11088_v63 }
 0x229   : > { %9796 = vrsqrt.f32 %v832_v29  ;;  %v769_v20 = vsub.f32 %v705_v59, %v737_v54  ;;  %1608 = vrot.lane.b32.xlu0 %v10126_v32, %s10215_s18 }
 0x22a   : > { %v1603_v37 = vpop.permute.xlu0 %1602  ;;  %v1494_v30 = vmul.f32 %v11117_v46, %v1456_v44 }
 0x22b   : > { %v9791_v19 = vpop.eup %9790  ;;  %v833_v10 = vadd.f32 1e-06, %v769_v20  ;;  %v1687_v48 = vsel %vm432_vm0, %v10127_v57, %v1603_v37  ;;  %v11127_v20 = vld [vmem:[%s13414_s5] ss:$0 sm:$0xff] }
 0x22c   : > { %v9793_v52 = vpop.eup %9792  ;;  %1610 = vrot.lane.b32.xlu1 %v10656_v15, %s10215_s18  ;;  %8838 = vmatmul.mubr.msk.f32.gmra.mrb[10].mxu0 %vm1716_vm2, %v1687_v48  ;;  %v1458_v47 = vmul.f32 %v9791_v19, %v1362_v33  ;;  %v11130_v32 = vadd.f32 %v11127_v20, %v1494_v30  ;;  %v801_v48 = vsub.f32 %v10901_v14, %v545_v49  ;;  %v11164_v49 = vld [vmem:[%s13412_s3] ss:$0 sm:$0xff] }
 0x22d   : > { %9798 = vrsqrt.f32 %v833_v10  ;;  %v1457_v50 = vmul.f32 %v9793_v52, %v1361_v56  ;;  %v11156_v52 = vld [vmem:[%s13411_s2] ss:$0 sm:$0xff] }
 0x22e   : > { %v1496_v15 = vmul.f32 %v11117_v46, %v1458_v47  ;;  %13606 = vst [vmem:[#allocation35_spill] sm:$0xff] %v11130_v32 }
 0x22f   : > { %v9795_v54 = vpop.eup %9794  ;;  %v1495_v29 = vmul.f32 %v11117_v46, %v1457_v50 }
 0x230   : > { %v1459_v59 = vmul.f32 %v9795_v54, %v1363_v40  ;;  %v11141_v56 = vadd.f32 %v11127_v20, %v1496_v15  ;;  %v11176_v15 = vld [vmem:[%s10281_s14 + $0xc0] sm:$0xff] }
 0x231   : > { %v11133_v33 = vadd.f32 %v11127_v20, %v1495_v29 }
 0x232   : > { %v1497_v44 = vmul.f32 %v11117_v46, %v1459_v59  ;;  %13608 = vst [vmem:[#allocation37_spill] sm:$0xff] %v11141_v56 }
 0x233   : > { %13607 = vst [vmem:[#allocation36_spill] sm:$0xff] %v11133_v33  ;;  %v9797_v37 = vpop.eup %9796  ;;  %v9366_v19 = vpack.c.bf16 %v11133_v33, %v11130_v32 }
 0x234   : > { %v11144_v10 = vadd.f32 %v11127_v20, %v1497_v44  ;;  %v896_v57 = vmul.f32 %v9797_v37, %v800_v43  ;;  %v1064_v43 = vsel %vm432_vm0, %v11176_v15, 0.0  ;;  %v11181_v44 = vld [vmem:[%s10281_s14 + $0xd0] sm:$0xff] }
 0x235   : > { %9368 = vmatprep.subr.msk.bf16.mxu0 %vm10549_vm1, %v9366_v19 }
 0x236   : > { %13609 = vst [vmem:[#allocation38_spill] sm:$0xff] %v11144_v10  ;;  %9371 = vmatpush3.bf16.xpose.msk.msra.mxu0 %vm10549_vm1, %v9366_v19  ;;  %v9372_v63 = vpack.c.bf16 %v11144_v10, %v11141_v56  ;;  %v934_v47 = vmul.f32 %v11156_v52, %v896_v57 }
 0x237   : > { %v9799_v50 = vpop.eup %9798 }
 0x238   : > { %v897_v30 = vmul.f32 %v9799_v50, %v801_v48  ;;  %9374 = vmatprep.subr.msk.bf16.mxu1 %vm10549_vm1, %v9372_v63  ;;  %v972_v40 = vadd.f32 %v11164_v49, %v934_v47  ;;  %v1070_v48 = vsel %vm432_vm0, %v11181_v44, 0.0  ;;  %v11195_v50 = vld [vmem:[%s10281_s14 + $0xd8] sm:$0xff] }
 0x23a   : > { %8923 = vmatprep.mubr.msk.f32.mxu1 %vm432_vm0, %v972_v40  ;;  %v935_v54 = vmul.f32 %v11156_v52, %v897_v30 }
 0x23c   : > { %v973_v29 = vadd.f32 %v11164_v49, %v935_v54 }
 0x23e   : > { %8924 = vmatmul.mubr.msk.f32.vlgmr.msra.gmra.mrb[14].mxu1 %vm432_vm0, %v973_v29  ;;  %v11171_v59 = vpack.c.bf16 %v973_v29, %v972_v40  ;;  %v1073_v29 = vsel %vm432_vm0, %v11195_v50, 0.0 }
 0x23f   : > { %9377 = vmatpush3.bf16.xpose.msk.msra.mxu1 %vm10549_vm1, %v9372_v63  ;;  %v11192_v63 = vld [vmem:[%s10281_s14 + $0xc8] sm:$0xff] }
 0x240   : > { %13610 = vst [vmem:[#allocation39_spill] sm:$0xff] %v11171_v59  ;;  %v1067_v54 = vsel %vm432_vm0, %v11192_v63, 0.0 }
 0x248   : > { %1065 = vadd.xlane.f32.xlu0 %v1064_v43  ;;  %v8830_v37 = vpop.f32.mrb[4].mxu0 }
 0x249   : > { %v11184_v19 = vadd.f32 %v8830_v37, %v10983_v17  ;;  %v1899_v57 = vpop.f32.mrb[5].mxu0 }
 0x24a   : > { %v11189_v47 = vadd.f32 %v10983_v17, %v1899_v57 }
 0x24b   : > { %13611 = vst [vmem:[#allocation40_spill] sm:$0xff] %v11184_v19 }
 0x24c   : > { %13612 = vst [vmem:[#allocation41_spill] sm:$0xff] %v11189_v47  ;;  %v11201_v40 = vpack.c.bf16 %v11184_v19, %v11189_v47  ;;  %1071 = vadd.xlane.f32.xlu0 %v1070_v48  ;;  %v1146_v47 = vmul.f32 %v11181_v44, %v11181_v44 }
 0x24e   : > { %13613 = vst [vmem:[#allocation42_spill] sm:$0xff] %v11201_v40  ;;  %v1230_v56 = vsel %vm432_vm0, %v1146_v47, 0.0 }
 0x250   : > { %1068 = vadd.xlane.f32.xlu1 %v1067_v54  ;;  %1074 = vadd.xlane.f32.xlu0 %v1073_v29  ;;  %v11218_v54 = vld [vmem:[%s10310_s17 + $0xa0] sm:$0xff]  ;;  %v11221_v29 = vld [vmem:[%s10310_s17 + $0xb0] sm:$0xff] }
 0x253   : > { %v1054_v43 = vpop.xlane.xlu1 %1053 }
 0x257   : > { %v1060_v37 = vpop.xlane.xlu1 %1059 }
 0x25b   : > { %v1063_v57 = vpop.xlane.xlu1 %1062  ;;  %v1057_v33 = vpop.xlane.xlu0 %1056 }
 0x25f   : > { %v1607_v30 = vpop.permute.xlu1 %1606  ;;  %v1605_v32 = vpop.permute.xlu0 %1604 }
 0x260   : > { %v1689_v40 = vsel %vm432_vm0, %v10805_v11, %v1607_v30  ;;  %v1688_v48 = vsel %vm432_vm0, %v10784_v7, %v1605_v32  ;;  %v493_v11 = vsel %vm432_vm0, %v11218_v54, 0.0  ;;  %v499_v7 = vsel %vm432_vm0, %v11221_v29, 0.0 }
 0x261   : > { %1614 = vrot.lane.b32.xlu1 %v10862_v4, %s10215_s18  ;;  %8840 = vmatprep.mubr.msk.f32.mxu0 %vm1716_vm2, %v1688_v48  ;;  %v1145_v4 = vmul.f32 %v11192_v63, %v11192_v63  ;;  %v1144_v32 = vmul.f32 %v11176_v15, %v11176_v15  ;;  %v1147_v48 = vmul.f32 %v11195_v50, %v11195_v50 }
 0x262   : > { %8841 = vmatmul.mubr.msk.f32.gmra.mrb[12].mxu0 %vm1716_vm2, %v1689_v40 }
 0x263   : > { %v1227_v30 = vsel %vm432_vm0, %v1145_v4, 0.0  ;;  %v1224_v40 = vsel %vm432_vm0, %v1144_v32, 0.0  ;;  %v1233_v32 = vsel %vm432_vm0, %v1147_v48, 0.0  ;;  %v582_v48 = vmul.f32 %v11218_v54, %v11218_v54 }
 0x266   : > { %1612 = vrot.lane.b32.xlu0 %v10833_v35, %s10215_s18 }
 0x285   : > { %494 = vadd.xlane.f32.xlu1 %v493_v11  ;;  %500 = vadd.xlane.f32.xlu0 %v499_v7  ;;  %v8833_v35 = vpop.f32.mrb[6].mxu0  ;;  %v11265_v7 = vmul.f32 0.25, %v1054_v43  ;;  %v11275_v43 = vmul.f32 0.25, %v1063_v57 }
 0x286   : > { %v11238_v19 = vadd.f32 %v8833_v35, %v10983_v17  ;;  %v1909_v10 = vpop.f32.mrb[7].mxu0  ;;  %v11255_v35 = vld [vmem:[%s10310_s17 + $0xa8] sm:$0xff] }
 0x287   : > { %v11241_v11 = vadd.f32 %v10983_v17, %v1909_v10  ;;  %v502_v10 = vsel %vm432_vm0, %v11252_v60, 0.0  ;;  %v1300_v36 = vmul.f32 %v11265_v7, %v11265_v7  ;;  %v1303_v57 = vmul.f32 %v11275_v43, %v11275_v43 }
 0x288   : > { %13614 = vst [vmem:[#allocation43_spill] sm:$0xff] %v11238_v19 }
 0x289   : > { %13615 = vst [vmem:[#allocation44_spill] sm:$0xff] %v11241_v11  ;;  %1228 = vadd.xlane.f32.xlu1 %v1227_v30  ;;  %1225 = vadd.xlane.f32.xlu0 %v1224_v40  ;;  %v11247_v4 = vpack.c.bf16 %v11238_v19, %v11241_v11  ;;  %v496_v30 = vsel %vm432_vm0, %v11255_v35, 0.0  ;;  %v584_v40 = vmul.f32 %v11221_v29, %v11221_v29  ;;  %v1109_v11 = vmul.f32 0.25, %v1057_v33 }
 0x28a   : > { %v583_v19 = vmul.f32 %v11255_v35, %v11255_v35  ;;  %v1110_v33 = vmul.f32 0.25, %v1060_v37 }
 0x28b   : > { %13616 = vst [vmem:[#allocation45_spill] sm:$0xff] %v11247_v4  ;;  %v1301_v45 = vmul.f32 %v1109_v11, %v1109_v11 }
 0x28c   : > { %v1302_v37 = vmul.f32 %v1110_v33, %v1110_v33 }
 0x28d   : > { %1234 = vadd.xlane.f32.xlu1 %v1233_v32  ;;  %1231 = vadd.xlane.f32.xlu0 %v1230_v56  ;;  %v660_v56 = vsel %vm432_vm0, %v584_v40, 0.0  ;;  %v654_v32 = vsel %vm432_vm0, %v582_v48, 0.0 }
 0x290   : > { %v11267_v47 = vpop.xlane.xlu1 %482  ;;  %v489_v4 = vpop.xlane.xlu0 %488 }
 0x291   : > { %13617 = vst [vmem:[#allocation46_spill] sm:$0xff] %v11267_v47  ;;  %503 = vadd.xlane.f32.xlu1 %v502_v10  ;;  %497 = vadd.xlane.f32.xlu0 %v496_v30  ;;  %v657_v10 = vsel %vm432_vm0, %v583_v19, 0.0  ;;  %v585_v30 = vmul.f32 %v11252_v60, %v11252_v60 }
 0x294   : > { %v1217_v59 = vpop.xlane.xlu1 %1216  ;;  %v1214_v12 = vpop.xlane.xlu0 %1213 }
 0x295   : > { %v1269_v6 = vmul.f32 0.25, %v1217_v59  ;;  %v1268_v0 = vmul.f32 0.25, %v1214_v12  ;;  %661 = vadd.xlane.f32.xlu1 %v660_v56  ;;  %655 = vadd.xlane.f32.xlu0 %v654_v32  ;;  %v663_v32 = vsel %vm432_vm0, %v585_v30, 0.0 }
 0x297   : > { %v1333_v40 = vsub.f32 %v1269_v6, %v1301_v45  ;;  %v1332_v48 = vsub.f32 %v1268_v0, %v1300_v36  ;;  %v11280_v55 = vpop.f32.mrb[12].mxu1  ;;  %v548_v0 = vmul.f32 0.25, %v489_v4  ;;  %v1364_v4 = vsub.f32 %v10949_v21, %v11265_v7 }
 0x298   : > { %13618 = vst [vmem:[#allocation47_spill] sm:$0xff] %v11280_v55  ;;  %v1223_v39 = vpop.xlane.xlu1 %1222  ;;  %v11284_v12 = vpop.f32.mrb[13].mxu1  ;;  %v1366_v7 = vsub.f32 %v10961_v22, %v1110_v33 }
 0x299   : > { %v1397_v18 = vadd.f32 1e-06, %v1333_v40  ;;  %v1396_v2 = vadd.f32 1e-06, %v1332_v48  ;;  %v1271_v59 = vmul.f32 0.25, %v1223_v39  ;;  %13619 = vst [vmem:[#allocation48_spill] sm:$0xff] %v11284_v12  ;;  %v1220_v56 = vpop.xlane.xlu0 %1219  ;;  %658 = vadd.xlane.f32.xlu1 %v657_v10  ;;  %v740_v48 = vmul.f32 %v548_v0, %v548_v0 }
 0x29a   : > { %v1270_v19 = vmul.f32 0.25, %v1220_v56 }
 0x29b   : > { %9800 = vrsqrt.f32 %v1397_v18  ;;  %v1335_v6 = vsub.f32 %v1271_v59, %v1303_v57  ;;  %v1365_v18 = vsub.f32 %v10974_v28, %v1109_v11  ;;  %v1367_v11 = vsub.f32 %v10971_v27, %v11275_v43 }
 0x29c   : > { %9802 = vrsqrt.f32 %v1396_v2  ;;  %v1334_v36 = vsub.f32 %v1270_v19, %v1302_v37  ;;  %v492_v45 = vpop.xlane.xlu1 %491 }
 0x29d   : > { %v1399_v47 = vadd.f32 1e-06, %v1335_v6  ;;  %v11287_v3 = vpop.xlane.xlu0 %485  ;;  %664 = vadd.xlane.f32.xlu1 %v663_v32  ;;  %v549_v57 = vmul.f32 0.25, %v492_v45 }
 0x29e   : > { %13620 = vst [vmem:[#allocation49_spill] sm:$0xff] %v11287_v3  ;;  %v1398_v40 = vadd.f32 1e-06, %v1334_v36 }
 0x29f   : > { %9804 = vrsqrt.f32 %v1399_v47  ;;  %v741_v45 = vmul.f32 %v549_v57, %v549_v57 }
 0x2a0   : > { %9806 = vrsqrt.f32 %v1398_v40  ;;  %v650_v39 = vpop.xlane.xlu1 %649 }
 0x2a1   : > { %v708_v10 = vmul.f32 0.25, %v650_v39  ;;  %v11289_v55 = vpop.xlane.xlu0 %643 }
 0x2a3   : > { %v772_v56 = vsub.f32 %v708_v10, %v740_v48 }
 0x2a4   : > { %v11292_v30 = vpop.xlane.xlu1 %646 }
 0x2a5   : > { %13621 = vst [vmem:[#allocation50_spill] sm:$0xff] %v11292_v30  ;;  %v9801_v2 = vpop.eup %9800  ;;  %v836_v59 = vadd.f32 1e-06, %v772_v56  ;;  %v1609_v37 = vpop.permute.xlu0 %1608 }
 0x2a6   : > { %v9803_v19 = vpop.eup %9802  ;;  %v1690_v47 = vsel %vm432_vm0, %v10887_v38, %v1609_v37  ;;  %v1461_v32 = vmul.f32 %v9801_v2, %v1365_v18 }
 0x2a7   : > { %9808 = vrsqrt.f32 %v836_v59  ;;  %8843 = vmatprep.mubr.msk.f32.mxu0 %vm1716_vm2, %v1690_v47  ;;  %v1460_v6 = vmul.f32 %v9803_v19, %v1364_v4 }
 0x2a8   : > { %v653_v36 = vpop.xlane.xlu1 %652  ;;  %v1499_v40 = vmul.f32 %v11117_v46, %v1461_v32 }
 0x2a9   : > { %v9805_v39 = vpop.eup %9804  ;;  %v709_v48 = vmul.f32 0.25, %v653_v36  ;;  %v1498_v10 = vmul.f32 %v11117_v46, %v1460_v6  ;;  %v804_v6 = vsub.f32 %v11021_v25, %v548_v0 }
 0x2aa   : > { %v9807_v56 = vpop.eup %9806  ;;  %v11305_v38 = vadd.f32 %v11127_v20, %v1499_v40  ;;  %v1463_v18 = vmul.f32 %v9805_v39, %v1367_v11 }
 0x2ab   : > { %v773_v2 = vsub.f32 %v709_v48, %v741_v45  ;;  %1616 = vrot.lane.b32.xlu0 %v10849_v58, %s10215_s18  ;;  %v11310_v43 = vadd.f32 %v11127_v20, %v1498_v10  ;;  %v1462_v4 = vmul.f32 %v9807_v56, %v1366_v7  ;;  %v805_v7 = vsub.f32 %v11040_v53, %v549_v57 }
 0x2ac   : > { %13622 = vst [vmem:[#allocation51_spill] sm:$0xff] %v11305_v38  ;;  %v1611_v59 = vpop.permute.xlu1 %1610  ;;  %v1501_v33 = vmul.f32 %v11117_v46, %v1463_v18 }
 0x2ad   : > { %13623 = vst [vmem:[#allocation52_spill] sm:$0xff] %v11310_v43  ;;  %v837_v37 = vadd.f32 1e-06, %v773_v2  ;;  %v1691_v19 = vsel %vm432_vm0, %v10901_v14, %v1611_v59  ;;  %v11317_v47 = vpack.c.bf16 %v11305_v38, %v11310_v43  ;;  %v1500_v32 = vmul.f32 %v11117_v46, %v1462_v4 }
 0x2ae   : > { %1618 = vrot.lane.b32.xlu1 %v10859_v23, %s10215_s18  ;;  %8844 = vmatmul.mubr.msk.f32.gmra.mrb[14].mxu0 %vm1716_vm2, %v1691_v19  ;;  %v11324_v58 = vadd.f32 %v11127_v20, %v1501_v33 }
 0x2af   : > { %13624 = vst [vmem:[#allocation53_spill] sm:$0xff] %v11317_v47  ;;  %9810 = vrsqrt.f32 %v837_v37  ;;  %9380 = vmatprep.subr.msk.bf16.mxu0 %vm10549_vm1, %v11317_v47  ;;  %v11330_v14 = vadd.f32 %v11127_v20, %v1500_v32  ;;  %v11361_v37 = vld [vmem:[%s10281_s14 + $0xe0] sm:$0xff]  ;;  %v11366_v32 = vld [vmem:[%s10281_s14 + $0xf0] sm:$0xff] }
 0x2b0   : > { %13625 = vst [vmem:[#allocation54_spill] sm:$0xff] %v11324_v58  ;;  %v1076_v19 = vsel %vm432_vm0, %v11361_v37, 0.0 }
 0x2b1   : > { %13626 = vst [vmem:[#allocation55_spill] sm:$0xff] %v11330_v14  ;;  %v9809_v11 = vpop.eup %9808  ;;  %v9384_v36 = vpack.c.bf16 %v11324_v58, %v11330_v14 }
 0x2b2   : > { %v900_v23 = vmul.f32 %v9809_v11, %v804_v6  ;;  %v1082_v6 = vsel %vm432_vm0, %v11366_v32, 0.0  ;;  %v11371_v11 = vld [vmem:[%s10281_s14 + $0xe8] sm:$0xff] }
 0x2b3   : > { %9386 = vmatprep.subr.msk.bf16.mxu1 %vm10549_vm1, %v9384_v36 }
 0x2b4   : > { %v938_v40 = vmul.f32 %v11156_v52, %v900_v23  ;;  %v11374_v23 = vld [vmem:[%s10281_s14 + $0xf8] sm:$0xff] }
 0x2b5   : > { %v1151_v57 = vmul.f32 %v11374_v23, %v11374_v23 }
 0x2b6   : > { %v976_v39 = vadd.f32 %v11164_v49, %v938_v40  ;;  %v1079_v40 = vsel %vm432_vm0, %v11371_v11, 0.0 }
 0x2b8   : > { %8937 = vmatprep.mubr.msk.f32.mxu1 %vm432_vm0, %v976_v39 }
 0x2b9   : > { %v9811_v45 = vpop.eup %9810 }
 0x2ba   : > { %v901_v0 = vmul.f32 %v9811_v45, %v805_v7 }
 0x2bb   : > { %v8836_v48 = vpop.f32.mrb[8].mxu0 }
 0x2bc   : > { %v11342_v10 = vadd.f32 %v8836_v48, %v10983_v17  ;;  %v1919_v56 = vpop.f32.mrb[9].mxu0  ;;  %v939_v18 = vmul.f32 %v11156_v52, %v901_v0 }
 0x2bd   : > { %v11346_v2 = vadd.f32 %v10983_v17, %v1919_v56 }
 0x2be   : > { %13627 = vst [vmem:[#allocation56_spill] sm:$0xff] %v11342_v10  ;;  %v977_v4 = vadd.f32 %v11164_v49, %v939_v18 }
 0x2bf   : > { %13628 = vst [vmem:[#allocation57_spill] sm:$0xff] %v11346_v2  ;;  %v11353_v59 = vpack.c.bf16 %v11342_v10, %v11346_v2  ;;  %v11429_v2 = vld [vmem:[%s10310_s17 + $0xd8] sm:$0xff] }
 0x2c0   : > { %8938 = vmatmul.mubr.msk.f32.vlgmr.msra.gmra.mrb[16].mxu1 %vm432_vm0, %v977_v4  ;;  %v11356_v33 = vpack.c.bf16 %v977_v4, %v976_v39 }
 0x2c1   : > { %13629 = vst [vmem:[#allocation58_spill] sm:$0xff] %v11353_v59  ;;  %9389 = vmatpush3.bf16.xpose.msk.msra.mxu1 %vm10549_vm1, %v9384_v36  ;;  %v1085_v36 = vsel %vm432_vm0, %v11374_v23, 0.0 }
 0x2c2   : > { %13630 = vst [vmem:[#allocation59_spill] sm:$0xff] %v11356_v33 }
 0x2ca   : > { %1077 = vadd.xlane.f32.xlu0 %v1076_v19 }
 0x2ce   : > { %1083 = vadd.xlane.f32.xlu0 %v1082_v6 }
 0x2d2   : > { %1080 = vadd.xlane.f32.xlu1 %v1079_v40  ;;  %1086 = vadd.xlane.f32.xlu0 %v1085_v36  ;;  %v11401_v36 = vld [vmem:[%s10310_s17 + $0xc0] sm:$0xff] }
 0x2d5   : > { %v11380_v39 = vpop.xlane.xlu0 %1065 }
 0x2d6   : > { %13631 = vst [vmem:[#allocation60_spill] sm:$0xff] %v11380_v39 }
 0x2d9   : > { %v1072_v7 = vpop.xlane.xlu0 %1071 }
 0x2da   : > { %v1114_v58 = vmul.f32 0.25, %v1072_v7 }
 0x2dc   : > { %v1306_v47 = vmul.f32 %v1114_v58, %v1114_v58 }
 0x2dd   : > { %v11382_v45 = vpop.xlane.xlu1 %1068  ;;  %v1075_v0 = vpop.xlane.xlu0 %1074 }
 0x2de   : > { %13632 = vst [vmem:[#allocation61_spill] sm:$0xff] %v11382_v45  ;;  %v1115_v38 = vmul.f32 0.25, %v1075_v0 }
 0x2e1   : > { %v1615_v48 = vpop.permute.xlu1 %1614  ;;  %v1613_v56 = vpop.permute.xlu0 %1612 }
 0x2e2   : > { %v1693_v18 = vsel %vm432_vm0, %v11043_v31, %v1615_v48  ;;  %v1692_v4 = vsel %vm432_vm0, %v11018_v41, %v1613_v56  ;;  %v11404_v41 = vld [vmem:[%s10310_s17 + $0xd0] sm:$0xff] }
 0x2e3   : > { %1622 = vrot.lane.b32.xlu1 %v10974_v28, %s10215_s18  ;;  %8846 = vmatprep.mubr.msk.f32.mxu0 %vm1716_vm2, %v1692_v4  ;;  %v511_v56 = vsel %vm432_vm0, %v11404_v41, 0.0  ;;  %v1148_v4 = vmul.f32 %v11361_v37, %v11361_v37  ;;  %v1150_v28 = vmul.f32 %v11366_v32, %v11366_v32 }
 0x2e4   : > { %8847 = vmatmul.mubr.msk.f32.gmra.mrb[16].mxu0 %vm1716_vm2, %v1693_v18  ;;  %v1149_v18 = vmul.f32 %v11371_v11, %v11371_v11 }
 0x2e5   : > { %v1242_v59 = vsel %vm432_vm0, %v1150_v28, 0.0 }
 0x2e8   : > { %1620 = vrot.lane.b32.xlu0 %v10949_v21, %s10215_s18  ;;  %v505_v21 = vsel %vm432_vm0, %v11401_v36, 0.0 }
 0x2ff   : > { %v8839_v19 = vpop.f32.mrb[10].mxu0 }
 0x300   : > { %v11395_v6 = vadd.f32 %v8839_v19, %v10983_v17  ;;  %v1929_v40 = vpop.f32.mrb[11].mxu0  ;;  %v1239_v19 = vsel %vm432_vm0, %v1149_v18, 0.0 }
 0x301   : > { %v11398_v31 = vadd.f32 %v10983_v17, %v1929_v40  ;;  %v1236_v40 = vsel %vm432_vm0, %v1148_v4, 0.0  ;;  %v588_v4 = vmul.f32 %v11404_v41, %v11404_v41 }
 0x302   : > { %13633 = vst [vmem:[#allocation62_spill] sm:$0xff] %v11395_v6 }
 0x303   : > { %13634 = vst [vmem:[#allocation63_spill] sm:$0xff] %v11398_v31  ;;  %v11410_v48 = vpack.c.bf16 %v11395_v6, %v11398_v31 }
 0x305   : > { %13635 = vst [vmem:[#allocation64_spill] sm:$0xff] %v11410_v48  ;;  %v1245_v48 = vsel %vm432_vm0, %v1151_v57, 0.0  ;;  %v586_v57 = vmul.f32 %v11401_v36, %v11401_v36 }
 0x307   : > { %506 = vadd.xlane.f32.xlu1 %v505_v21  ;;  %512 = vadd.xlane.f32.xlu0 %v511_v56  ;;  %v11432_v21 = vld [vmem:[%s10310_s17 + $0xc8] sm:$0xff]  ;;  %v514_v56 = vsel %vm432_vm0, %v11429_v2, 0.0  ;;  %v666_v10 = vsel %vm432_vm0, %v586_v57, 0.0 }
 0x308   : > { %v508_v18 = vsel %vm432_vm0, %v11432_v21, 0.0  ;;  %v587_v31 = vmul.f32 %v11432_v21, %v11432_v21 }
 0x30a   : > { %v669_v14 = vsel %vm432_vm0, %v587_v31, 0.0 }
 0x30b   : > { %1240 = vadd.xlane.f32.xlu1 %v1239_v19  ;;  %1237 = vadd.xlane.f32.xlu0 %v1236_v40 }
 0x30f   : > { %1246 = vadd.xlane.f32.xlu1 %v1245_v48  ;;  %1243 = vadd.xlane.f32.xlu0 %v1242_v59  ;;  %v672_v59 = vsel %vm432_vm0, %v588_v4, 0.0  ;;  %v1307_v4 = vmul.f32 %v1115_v38, %v1115_v38 }
 0x311   : > { %v11442_v19 = vpop.f32.mrb[14].mxu1 }
 0x312   : > { %13636 = vst [vmem:[#allocation65_spill] sm:$0xff] %v11442_v19  ;;  %v11444_v28 = vpop.xlane.xlu1 %494  ;;  %v11446_v40 = vpop.f32.mrb[15].mxu1 }
 0x313   : > { %13637 = vst [vmem:[#allocation66_spill] sm:$0xff] %v11444_v28  ;;  %v501_v48 = vpop.xlane.xlu0 %500  ;;  %515 = vadd.xlane.f32.xlu1 %v514_v56  ;;  %509 = vadd.xlane.f32.xlu0 %v508_v18  ;;  %v589_v56 = vmul.f32 %v11429_v2, %v11429_v2 }
 0x315   : > { %v675_v28 = vsel %vm432_vm0, %v589_v56, 0.0 }
 0x316   : > { %v11452_v6 = vpop.xlane.xlu1 %1228 }
 0x317   : > { %13638 = vst [vmem:[#allocation67_spill] sm:$0xff] %v11452_v6  ;;  %v11454_v43 = vpop.xlane.xlu0 %1225  ;;  %673 = vadd.xlane.f32.xlu1 %v672_v59  ;;  %667 = vadd.xlane.f32.xlu0 %v666_v10  ;;  %v552_v59 = vmul.f32 0.25, %v501_v48 }
 0x318   : > { %13639 = vst [vmem:[#allocation68_spill] sm:$0xff] %v11454_v43 }
 0x319   : > { %v744_v3 = vmul.f32 %v552_v59, %v552_v59 }
 0x31a   : > { %v1235_v18 = vpop.xlane.xlu1 %1234 }
 0x31b   : > { %v1275_v33 = vmul.f32 0.25, %v1235_v18  ;;  %v1232_v57 = vpop.xlane.xlu0 %1231  ;;  %670 = vadd.xlane.f32.xlu1 %v669_v14 }
 0x31c   : > { %v1274_v30 = vmul.f32 0.25, %v1232_v57 }
 0x31d   : > { %v1339_v0 = vsub.f32 %v1275_v33, %v1307_v4 }
 0x31e   : > { %v1338_v6 = vsub.f32 %v1274_v30, %v1306_v47  ;;  %v504_v43 = vpop.xlane.xlu1 %503 }
 0x31f   : > { %v1403_v10 = vadd.f32 1e-06, %v1339_v0  ;;  %v11460_v7 = vpop.xlane.xlu0 %497  ;;  %676 = vadd.xlane.f32.xlu1 %v675_v28  ;;  %v553_v56 = vmul.f32 0.25, %v504_v43 }
 0x320   : > { %v1402_v31 = vadd.f32 1e-06, %v1338_v6  ;;  %v1371_v6 = vsub.f32 %v11195_v50, %v1115_v38 }
 0x321   : > { %9812 = vrsqrt.f32 %v1403_v10  ;;  %v745_v4 = vmul.f32 %v553_v56, %v553_v56 }
 0x322   : > { %9814 = vrsqrt.f32 %v1402_v31  ;;  %v662_v39 = vpop.xlane.xlu1 %661 }
 0x323   : > { %v712_v18 = vmul.f32 0.25, %v662_v39  ;;  %v11462_v45 = vpop.xlane.xlu0 %655  ;;  %v1370_v39 = vsub.f32 %v11181_v44, %v1114_v58 }
 0x325   : > { %v776_v14 = vsub.f32 %v712_v18, %v744_v3 }
 0x326   : > { %v11464_v57 = vpop.xlane.xlu1 %658 }
 0x327   : > { %v840_v33 = vadd.f32 1e-06, %v776_v14  ;;  %v1617_v30 = vpop.permute.xlu0 %1616 }
 0x328   : > { %v1694_v47 = vsel %vm432_vm0, %v11021_v25, %v1617_v30  ;;  %v808_v30 = vsub.f32 %v11221_v29, %v552_v59 }
 0x329   : > { %9816 = vrsqrt.f32 %v840_v33  ;;  %8849 = vmatprep.mubr.msk.f32.mxu0 %vm1716_vm2, %v1694_v47 }
 0x32a   : > { %v665_v28 = vpop.xlane.xlu1 %664 }
 0x32b   : > { %v9813_v48 = vpop.eup %9812  ;;  %v713_v0 = vmul.f32 0.25, %v665_v28 }
 0x32c   : > { %v9815_v3 = vpop.eup %9814  ;;  %v1467_v10 = vmul.f32 %v9813_v48, %v1371_v6 }
 0x32d   : > { %v777_v31 = vsub.f32 %v713_v0, %v745_v4  ;;  %1624 = vrot.lane.b32.xlu0 %v10961_v22, %s10215_s18  ;;  %v1466_v43 = vmul.f32 %v9815_v3, %v1370_v39  ;;  %v809_v0 = vsub.f32 %v11252_v60, %v553_v56 }
 0x32e   : > { %v1619_v18 = vpop.permute.xlu1 %1618  ;;  %v1505_v25 = vmul.f32 %v11117_v46, %v1467_v10 }
 0x32f   : > { %v841_v14 = vadd.f32 1e-06, %v777_v31  ;;  %v1695_v38 = vsel %vm432_vm0, %v11040_v53, %v1619_v18  ;;  %v1504_v33 = vmul.f32 %v11117_v46, %v1466_v43  ;;  %v11519_v18 = vld [vmem:[%s10310_s17 + $0xe0] sm:$0xff] }
 0x330   : > { %1626 = vrot.lane.b32.xlu1 %v10971_v27, %s10215_s18  ;;  %8850 = vmatmul.mubr.msk.f32.gmra.mrb[18].mxu0 %vm1716_vm2, %v1695_v38  ;;  %v11481_v58 = vadd.f32 %v11127_v20, %v1505_v25  ;;  %v517_v56 = vsel %vm432_vm0, %v11519_v18, 0.0  ;;  %v11524_v25 = vld [vmem:[%s10310_s17 + $0xe8] sm:$0xff]  ;;  %v11529_v38 = vld [vmem:[%s10310_s17 + $0xf0] sm:$0xff] }
 0x331   : > { %9818 = vrsqrt.f32 %v841_v14  ;;  %1628 = vrot.lane.b32.xlu0 %v11176_v15, %s10215_s18  ;;  %v11486_v22 = vadd.f32 %v11127_v20, %v1504_v33  ;;  %v520_v14 = vsel %vm432_vm0, %v11524_v25, 0.0  ;;  %v11532_v33 = vld [vmem:[%s10310_s17 + $0xf8] sm:$0xff] }
 0x332   : > { %13640 = vst [vmem:[#allocation69_spill] sm:$0xff] %v11481_v58 }
 0x333   : > { %13641 = vst [vmem:[#allocation70_spill] sm:$0xff] %v11486_v22  ;;  %v9817_v53 = vpop.eup %9816  ;;  %v9396_v47 = vpack.c.bf16 %v11481_v58, %v11486_v22 }
 0x334   : > { %1630 = vrot.lane.b32.xlu1 %v11192_v63, %s10215_s18  ;;  %v904_v27 = vmul.f32 %v9817_v53, %v808_v30  ;;  %v523_v30 = vsel %vm432_vm0, %v11529_v38, 0.0  ;;  %v526_v53 = vsel %vm432_vm0, %v11532_v33, 0.0  ;;  %v4637_v63 = vsel %vm4630_vm3, %v10929_v62, -inf }
 0x335   : > { %9398 = vmatprep.subr.msk.bf16.mxu1 %vm10549_vm1, %v9396_v47  ;;  %v8842_v6 = vpop.f32.mrb[12].mxu0 }
 0x336   : > { %v11496_v28 = vadd.f32 %v8842_v6, %v10983_v17  ;;  %v1939_v15 = vpop.f32.mrb[13].mxu0  ;;  %v942_v48 = vmul.f32 %v11156_v52, %v904_v27  ;;  %v590_v27 = vmul.f32 %v11519_v18, %v11519_v18 }
 0x337   : > { %v11500_v59 = vadd.f32 %v10983_v17, %v1939_v15 }
 0x338   : > { %13642 = vst [vmem:[#allocation71_spill] sm:$0xff] %v11496_v28  ;;  %v980_v39 = vadd.f32 %v11164_v49, %v942_v48  ;;  %v678_v48 = vsel %vm432_vm0, %v590_v27, 0.0 }
 0x339   : > { %13643 = vst [vmem:[#allocation72_spill] sm:$0xff] %v11500_v59  ;;  %v11507_v4 = vpack.c.bf16 %v11496_v28, %v11500_v59 }
 0x33a   : > { %8951 = vmatprep.mubr.msk.f32.mxu1 %vm432_vm0, %v980_v39 }
 0x33b   : > { %13644 = vst [vmem:[#allocation73_spill] sm:$0xff] %v11507_v4  ;;  %v9819_v3 = vpop.eup %9818 }
 0x33c   : > { %v905_v10 = vmul.f32 %v9819_v3, %v809_v0 }
 0x33e   : > { %v943_v17 = vmul.f32 %v11156_v52, %v905_v10  ;;  %v593_v10 = vmul.f32 %v11532_v33, %v11532_v33 }
 0x340   : > { %v981_v31 = vadd.f32 %v11164_v49, %v943_v17 }
 0x342   : > { %8952 = vmatmul.mubr.msk.f32.vlgmr.msra.gmra.mrb[18].mxu1 %vm432_vm0, %v981_v31  ;;  %v11514_v43 = vpack.c.bf16 %v981_v31, %v980_v39  ;;  %v591_v39 = vmul.f32 %v11524_v25, %v11524_v25 }
 0x343   : > { %9401 = vmatpush3.bf16.xpose.msk.msra.mxu1 %vm10549_vm1, %v9396_v47  ;;  %v592_v47 = vmul.f32 %v11529_v38, %v11529_v38 }
 0x344   : > { %v681_v3 = vsel %vm432_vm0, %v591_v39, 0.0 }
 0x345   : > { %v684_v15 = vsel %vm432_vm0, %v592_v47, 0.0 }
 0x350   : > { %518 = vadd.xlane.f32.xlu0 %v517_v56  ;;  %v687_v56 = vsel %vm432_vm0, %v593_v10, 0.0 }
 0x354   : > { %521 = vadd.xlane.f32.xlu0 %v520_v14 }
 0x357   : > { %v11542_v6 = vpop.xlane.xlu0 %1077 }
 0x358   : > { %524 = vadd.xlane.f32.xlu1 %v523_v30  ;;  %527 = vadd.xlane.f32.xlu0 %v526_v53 }
 0x35b   : > { %v1084_v0 = vpop.xlane.xlu0 %1083 }
 0x35c   : > { %685 = vadd.xlane.f32.xlu1 %v684_v15  ;;  %679 = vadd.xlane.f32.xlu0 %v678_v48 }
 0x35f   : > { %v11551_v17 = vpop.xlane.xlu1 %1080  ;;  %v1087_v31 = vpop.xlane.xlu0 %1086 }
 0x360   : > { %682 = vadd.xlane.f32.xlu1 %v681_v3 }
 0x363   : > { %v1623_v14 = vpop.permute.xlu1 %1622  ;;  %v1621_v30 = vpop.permute.xlu0 %1620 }
 0x364   : > { %v1697_v53 = vsel %vm432_vm0, %v11255_v35, %v1623_v14  ;;  %v1696_v47 = vsel %vm432_vm0, %v11218_v54, %v1621_v30  ;;  %688 = vadd.xlane.f32.xlu1 %v687_v56  ;;  %v4631_v30 = vsel %vm4630_vm3, %v10916_v24, -inf }
 0x365   : > { %8852 = vmatprep.mubr.msk.f32.mxu0 %vm1716_vm2, %v1696_v47 }
 0x366   : > { %8853 = vmatmul.mubr.msk.f32.gmra.mrb[20].mxu0 %vm1716_vm2, %v1697_v53  ;;  %v1119_v53 = vmul.f32 0.25, %v1087_v31  ;;  %v4634_v31 = vsel %vm4630_vm3, %v10914_v16, -inf }
 0x368   : > { %v1311_v15 = vmul.f32 %v1119_v53, %v1119_v53 }
 0x372   : > { %1632 = vrot.lane.b32.xlu0 %v11181_v44, %s10215_s18  ;;  %v11575_v44 = vld [vmem:[%s13416_s7] ss:$0 sm:$0xff] }
 0x375   : > { %1634 = vrot.lane.b32.xlu1 %v11195_v50, %s10215_s18 }
 0x376   : > { %1636 = vrot.lane.b32.xlu0 %v11361_v37, %s10215_s18 }
 0x379   : > { %1638 = vrot.lane.b32.xlu1 %v11371_v11, %s10215_s18 }
 0x37a   : > { %1640 = vrot.lane.b32.xlu0 %v11366_v32, %s10215_s18 }
 0x37d   : > { %1642 = vrot.lane.b32.xlu1 %v11374_v23, %s10215_s18 }
 0x381   : > { %v8845_v54 = vpop.f32.mrb[14].mxu0 }
 0x382   : > { %v11578_v50 = vadd.f32 %v11575_v44, %v8845_v54  ;;  %v1949_v35 = vpop.f32.mrb[15].mxu0  ;;  %v1118_v54 = vmul.f32 0.25, %v1084_v0 }
 0x383   : > { %v11581_v27 = vadd.f32 %v11575_v44, %v1949_v35 }
 0x384   : > { %13645 = vst [vmem:[#allocation74_spill] sm:$0xff] %v11578_v50  ;;  %v1310_v59 = vmul.f32 %v1118_v54, %v1118_v54 }
 0x385   : > { %13646 = vst [vmem:[#allocation75_spill] sm:$0xff] %v11581_v27  ;;  %v11587_v48 = vpack.c.bf16 %v11578_v50, %v11581_v27 }
 0x387   : > { %13647 = vst [vmem:[#allocation76_spill] sm:$0xff] %v11587_v48 }
 0x393   : > { %v11589_v39 = vpop.f32.mrb[16].mxu1 }
 0x394   : > { %13648 = vst [vmem:[#allocation77_spill] sm:$0xff] %v11589_v39  ;;  %v11591_v3 = vpop.xlane.xlu1 %506  ;;  %v11593_v10 = vpop.f32.mrb[17].mxu1 }
 0x395   : > { %13649 = vst [vmem:[#allocation78_spill] sm:$0xff] %v11593_v10  ;;  %v513_v56 = vpop.xlane.xlu0 %512 }
 0x396   : > { %v11607_v0 = vmul.f32 0.25, %v513_v56 }
 0x398   : > { %v11595_v14 = vpop.xlane.xlu1 %1240 }
 0x399   : > { %v11599_v47 = vpop.xlane.xlu0 %1237  ;;  %4632 = vmax.xlane.f32.xlu0 %v4631_v30  ;;  %v4640_v30 = vsel %vm4630_vm3, %v10926_v26, -inf }
 0x39c   : > { %v1247_v35 = vpop.xlane.xlu1 %1246 }
 0x39d   : > { %v1279_v48 = vmul.f32 0.25, %v1247_v35  ;;  %v1244_v4 = vpop.xlane.xlu0 %1243  ;;  %4638 = vmax.xlane.f32.xlu0 %v4637_v63 }
 0x39e   : > { %v1278_v28 = vmul.f32 0.25, %v1244_v4  ;;  %v748_v4 = vmul.f32 %v11607_v0, %v11607_v0 }
 0x39f   : > { %v1343_v27 = vsub.f32 %v1279_v48, %v1311_v15 }
 0x3a0   : > { %v1342_v50 = vsub.f32 %v1278_v28, %v1310_v59  ;;  %v516_v58 = vpop.xlane.xlu1 %515  ;;  %v4649_v28 = vsel %vm4630_vm3, %v10987_v8, -inf  ;;  %v4643_v59 = vsel %vm4630_vm3, %v10958_v5, -inf }
 0x3a1   : > { %v1407_v24 = vadd.f32 1e-06, %v1343_v27  ;;  %v11609_v22 = vpop.xlane.xlu0 %509  ;;  %4635 = vmax.xlane.f32.xlu1 %v4634_v31  ;;  %4641 = vmax.xlane.f32.xlu0 %v4640_v30  ;;  %v11625_v31 = vmul.f32 0.25, %v516_v58  ;;  %v4655_v58 = vsel %vm4630_vm3, %v11007_v34, -inf  ;;  %v4658_v34 = vsel %vm4630_vm3, %v11005_v1, -inf }
 0x3a2   : > { %v1406_v35 = vadd.f32 1e-06, %v1342_v50  ;;  %v4646_v50 = vsel %vm4630_vm3, %v10953_v61, -inf  ;;  %v4664_v61 = vsel %vm4630_vm3, %v11097_v51, -inf }
 0x3a3   : > { %9820 = vrsqrt.f32 %v1407_v24  ;;  %v4652_v24 = vsel %vm4630_vm3, %v10985_v13, -inf }
 0x3a4   : > { %9822 = vrsqrt.f32 %v1406_v35  ;;  %v674_v63 = vpop.xlane.xlu1 %673 }
 0x3a5   : > { %v716_v15 = vmul.f32 0.25, %v674_v63  ;;  %v11617_v48 = vpop.xlane.xlu0 %667  ;;  %4650 = vmax.xlane.f32.xlu1 %v4649_v28  ;;  %4644 = vmax.xlane.f32.xlu0 %v4643_v59  ;;  %v1375_v28 = vsub.f32 %v11374_v23, %v1119_v53 }
 0x3a7   : > { %v780_v27 = vsub.f32 %v716_v15, %v748_v4  ;;  %v4661_v4 = vsel %vm4630_vm3, %v11099_v42, -inf }
 0x3a8   : > { %v11619_v56 = vpop.xlane.xlu1 %670 }
 0x3a9   : > { %v844_v30 = vadd.f32 1e-06, %v780_v27  ;;  %v1625_v35 = vpop.permute.xlu0 %1624  ;;  %4653 = vmax.xlane.f32.xlu1 %v4652_v24  ;;  %4647 = vmax.xlane.f32.xlu0 %v4646_v50  ;;  %v1374_v27 = vsub.f32 %v11366_v32, %v1118_v54  ;;  %v749_v24 = vmul.f32 %v11625_v31, %v11625_v31 }
 0x3aa   : > { %v1698_v63 = vsel %vm432_vm0, %v11221_v29, %v1625_v35 }
 0x3ab   : > { %9824 = vrsqrt.f32 %v844_v30  ;;  %8855 = vmatprep.mubr.msk.f32.mxu0 %vm1716_vm2, %v1698_v63 }
 0x3ac   : > { %v677_v59 = vpop.xlane.xlu1 %676 }
 0x3ad   : > { %v9821_v15 = vpop.eup %9820  ;;  %v717_v50 = vmul.f32 0.25, %v677_v59  ;;  %4662 = vmax.xlane.f32.xlu1 %v4661_v4  ;;  %4656 = vmax.xlane.f32.xlu0 %v4655_v58  ;;  %v1629_v23 = vpop.permute.xlu0 %1628 }
 0x3ae   : > { %v9823_v29 = vpop.eup %9822  ;;  %v1471_v30 = vmul.f32 %v9821_v15, %v1375_v28  ;;  %v1700_v4 = vsel %vm432_vm0, %v11401_v36, %v1629_v23 }
 0x3af   : > { %v781_v35 = vsub.f32 %v717_v50, %v749_v24  ;;  %v1470_v53 = vmul.f32 %v9823_v29, %v1374_v27 }
 0x3b0   : > { %v1627_v63 = vpop.permute.xlu1 %1626  ;;  %v1509_v32 = vmul.f32 %v11117_v46, %v1471_v30 }
 0x3b1   : > { %v845_v54 = vadd.f32 1e-06, %v781_v35  ;;  %v1699_v59 = vsel %vm432_vm0, %v11252_v60, %v1627_v63  ;;  %4665 = vmax.xlane.f32.xlu1 %v4664_v61  ;;  %4659 = vmax.xlane.f32.xlu0 %v4658_v34  ;;  %v1508_v28 = vmul.f32 %v11117_v46, %v1470_v53  ;;  %v812_v60 = vsub.f32 %v11404_v41, %v11607_v0  ;;  %v13651_v35 = vld [vmem:[#allocation47_spill] sm:$0xff] }
 0x3b2   : > { %8856 = vmatmul.mubr.msk.f32.gmra.mrb[22].mxu0 %vm1716_vm2, %v1699_v59  ;;  %v11650_v58 = vadd.f32 %v11127_v20, %v1509_v32  ;;  %v4667_v34 = vsel %vm4630_vm3, %v11284_v12, -inf  ;;  %v4673_v46 = vsel %vm4630_vm3, %v11446_v40, -inf  ;;  %v4670_v23 = vsel %vm4630_vm3, %v13651_v35, -inf }
 0x3b3   : > { %9826 = vrsqrt.f32 %v845_v54  ;;  %8858 = vmatprep.mubr.msk.f32.mxu0 %vm1716_vm2, %v1700_v4  ;;  %v11654_v15 = vadd.f32 %v11127_v20, %v1508_v28  ;;  %v4676_v53 = vsel %vm4630_vm3, %v11442_v19, -inf  ;;  %v813_v4 = vsub.f32 %v11429_v2, %v11625_v31  ;;  %v13654_v31 = vld [vmem:[#allocation9_spill] sm:$0xff] }
 0x3b4   : > { %v1631_v61 = vpop.permute.xlu1 %1630  ;;  %v11740_v12 = vmul.f32 0.25, %v11460_v7  ;;  %v11752_v7 = vmul.f32 0.25, %v11591_v3 }
 0x3b5   : > { %v9825_v27 = vpop.eup %9824  ;;  %v1701_v24 = vsel %vm432_vm0, %v11432_v21, %v1631_v61  ;;  %4668 = vmax.xlane.f32.xlu0 %v4667_v34  ;;  %4674 = vmax.xlane.f32.xlu1 %v4673_v46  ;;  %v9408_v20 = vpack.c.bf16 %v11650_v58, %v11654_v15  ;;  %v4688_v46 = vsel %vm4630_vm3, %v11589_v39, -inf }
 0x3b6   : > { %8859 = vmatmul.mubr.msk.f32.gmra.mrb[24].mxu0 %vm1716_vm2, %v1701_v24  ;;  %v908_v50 = vmul.f32 %v9825_v27, %v812_v60  ;;  %v4685_v60 = vsel %vm4630_vm3, %v11593_v10, -inf  ;;  %v11765_v10 = vmul.f32 0.25, %v11609_v22 }
 0x3b7   : > { %9410 = vmatprep.subr.msk.bf16.mxu1 %vm10549_vm1, %v9408_v20  ;;  %v8848_v0 = vpop.f32.mrb[16].mxu0 }
 0x3b8   : > { %v11670_v29 = vadd.f32 %v11575_v44, %v8848_v0  ;;  %v1959_v30 = vpop.f32.mrb[17].mxu0  ;;  %v946_v63 = vmul.f32 %v11156_v52, %v908_v50  ;;  %v13655_v0 = vld [vmem:[#allocation46_spill] sm:$0xff] }
 0x3b9   : > { %v11678_v32 = vadd.f32 %v11575_v44, %v1959_v30  ;;  %4671 = vmax.xlane.f32.xlu0 %v4670_v23  ;;  %4677 = vmax.xlane.f32.xlu1 %v4676_v53  ;;  %v11705_v30 = vmul.f32 0.25, %v13655_v0  ;;  %v706_v23 = vmul.f32 0.25, %v11289_v55  ;;  %v13661_v0 = vld [vmem:[#allocation66_spill] sm:$0xff] }
 0x3ba   : > { %13650 = vst [vmem:[#allocation79_spill] sm:$0xff] %v11670_v29  ;;  %v984_v54 = vadd.f32 %v11164_v49, %v946_v63  ;;  %v13657_v63 = vld [vmem:[#allocation49_spill] sm:$0xff] }
 0x3bb   : > { %13652 = vst [vmem:[#allocation80_spill] sm:$0xff] %v11678_v32  ;;  %v11685_v28 = vpack.c.bf16 %v11670_v29, %v11678_v32 }
 0x3bc   : > { %8965 = vmatprep.mubr.msk.f32.mxu1 %vm432_vm0, %v984_v54 }
 0x3bd   : > { %13653 = vst [vmem:[#allocation81_spill] sm:$0xff] %v11685_v28  ;;  %v9827_v61 = vpop.eup %9826  ;;  %4686 = vmax.xlane.f32.xlu1 %v4685_v60  ;;  %v13659_v60 = vld [vmem:[#allocation67_spill] sm:$0xff] }
 0x3be   : > { %v909_v34 = vmul.f32 %v9827_v61, %v813_v4  ;;  %v13658_v4 = vld [vmem:[#allocation60_spill] sm:$0xff]  ;;  %v1273_v61 = vmul.f32 0.25, %v13659_v60  ;;  %v710_v60 = vmul.f32 0.25, %v11462_v45  ;;  %v1277_v45 = vmul.f32 0.25, %v11595_v14 }
 0x3bf   : > { %v711_v14 = vmul.f32 0.25, %v11464_v57 }
 0x3c0   : > { %v947_v27 = vmul.f32 %v11156_v52, %v909_v34  ;;  %v13656_v52 = vld [vmem:[#allocation61_spill] sm:$0xff] }
 0x3c1   : > { %4689 = vmax.xlane.f32.xlu1 %v4688_v46  ;;  %v11709_v53 = vmul.f32 0.25, %v13656_v52  ;;  %v11724_v52 = vmul.f32 0.25, %v13661_v0  ;;  %v11737_v0 = vmul.f32 0.25, %v11551_v17 }
 0x3c2   : > { %v985_v24 = vadd.f32 %v11164_v49, %v947_v27  ;;  %v738_v49 = vmul.f32 %v11705_v30, %v11705_v30  ;;  %v13660_v27 = vld [vmem:[#allocation68_spill] sm:$0xff] }
 0x3c3   : > { %v1305_v55 = vmul.f32 %v11709_v53, %v11709_v53  ;;  %v742_v29 = vmul.f32 %v11724_v52, %v11724_v52  ;;  %v1309_v17 = vmul.f32 %v11737_v0, %v11737_v0 }
 0x3c4   : > { %8966 = vmatmul.mubr.msk.f32.vlgmr.msra.gmra.mrb[20].mxu1 %vm432_vm0, %v985_v24  ;;  %v11697_v50 = vpack.c.bf16 %v985_v24, %v984_v54  ;;  %v11714_v54 = vmul.f32 0.25, %v13657_v63  ;;  %v770_v46 = vsub.f32 %v706_v23, %v738_v49  ;;  %v1272_v24 = vmul.f32 0.25, %v13660_v27  ;;  %v13662_v63 = vld [vmem:[#allocation50_spill] sm:$0xff] }
 0x3c5   : > { %9413 = vmatpush3.bf16.xpose.msk.msra.mxu1 %vm10549_vm1, %v9408_v20  ;;  %v11717_v20 = vmul.f32 0.25, %v13658_v4  ;;  %v707_v28 = vmul.f32 0.25, %v13662_v63  ;;  %v1337_v32 = vsub.f32 %v1273_v61, %v1305_v55  ;;  %v11743_v63 = vmul.f32 0.25, %v11542_v6 }
 0x3c6   : > { %9422 = vmatprep.subr.msk.bf16.mxu1 %vm10549_vm1, %v13654_v31  ;;  %v739_v59 = vmul.f32 %v11714_v54, %v11714_v54  ;;  %v834_v49 = vadd.f32 1e-06, %v770_v46  ;;  %v774_v55 = vsub.f32 %v710_v60, %v742_v29  ;;  %v743_v29 = vmul.f32 %v11740_v12, %v11740_v12 }
 0x3c7   : > { %v1304_v4 = vmul.f32 %v11717_v20, %v11717_v20  ;;  %v1401_v61 = vadd.f32 1e-06, %v1337_v32  ;;  %v1308_v32 = vmul.f32 %v11743_v63, %v11743_v63 }
 0x3c8   : > { %v771_v35 = vsub.f32 %v707_v28, %v739_v59  ;;  %9828 = vrsqrt.f32 %v834_v49  ;;  %v838_v59 = vadd.f32 1e-06, %v774_v55  ;;  %v775_v57 = vsub.f32 %v711_v14, %v743_v29 }
 0x3c9   : > { %v1336_v27 = vsub.f32 %v1272_v24, %v1304_v4  ;;  %v1276_v4 = vmul.f32 0.25, %v11599_v47  ;;  %9830 = vrsqrt.f32 %v1401_v61  ;;  %v1341_v47 = vsub.f32 %v1277_v45, %v1309_v17 }
 0x3ca   : > { %v835_v6 = vadd.f32 1e-06, %v771_v35  ;;  %v747_v29 = vmul.f32 %v11765_v10, %v11765_v10  ;;  %v715_v14 = vmul.f32 0.25, %v11619_v56 }
 0x3cb   : > { %v1400_v24 = vadd.f32 1e-06, %v1336_v27  ;;  %v1340_v49 = vsub.f32 %v1276_v4, %v1308_v32  ;;  %v746_v27 = vmul.f32 %v11752_v7, %v11752_v7 }
 0x3cd   : > { %9832 = vrsqrt.f32 %v1400_v24  ;;  %v1404_v4 = vadd.f32 1e-06, %v1340_v49 }
 0x3ce   : > { %9834 = vrsqrt.f32 %v835_v6  ;;  %v839_v6 = vadd.f32 1e-06, %v775_v57 }
 0x3cf   : > { %9836 = vrsqrt.f32 %v838_v59  ;;  %v10133_v59 = vld [vmem:[%s10310_s17 + $0x80] sm:$0xff] }
 0x3d2   : > { %v9829_v22 = vpop.eup %9828 }
 0x3dd   : > { %v519_v34 = vpop.xlane.xlu0 %518 }
 0x3de   : > { %v11771_v19 = vmul.f32 0.25, %v519_v34 }
 0x3e0   : > { %v750_v56 = vmul.f32 %v11771_v19, %v11771_v19 }
 0x3e1   : > { %v11732_v23 = vpop.xlane.xlu0 %521 }
 0x3e5   : > { %v525_v1 = vpop.xlane.xlu1 %524  ;;  %v528_v46 = vpop.xlane.xlu0 %527 }
 0x3e6   : > { %v11747_v39 = vmul.f32 0.25, %v525_v1  ;;  %v714_v1 = vmul.f32 0.25, %v11617_v48  ;;  %v1405_v48 = vadd.f32 1e-06, %v1341_v47  ;;  %v11767_v17 = vmul.f32 0.25, %v528_v46 }
 0x3e7   : > { %v802_v46 = vsub.f32 %v10133_v59, %v11705_v30 }
 0x3e8   : > { %v752_v3 = vmul.f32 %v11747_v39, %v11747_v39  ;;  %v778_v55 = vsub.f32 %v714_v1, %v746_v27  ;;  %v753_v49 = vmul.f32 %v11767_v17, %v11767_v17 }
 0x3e9   : > { %v686_v28 = vpop.xlane.xlu1 %685  ;;  %v680_v60 = vpop.xlane.xlu0 %679  ;;  %v898_v27 = vmul.f32 %v9829_v22, %v802_v46  ;;  %v11790_v22 = vmul.f32 0.25, %v11732_v23 }
 0x3ea   : > { %v720_v35 = vmul.f32 0.25, %v686_v28  ;;  %v842_v47 = vadd.f32 1e-06, %v778_v55  ;;  %v10135_v55 = vld [vmem:[%s10281_s14 + $0xc8] sm:$0xff] }
 0x3ec   : > { %v784_v61 = vsub.f32 %v720_v35, %v752_v3  ;;  %v9831_v35 = vpop.eup %9830 }
 0x3ed   : > { %v683_v45 = vpop.xlane.xlu1 %682  ;;  %v1633_v24 = vpop.permute.xlu0 %1632 }
 0x3ee   : > { %v848_v32 = vadd.f32 1e-06, %v784_v61  ;;  %v1702_v28 = vsel %vm432_vm0, %v11404_v41, %v1633_v24  ;;  %v718_v41 = vmul.f32 0.25, %v680_v60  ;;  %v9833_v57 = vpop.eup %9832  ;;  %v10134_v61 = vld [vmem:[%s10281_s14 + $0xc0] sm:$0xff]  ;;  %v1369_v24 = vsub.f32 %v10135_v55, %v11709_v53 }
 0x3ef   : > { %8861 = vmatprep.mubr.msk.f32.mxu0 %vm1716_vm2, %v1702_v28  ;;  %v1368_v30 = vsub.f32 %v10134_v61, %v11717_v20  ;;  %v9835_v59 = vpop.eup %9834 }
 0x3f0   : > { %9838 = vrsqrt.f32 %v848_v32 }
 0x3f1   : > { %9840 = vrsqrt.f32 %v1405_v48  ;;  %v689_v34 = vpop.xlane.xlu1 %688  ;;  %v1637_v1 = vpop.permute.xlu0 %1636  ;;  %v779_v48 = vsub.f32 %v715_v14, %v747_v29  ;;  %v10136_v14 = vld [vmem:[%s10310_s17 + $0x88] sm:$0xff]  ;;  %v1464_v23 = vmul.f32 %v9833_v57, %v1368_v30 }
 0x3f2   : > { %9842 = vrsqrt.f32 %v1404_v4  ;;  %v721_v3 = vmul.f32 0.25, %v689_v34  ;;  %v782_v4 = vsub.f32 %v718_v41, %v750_v56  ;;  %v1704_v28 = vsel %vm432_vm0, %v11519_v18, %v1637_v1  ;;  %v9837_v29 = vpop.eup %9836  ;;  %v10138_v1 = vld [vmem:[%s10310_s17 + $0xa0] sm:$0xff] }
 0x3f3   : > { %9844 = vrsqrt.f32 %v839_v6  ;;  %v803_v53 = vsub.f32 %v10136_v14, %v11714_v54  ;;  %v1465_v34 = vmul.f32 %v9831_v35, %v1369_v24  ;;  %v816_v56 = vsub.f32 %v11529_v38, %v11747_v39  ;;  %v10139_v39 = vld [vmem:[%s13413_s4] ss:$0 sm:$0xff] }
 0x3f4   : > { %v785_v60 = vsub.f32 %v721_v3, %v753_v49  ;;  %9846 = vrsqrt.f32 %v842_v47  ;;  %v11800_v47 = vld [vmem:[%s13411_s2] ss:$0 sm:$0xff]  ;;  %v806_v49 = vsub.f32 %v10138_v1, %v11724_v52  ;;  %v719_v3 = vmul.f32 0.25, %v683_v45 }
 0x3f5   : > { %v1635_v32 = vpop.permute.xlu1 %1634  ;;  %v1641_v6 = vpop.permute.xlu0 %1640  ;;  %v936_v41 = vmul.f32 %v11800_v47, %v898_v27  ;;  %v899_v54 = vmul.f32 %v9835_v59, %v803_v53  ;;  %v846_v61 = vadd.f32 1e-06, %v782_v4  ;;  %v751_v35 = vmul.f32 %v11790_v22, %v11790_v22 }
 0x3f6   : > { %v849_v46 = vadd.f32 1e-06, %v785_v60  ;;  %v1703_v20 = vsel %vm432_vm0, %v11429_v2, %v1635_v32  ;;  %v843_v2 = vadd.f32 1e-06, %v779_v48  ;;  %v1706_v55 = vsel %vm432_vm0, %v11529_v38, %v1641_v6 }
 0x3f7   : > { %8862 = vmatmul.mubr.msk.f32.gmra.mrb[26].mxu0 %vm1716_vm2, %v1703_v20  ;;  %v902_v45 = vmul.f32 %v9837_v29, %v806_v49  ;;  %v1502_v48 = vmul.f32 %v10139_v39, %v1464_v23  ;;  %v1503_v24 = vmul.f32 %v10139_v39, %v1465_v34  ;;  %v1373_v4 = vsub.f32 %v11371_v11, %v11737_v0  ;;  %v10141_v29 = vld [vmem:[%s10310_s17 + $0xa8] sm:$0xff] }
 0x3f8   : > { %9848 = vrsqrt.f32 %v849_v46  ;;  %8864 = vmatprep.mubr.msk.f32.mxu0 %vm1716_vm2, %v1704_v28  ;;  %v783_v32 = vsub.f32 %v719_v3, %v751_v35  ;;  %v11824_v28 = vld [vmem:[%s13412_s3] ss:$0 sm:$0xff]  ;;  %v937_v46 = vmul.f32 %v11800_v47, %v899_v54  ;;  %v1372_v20 = vsub.f32 %v11361_v37, %v11743_v63 }
 0x3f9   : > { %v1639_v60 = vpop.permute.xlu1 %1638  ;;  %9850 = vrsqrt.f32 %v843_v2  ;;  %v11827_v59 = vadd.f32 %v11824_v28, %v936_v41  ;;  %v807_v14 = vsub.f32 %v10141_v29, %v11740_v12  ;;  %v940_v23 = vmul.f32 %v11800_v47, %v902_v45  ;;  %v10142_v37 = vld [vmem:[%s13414_s5] ss:$0 sm:$0xff]  ;;  %v13664_v45 = vld [vmem:[#allocation53_spill] sm:$0xff] }
 0x3fa   : > { %v9839_v27 = vpop.eup %9838  ;;  %v1705_v52 = vsel %vm432_vm0, %v11524_v25, %v1639_v60  ;;  %9852 = vrsqrt.f32 %v846_v61  ;;  %v11845_v63 = vadd.f32 %v10142_v37, %v1502_v48  ;;  %v11847_v49 = vadd.f32 %v10142_v37, %v1503_v24 }
 0x3fb   : > { %v9841_v57 = vpop.eup %9840  ;;  %8865 = vmatmul.mubr.msk.f32.gmra.mrb[28].mxu0 %vm1716_vm2, %v1705_v52  ;;  %v912_v30 = vmul.f32 %v9839_v27, %v816_v56  ;;  %v810_v2 = vsub.f32 %v11401_v36, %v11752_v7  ;;  %v847_v3 = vadd.f32 1e-06, %v783_v32  ;;  %v817_v56 = vsub.f32 %v11532_v33, %v11767_v17 }
 0x3fc   : > { %v9843_v38 = vpop.eup %9842  ;;  %8867 = vmatprep.mubr.msk.f32.mxu0 %vm1716_vm2, %v1706_v55  ;;  %v1469_v41 = vmul.f32 %v9841_v57, %v1373_v4  ;;  %v11858_v61 = vadd.f32 %v11824_v28, %v937_v46  ;;  %v11861_v55 = vadd.f32 %v11824_v28, %v940_v23 }
 0x3fd   : > { %v1643_v6 = vpop.permute.xlu1 %1642  ;;  %v950_v11 = vmul.f32 %v11800_v47, %v912_v30  ;;  %v9845_v0 = vpop.eup %9844  ;;  %v1468_v12 = vmul.f32 %v9843_v38, %v1372_v20  ;;  %9854 = vrsqrt.f32 %v847_v3  ;;  %v811_v38 = vsub.f32 %v11432_v21, %v11765_v10 }
 0x3fe   : > { %v1707_v53 = vsel %vm432_vm0, %v11532_v33, %v1643_v6  ;;  %v9847_v34 = vpop.eup %9846  ;;  %v903_v54 = vmul.f32 %v9845_v0, %v807_v14  ;;  %v1507_v36 = vmul.f32 %v10139_v39, %v1469_v41  ;;  %v9390_v33 = vpack.c.bf16 %v11847_v49, %v11845_v63  ;;  %v13667_v14 = vld [vmem:[#allocation4_spill] sm:$0xff] }
 0x3ff   : > { %8868 = vmatmul.mubr.msk.f32.gmra.mrb[30].mxu0 %vm1716_vm2, %v1707_v53  ;;  %v11840_v1 = vadd.f32 %v11824_v28, %v950_v11  ;;  %v906_v27 = vmul.f32 %v9847_v34, %v810_v2  ;;  %v1506_v17 = vmul.f32 %v10139_v39, %v1468_v12  ;;  %v814_v21 = vsub.f32 %v11519_v18, %v11771_v19  ;;  %v13668_v19 = vld [vmem:[#allocation15_spill] sm:$0xff]  ;;  %v13669_v2 = vld [vmem:[#allocation5_spill] sm:$0xff] }
 0x400   : > { %8930 = vmatprep.mubr.msk.f32.mxu0 %vm432_vm0, %v11827_v59  ;;  %v941_v48 = vmul.f32 %v11800_v47, %v903_v54  ;;  %v11885_v32 = vadd.f32 %v10142_v37, %v1507_v36  ;;  %v13670_v54 = vld [vmem:[#allocation10_spill] sm:$0xff] }
 0x401   : > { %8979 = vmatprep.mubr.msk.f32.mxu1 %vm432_vm0, %v11840_v1  ;;  %v944_v4 = vmul.f32 %v11800_v47, %v906_v27  ;;  %v11896_v0 = vadd.f32 %v10142_v37, %v1506_v17  ;;  %v815_v37 = vsub.f32 %v11524_v25, %v11790_v22  ;;  %v13671_v25 = vld [vmem:[#allocation21_spill] sm:$0xff]  ;;  %v13672_v22 = vld [vmem:[#allocation6_spill] sm:$0xff]  ;;  %v13674_v17 = vld [vmem:[#allocation16_spill] sm:$0xff] }
 0x402   : > { %v9849_v60 = vpop.eup %9848  ;;  %v11903_v29 = vadd.f32 %v11824_v28, %v941_v48  ;;  %v13679_v48 = vld [vmem:[#allocation23_spill] sm:$0xff] }
 0x403   : > { %v913_v7 = vmul.f32 %v9849_v60, %v817_v56  ;;  %v8851_v35 = vpop.f32.mrb[18].mxu0  ;;  %8931 = vmatmul.mubr.msk.f32.vlgmr.msra.gmra.mrb[32].mxu0 %vm432_vm0, %v11858_v61  ;;  %v9851_v24 = vpop.eup %9850  ;;  %v11911_v53 = vadd.f32 %v11824_v28, %v944_v4  ;;  %v9402_v18 = vpack.c.bf16 %v11885_v32, %v11896_v0  ;;  %v13682_v4 = vld [vmem:[#allocation7_spill] sm:$0xff] }
 0x404   : > { %v11868_v52 = vadd.f32 %v11575_v44, %v8851_v35  ;;  %9383 = vmatpush3.bf16.xpose.msk.msra.mxu0 %vm10549_vm1, %v13664_v45  ;;  %v1969_v57 = vpop.f32.mrb[19].mxu0  ;;  %8944 = vmatprep.mubr.msk.f32.mxu0 %vm432_vm0, %v11861_v55  ;;  %v9853_v46 = vpop.eup %9852  ;;  %v907_v10 = vmul.f32 %v9851_v24, %v811_v38  ;;  %v13673_v35 = vld [vmem:[#allocation11_spill] sm:$0xff]  ;;  %v13676_v45 = vld [vmem:[#allocation2_spill] sm:$0xff] }
 0x405   : > { %v11876_v30 = vadd.f32 %v11575_v44, %v1969_v57  ;;  %9392 = vmatprep.subr.msk.bf16.mxu0 %vm10549_vm1, %v9390_v33  ;;  %v951_v39 = vmul.f32 %v11800_v47, %v913_v7  ;;  %v910_v23 = vmul.f32 %v9853_v46, %v814_v21  ;;  %v13677_v57 = vld [vmem:[#allocation12_spill] sm:$0xff]  ;;  %v13680_v24 = vld [vmem:[#allocation3_spill] sm:$0xff]  ;;  %v13683_v46 = vld [vmem:[#allocation18_spill] sm:$0xff] }
 0x406   : > { %13663 = vst [vmem:[#allocation9_spill] sm:$0xff] %v11868_v52  ;;  %v13681_v38 = vld [vmem:[#allocation59_spill] sm:$0xff]  ;;  %v13684_v21 = vld [vmem:[#allocation24_spill] sm:$0xff] }
 0x407   : > { %13665 = vst [vmem:[#allocation46_spill] sm:$0xff] %v11876_v30  ;;  %v11891_v6 = vpack.c.bf16 %v11868_v52, %v11876_v30  ;;  %v11894_v11 = vadd.f32 %v11824_v28, %v951_v39  ;;  %v9855_v41 = vpop.eup %9854  ;;  %v948_v34 = vmul.f32 %v11800_v47, %v910_v23  ;;  %v13678_v39 = vld [vmem:[#allocation17_spill] sm:$0xff] }
 0x408   : > { %v911_v12 = vmul.f32 %v9855_v41, %v815_v37  ;;  %v13687_v23 = vld [vmem:[#allocation13_spill] sm:$0xff]  ;;  %v13691_v41 = vld [vmem:[#allocation14_spill] sm:$0xff]  ;;  %v13692_v37 = vld [vmem:[#allocation19_spill] sm:$0xff] }
 0x409   : > { %13666 = vst [vmem:[#allocation61_spill] sm:$0xff] %v11891_v6  ;;  %8980 = vmatmul.mubr.msk.f32.vlgmr.msra.gmra.mrb[22].mxu1 %vm432_vm0, %v11894_v11  ;;  %v11941_v56 = vadd.f32 %v11824_v28, %v948_v34  ;;  %v9462_v34 = vpack.c.bf16 %v11858_v61, %v11827_v59  ;;  %v13695_v59 = vld [vmem:[#allocation70_spill] sm:$0xff] }
 0x40a   : > { %9425 = vmatpush3.bf16.xpose.msk.msra.mxu1 %vm10549_vm1, %v13654_v31  ;;  %8993 = vmatprep.mubr.msk.f32.mxu1 %vm432_vm0, %v13667_v14  ;;  %v945_v31 = vmul.f32 %v11800_v47, %v907_v10  ;;  %v949_v27 = vmul.f32 %v11800_v47, %v911_v12  ;;  %v13675_v47 = vld [vmem:[#allocation39_spill] sm:$0xff]  ;;  %v13685_v10 = vld [vmem:[#allocation37_spill] sm:$0xff]  ;;  %v13686_v14 = vld [vmem:[#allocation8_spill] sm:$0xff] }
 0x40b   : > { %8945 = vmatmul.mubr.msk.f32.vlgmr.msra.gmra.mrb[34].mxu0 %vm432_vm0, %v11903_v29  ;;  %9434 = vmatprep.subr.msk.bf16.mxu1 %vm10549_vm1, %v13668_v19 }
 0x40c   : > { %9395 = vmatpush3.bf16.xpose.msk.msra.mxu0 %vm10549_vm1, %v9390_v33  ;;  %8958 = vmatprep.mubr.msk.f32.mxu0 %vm432_vm0, %v11911_v53  ;;  %v11933_v3 = vadd.f32 %v11824_v28, %v945_v31  ;;  %v987_v33 = vadd.f32 %v11824_v28, %v949_v27  ;;  %v13690_v31 = vld [vmem:[#allocation55_spill] sm:$0xff] }
 0x40d   : > { %9404 = vmatprep.subr.msk.bf16.mxu0 %vm10549_vm1, %v9402_v18 }
 0x411   : > { %8994 = vmatmul.mubr.msk.f32.vlgmr.msra.gmra.mrb[24].mxu1 %vm432_vm0, %v13669_v2  ;;  %v9504_v2 = vpack.c.bf16 %v11894_v11, %v11840_v1  ;;  %v9474_v1 = vpack.c.bf16 %v11903_v29, %v11861_v55  ;;  %v13701_v55 = vld [vmem:[#allocation36_spill] sm:$0xff]  ;;  %v9486_v29 = vpack.c.bf16 %v11933_v3, %v11911_v53 }
 0x412   : > { %9437 = vmatpush3.bf16.xpose.msk.msra.mxu1 %vm10549_vm1, %v13668_v19  ;;  %9007 = vmatprep.mubr.msk.f32.mxu1 %vm432_vm0, %v13670_v54  ;;  %v13688_v19 = vld [vmem:[#allocation26_spill] sm:$0xff] }
 0x413   : > { %8959 = vmatmul.mubr.msk.f32.vlgmr.msra.gmra.mrb[36].mxu0 %vm432_vm0, %v11933_v3  ;;  %9446 = vmatprep.subr.msk.bf16.mxu1 %vm10549_vm1, %v13671_v25 }
 0x414   : > { %9407 = vmatpush3.bf16.xpose.msk.msra.mxu0 %vm10549_vm1, %v9402_v18  ;;  %8972 = vmatprep.mubr.msk.f32.mxu0 %vm432_vm0, %v11941_v56  ;;  %v13689_v18 = vld [vmem:[#allocation38_spill] sm:$0xff] }
 0x415   : > { %9416 = vmatprep.subr.msk.bf16.mxu0 %vm10549_vm1, %v13672_v22  ;;  %v11955_v60 = vpop.f32.mrb[18].mxu1 }
 0x416   : > { %v11958_v36 = vpop.f32.mrb[19].mxu1  ;;  %v4700_v28 = vsel %vm4630_vm3, %v11955_v60, -inf }
 0x417   : > { %v4697_v7 = vsel %vm4630_vm3, %v11958_v36, -inf }
 0x418   : > { %4698 = vmax.xlane.f32.xlu1 %v4697_v7  ;;  %v13700_v7 = vld [vmem:[#allocation69_spill] sm:$0xff] }
 0x419   : > { %9008 = vmatmul.mubr.msk.f32.vlgmr.msra.gmra.mrb[26].mxu1 %vm432_vm0, %v13673_v35  ;;  %v13702_v35 = vld [vmem:[#allocation52_spill] sm:$0xff] }
 0x41a   : > { %9449 = vmatpush3.bf16.xpose.msk.msra.mxu1 %vm10549_vm1, %v13671_v25  ;;  %9021 = vmatprep.mubr.msk.f32.mxu1 %vm432_vm0, %v13674_v17  ;;  %v13703_v17 = vld [vmem:[#allocation51_spill] sm:$0xff] }
 0x41b   : > { %8973 = vmatmul.mubr.msk.f32.vlgmr.msra.gmra.mrb[38].mxu0 %vm432_vm0, %v987_v33  ;;  %9458 = vmatprep.subr.msk.bf16.mxu1 %vm10549_vm1, %v13675_v47 }
 0x41c   : > { %9419 = vmatpush3.bf16.xpose.msk.msra.mxu0 %vm10549_vm1, %v13672_v22  ;;  %8986 = vmatprep.mubr.msk.f32.mxu0 %vm432_vm0, %v13676_v45  ;;  %v13697_v22 = vld [vmem:[#allocation20_spill] sm:$0xff] }
 0x41d   : > { %4701 = vmax.xlane.f32.xlu1 %v4700_v28  ;;  %9428 = vmatprep.subr.msk.bf16.mxu0 %vm10549_vm1, %v13677_v57 }
 0x421   : > { %9022 = vmatmul.mubr.msk.f32.vlgmr.msra.gmra.mrb[28].mxu1 %vm432_vm0, %v13678_v39 }
 0x422   : > { %9461 = vmatpush3.bf16.xpose.msk.msra.mxu1 %vm10549_vm1, %v13675_v47  ;;  %9035 = vmatprep.mubr.msk.f32.mxu1 %vm432_vm0, %v13679_v48 }
 0x423   : > { %8987 = vmatmul.mubr.msk.f32.vlgmr.msra.gmra.mrb[40].mxu0 %vm432_vm0, %v13680_v24  ;;  %9470 = vmatprep.subr.msk.bf16.mxu1 %vm10549_vm1, %v13681_v38 }
 0x424   : > { %9431 = vmatpush3.bf16.xpose.msk.msra.mxu0 %vm10549_vm1, %v13677_v57  ;;  %9000 = vmatprep.mubr.msk.f32.mxu0 %vm432_vm0, %v13682_v4 }
 0x425   : > { %9440 = vmatprep.subr.msk.bf16.mxu0 %vm10549_vm1, %v13683_v46 }
 0x426   : > { %v12273_v20 = vpop.xlane.xlu0 %4632 }
 0x429   : > { %9036 = vmatmul.mubr.msk.f32.vlgmr.msra.gmra.mrb[30].mxu1 %vm432_vm0, %v13684_v21 }
 0x42a   : > { %9473 = vmatpush3.bf16.xpose.msk.msra.mxu1 %vm10549_vm1, %v13681_v38  ;;  %9049 = vmatprep.mubr.msk.f32.mxu1 %vm432_vm0, %v13685_v10 }
 0x42b   : > { %9001 = vmatmul.mubr.msk.f32.vlgmr.msra.gmra.mrb[42].mxu0 %vm432_vm0, %v13686_v14  ;;  %9482 = vmatprep.subr.msk.bf16.mxu1 %vm10549_vm1, %v11514_v43 }
 0x42c   : > { %9443 = vmatpush3.bf16.xpose.msk.msra.mxu0 %vm10549_vm1, %v13683_v46  ;;  %9014 = vmatprep.mubr.msk.f32.mxu0 %vm432_vm0, %v13687_v23 }
 0x42d   : > { %9452 = vmatprep.subr.msk.bf16.mxu0 %vm10549_vm1, %v13688_v19 }
 0x431   : > { %9050 = vmatmul.mubr.msk.f32.vlgmr.msra.gmra.mrb[32].mxu1 %vm432_vm0, %v13689_v18 }
 0x432   : > { %9485 = vmatpush3.bf16.xpose.msk.msra.mxu1 %vm10549_vm1, %v11514_v43  ;;  %9063 = vmatprep.mubr.msk.f32.mxu1 %vm432_vm0, %v13690_v31  ;;  %v13693_v43 = vld [vmem:[#allocation54_spill] sm:$0xff] }
 0x433   : > { %9015 = vmatmul.mubr.msk.f32.vlgmr.msra.gmra.mrb[44].mxu0 %vm432_vm0, %v13691_v41  ;;  %9494 = vmatprep.subr.msk.bf16.mxu1 %vm10549_vm1, %v11697_v50 }
 0x434   : > { %9455 = vmatpush3.bf16.xpose.msk.msra.mxu0 %vm10549_vm1, %v13688_v19  ;;  %9028 = vmatprep.mubr.msk.f32.mxu0 %vm432_vm0, %v13692_v37 }
 0x435   : > { %9464 = vmatprep.subr.msk.bf16.mxu0 %vm10549_vm1, %v9462_v34 }
 0x439   : > { %9064 = vmatmul.mubr.msk.f32.vlgmr.msra.gmra.mrb[34].mxu1 %vm432_vm0, %v13693_v43  ;;  %v8854_v12 = vpop.f32.mrb[20].mxu0 }
 0x43a   : > { %v12050_v54 = vadd.f32 %v11575_v44, %v8854_v12  ;;  %9497 = vmatpush3.bf16.xpose.msk.msra.mxu1 %vm10549_vm1, %v11697_v50  ;;  %9077 = vmatprep.mubr.msk.f32.mxu1 %vm432_vm0, %v13695_v59  ;;  %v1979_v61 = vpop.f32.mrb[21].mxu0  ;;  %v13698_v50 = vld [vmem:[#allocation35_spill] sm:$0xff] }
 0x43b   : > { %v12058_v25 = vadd.f32 %v11575_v44, %v1979_v61  ;;  %9029 = vmatmul.mubr.msk.f32.vlgmr.msra.gmra.mrb[46].mxu0 %vm432_vm0, %v13697_v22  ;;  %9506 = vmatprep.subr.msk.bf16.mxu1 %vm10549_vm1, %v9504_v2 }
 0x43c   : > { %13694 = vst [vmem:[#allocation49_spill] sm:$0xff] %v12050_v54  ;;  %9467 = vmatpush3.bf16.xpose.msk.msra.mxu0 %vm10549_vm1, %v9462_v34  ;;  %9042 = vmatprep.mubr.msk.f32.mxu0 %vm432_vm0, %v13698_v50 }
 0x43d   : > { %13696 = vst [vmem:[#allocation60_spill] sm:$0xff] %v12058_v25  ;;  %v12074_v27 = vpack.c.bf16 %v12050_v54, %v12058_v25  ;;  %9476 = vmatprep.subr.msk.bf16.mxu0 %vm10549_vm1, %v9474_v1 }
 0x43f   : > { %13699 = vst [vmem:[#allocation67_spill] sm:$0xff] %v12074_v27 }
 0x441   : > { %9078 = vmatmul.mubr.msk.f32.vlgmr.msra.gmra.mrb[36].mxu1 %vm432_vm0, %v13700_v7 }
 0x442   : > { %9509 = vmatpush3.bf16.xpose.msk.msra.mxu1 %vm10549_vm1, %v9504_v2  ;;  %9091 = vmatprep.mubr.msk.f32.mxu1 %vm432_vm0, %v11654_v15  ;;  %v9498_v15 = vpack.c.bf16 %v987_v33, %v11941_v56 }
 0x443   : > { %9043 = vmatmul.mubr.msk.f32.vlgmr.msra.gmra.mrb[48].mxu0 %vm432_vm0, %v13701_v55 }
 0x444   : > { %9479 = vmatpush3.bf16.xpose.msk.msra.mxu0 %vm10549_vm1, %v9474_v1  ;;  %9056 = vmatprep.mubr.msk.f32.mxu0 %vm432_vm0, %v13702_v35 }
 0x445   : > { %9488 = vmatprep.subr.msk.bf16.mxu0 %vm10549_vm1, %v9486_v29 }
 0x449   : > { %9092 = vmatmul.mubr.msk.f32.vlgmr.msra.gmra.mrb[38].mxu1 %vm432_vm0, %v11650_v58 }
 0x44b   : > { %9057 = vmatmul.mubr.msk.f32.vlgmr.msra.gmra.mrb[50].mxu0 %vm432_vm0, %v13703_v17 }
 0x44c   : > { %9491 = vmatpush3.bf16.xpose.msk.msra.mxu0 %vm10549_vm1, %v9486_v29  ;;  %9070 = vmatprep.mubr.msk.f32.mxu0 %vm432_vm0, %v11845_v63 }
 0x44d   : > { %9500 = vmatprep.subr.msk.bf16.mxu0 %vm10549_vm1, %v9498_v15 }
 0x453   : > { %9071 = vmatmul.mubr.msk.f32.vlgmr.msra.gmra.mrb[52].mxu0 %vm432_vm0, %v11847_v49 }
 0x454   : > { %9503 = vmatpush3.bf16.xpose.msk.msra.mxu0 %vm10549_vm1, %v9498_v15  ;;  %9084 = vmatprep.mubr.msk.f32.mxu0 %vm432_vm0, %v11896_v0 }
 0x45b   : > { %9085 = vmatmul.mubr.msk.f32.vlgmr.msra.gmra.mrb[54].mxu0 %vm432_vm0, %v11885_v32 }
 0x485   : > { %v8857_v58 = vpop.f32.mrb[22].mxu0 }
 0x486   : > { %v12114_v53 = vadd.f32 %v11575_v44, %v8857_v58  ;;  %v1989_v63 = vpop.f32.mrb[23].mxu0 }
 0x487   : > { %v12117_v3 = vadd.f32 %v11575_v44, %v1989_v63 }
 0x488   : > { %13704 = vst [vmem:[#allocation68_spill] sm:$0xff] %v12114_v53 }
 0x489   : > { %13705 = vst [vmem:[#allocation66_spill] sm:$0xff] %v12117_v3  ;;  %v12123_v9 = vpack.c.bf16 %v12114_v53, %v12117_v3  ;;  %v8860_v56 = vpop.f32.mrb[24].mxu0 }
 0x48a   : > { %v12126_v0 = vadd.f32 %v11575_v44, %v8860_v56  ;;  %v1999_v32 = vpop.f32.mrb[25].mxu0 }
 0x48b   : > { %13706 = vst [vmem:[#allocation50_spill] sm:$0xff] %v12123_v9  ;;  %v12129_v33 = vadd.f32 %v11575_v44, %v1999_v32 }
 0x48c   : > { %13707 = vst [vmem:[#allocation53_spill] sm:$0xff] %v12126_v0 }
 0x48d   : > { %13708 = vst [vmem:[#allocation4_spill] sm:$0xff] %v12129_v33  ;;  %v12135_v45 = vpack.c.bf16 %v12126_v0, %v12129_v33 }
 0x48f   : > { %13709 = vst [vmem:[#allocation15_spill] sm:$0xff] %v12135_v45 }
 0x497   : > { %v12137_v28 = vpop.f32.mrb[20].mxu1 }
 0x498   : > { %v12139_v57 = vpop.f32.mrb[21].mxu1  ;;  %v4712_v48 = vsel %vm4630_vm3, %v12137_v28, -inf }
 0x499   : > { %v4709_v39 = vsel %vm4630_vm3, %v12139_v57, -inf }
 0x49a   : > { %4710 = vmax.xlane.f32.xlu1 %v4709_v39 }
 0x49e   : > { %4713 = vmax.xlane.f32.xlu1 %v4712_v48 }
 0x4ca   : > { %v8863_v24 = vpop.f32.mrb[26].mxu0 }
 0x4cb   : > { %v12146_v38 = vadd.f32 %v11575_v44, %v8863_v24  ;;  %v2009_v4 = vpop.f32.mrb[27].mxu0 }
 0x4cc   : > { %v12149_v46 = vadd.f32 %v11575_v44, %v2009_v4 }
 0x4cd   : > { %13710 = vst [vmem:[#allocation5_spill] sm:$0xff] %v12146_v38 }
 0x4ce   : > { %13711 = vst [vmem:[#allocation10_spill] sm:$0xff] %v12149_v46  ;;  %v12155_v10 = vpack.c.bf16 %v12146_v38, %v12149_v46  ;;  %v8866_v14 = vpop.f32.mrb[28].mxu0 }
 0x4cf   : > { %v12158_v23 = vadd.f32 %v11575_v44, %v8866_v14  ;;  %v2019_v19 = vpop.f32.mrb[29].mxu0 }
 0x4d0   : > { %13712 = vst [vmem:[#allocation21_spill] sm:$0xff] %v12155_v10  ;;  %v12161_v18 = vadd.f32 %v11575_v44, %v2019_v19 }
 0x4d1   : > { %13713 = vst [vmem:[#allocation6_spill] sm:$0xff] %v12158_v23 }
 0x4d2   : > { %13714 = vst [vmem:[#allocation11_spill] sm:$0xff] %v12161_v18  ;;  %v12167_v41 = vpack.c.bf16 %v12158_v23, %v12161_v18  ;;  %v8869_v34 = vpop.f32.mrb[30].mxu0 }
 0x4d3   : > { %v12170_v37 = vadd.f32 %v11575_v44, %v8869_v34  ;;  %v2029_v43 = vpop.f32.mrb[31].mxu0 }
 0x4d4   : > { %13715 = vst [vmem:[#allocation16_spill] sm:$0xff] %v12167_v41  ;;  %v12173_v12 = vadd.f32 %v11575_v44, %v2029_v43 }
 0x4d5   : > { %13716 = vst [vmem:[#allocation39_spill] sm:$0xff] %v12170_v37 }
 0x4d6   : > { %13717 = vst [vmem:[#allocation2_spill] sm:$0xff] %v12173_v12  ;;  %v12179_v59 = vpack.c.bf16 %v12170_v37, %v12173_v12  ;;  %v12181_v61 = vpop.f32.mrb[32].mxu0 }
 0x4d7   : > { %v12183_v22 = vpop.f32.mrb[33].mxu0  ;;  %v4682_v44 = vsel %vm4630_vm3, %v12181_v61, -inf }
 0x4d8   : > { %13718 = vst [vmem:[#allocation12_spill] sm:$0xff] %v12179_v59  ;;  %v4679_v1 = vsel %vm4630_vm3, %v12183_v22, -inf }
 0x4d9   : > { %4680 = vmax.xlane.f32.xlu0 %v4679_v1 }
 0x4dc   : > { %v12187_v50 = vpop.f32.mrb[22].mxu1 }
 0x4dd   : > { %v12191_v7 = vpop.f32.mrb[23].mxu1  ;;  %4683 = vmax.xlane.f32.xlu0 %v4682_v44  ;;  %v4724_v15 = vsel %vm4630_vm3, %v12187_v50, -inf }
 0x4de   : > { %v12193_v55 = vpop.f32.mrb[34].mxu0  ;;  %v4721_v29 = vsel %vm4630_vm3, %v12191_v7, -inf }
 0x4df   : > { %v12197_v35 = vpop.f32.mrb[35].mxu0  ;;  %4722 = vmax.xlane.f32.xlu1 %v4721_v29  ;;  %v4694_v63 = vsel %vm4630_vm3, %v12193_v55, -inf }
 0x4e0   : > { %v4691_v17 = vsel %vm4630_vm3, %v12197_v35, -inf }
 0x4e1   : > { %4692 = vmax.xlane.f32.xlu0 %v4691_v17 }
 0x4e3   : > { %4725 = vmax.xlane.f32.xlu1 %v4724_v15 }
 0x4e4   : > { %v12203_v58 = vpop.f32.mrb[24].mxu1 }
 0x4e5   : > { %v12207_v56 = vpop.f32.mrb[25].mxu1  ;;  %4695 = vmax.xlane.f32.xlu0 %v4694_v63  ;;  %v6416_v4 = vsel %vm4630_vm3, %v12203_v58, -inf }
 0x4e6   : > { %v12209_v32 = vpop.f32.mrb[36].mxu0  ;;  %v6413_v39 = vsel %vm4630_vm3, %v12207_v56, -inf }
 0x4e7   : > { %v12213_v48 = vpop.f32.mrb[37].mxu0  ;;  %6414 = vmax.xlane.f32.xlu1 %v6413_v39  ;;  %v4706_v19 = vsel %vm4630_vm3, %v12209_v32, -inf }
 0x4e8   : > { %v4703_v24 = vsel %vm4630_vm3, %v12213_v48, -inf }
 0x4e9   : > { %4704 = vmax.xlane.f32.xlu0 %v4703_v24 }
 0x4eb   : > { %6417 = vmax.xlane.f32.xlu1 %v6416_v4 }
 0x4ec   : > { %v12219_v14 = vpop.f32.mrb[26].mxu1 }
 0x4ed   : > { %v12223_v34 = vpop.f32.mrb[27].mxu1  ;;  %4707 = vmax.xlane.f32.xlu0 %v4706_v19  ;;  %v6428_v17 = vsel %vm4630_vm3, %v12219_v14, -inf }
 0x4ee   : > { %v12225_v43 = vpop.f32.mrb[38].mxu0  ;;  %v6425_v1 = vsel %vm4630_vm3, %v12223_v34, -inf }
 0x4ef   : > { %v12229_v44 = vpop.f32.mrb[39].mxu0  ;;  %6426 = vmax.xlane.f32.xlu1 %v6425_v1  ;;  %v4718_v63 = vsel %vm4630_vm3, %v12225_v43, -inf }
 0x4f0   : > { %v4715_v29 = vsel %vm4630_vm3, %v12229_v44, -inf }
 0x4f1   : > { %4716 = vmax.xlane.f32.xlu0 %v4715_v29 }
 0x4f3   : > { %6429 = vmax.xlane.f32.xlu1 %v6428_v17 }
 0x4f4   : > { %v12235_v15 = vpop.f32.mrb[28].mxu1 }
 0x4f5   : > { %13719 = vst [vmem:[#allocation17_spill] sm:$0xff] %v12235_v15  ;;  %v12239_v39 = vpop.f32.mrb[29].mxu1  ;;  %4719 = vmax.xlane.f32.xlu0 %v4718_v63  ;;  %v6440_v29 = vsel %vm4630_vm3, %v12235_v15, -inf }
 0x4f6   : > { %13720 = vst [vmem:[#allocation23_spill] sm:$0xff] %v12239_v39  ;;  %v12241_v24 = vpop.f32.mrb[40].mxu0  ;;  %v6437_v4 = vsel %vm4630_vm3, %v12239_v39, -inf }
 0x4f7   : > { %v12245_v19 = vpop.f32.mrb[41].mxu0  ;;  %6438 = vmax.xlane.f32.xlu1 %v6437_v4  ;;  %v6410_v63 = vsel %vm4630_vm3, %v12241_v24, -inf }
 0x4f8   : > { %v6407_v1 = vsel %vm4630_vm3, %v12245_v19, -inf }
 0x4f9   : > { %6408 = vmax.xlane.f32.xlu0 %v6407_v1 }
 0x4fb   : > { %6441 = vmax.xlane.f32.xlu1 %v6440_v29  ;;  %v4636_v29 = vpop.xlane.xlu1 %4635 }
 0x4fc   : > { %v12251_v17 = vpop.f32.mrb[30].mxu1  ;;  %v4728_v23 = vsub.f32 %v10914_v16, %v4636_v29 }
 0x4fd   : > { %13721 = vst [vmem:[#allocation3_spill] sm:$0xff] %v12251_v17  ;;  %v12255_v31 = vpop.f32.mrb[31].mxu1  ;;  %6411 = vmax.xlane.f32.xlu0 %v6410_v63  ;;  %v6452_v21 = vsel %vm4630_vm3, %v12251_v17, -inf }
 0x4fe   : > { %13722 = vst [vmem:[#allocation59_spill] sm:$0xff] %v12255_v31  ;;  %v12257_v2 = vpop.f32.mrb[42].mxu0  ;;  %v6449_v4 = vsel %vm4630_vm3, %v12255_v31, -inf  ;;  %v4761_v46 = vmul.f32 1.442695, %v4728_v23 }
 0x4ff   : > { %13723 = vst [vmem:[#allocation7_spill] sm:$0xff] %v12257_v2  ;;  %v12261_v47 = vpop.f32.mrb[43].mxu0  ;;  %6450 = vmax.xlane.f32.xlu1 %v6449_v4  ;;  %v6422_v63 = vsel %vm4630_vm3, %v12257_v2, -inf  ;;  %v4651_v59 = vpop.xlane.xlu1 %4650 }
 0x500   : > { %v6419_v1 = vsel %vm4630_vm3, %v12261_v47, -inf  ;;  %9856 = vpow2.f32 %v4761_v46  ;;  %v4733_v23 = vsub.f32 %v10987_v8, %v4651_v59 }
 0x501   : > { %6420 = vmax.xlane.f32.xlu0 %v6419_v1 }
 0x503   : > { %6453 = vmax.xlane.f32.xlu1 %v6452_v21 }
 0x504   : > { %v12267_v11 = vpop.f32.mrb[32].mxu1 }
 0x505   : > { %v12271_v49 = vpop.f32.mrb[33].mxu1  ;;  %6423 = vmax.xlane.f32.xlu0 %v6422_v63  ;;  %v6464_v10 = vsel %vm4630_vm3, %v12267_v11, -inf  ;;  %v12285_v63 = vpop.xlane.xlu0 %4638 }
 0x506   : > { %13724 = vst [vmem:[#allocation18_spill] sm:$0xff] %v12271_v49  ;;  %v12275_v4 = vpop.f32.mrb[44].mxu0  ;;  %v6461_v1 = vsel %vm4630_vm3, %v12271_v49, -inf }
 0x507   : > { %13725 = vst [vmem:[#allocation24_spill] sm:$0xff] %v12275_v4  ;;  %v12279_v41 = vpop.f32.mrb[45].mxu0  ;;  %6462 = vmax.xlane.f32.xlu1 %v6461_v1  ;;  %v6434_v9 = vsel %vm4630_vm3, %v12275_v4, -inf  ;;  %v4654_v1 = vpop.xlane.xlu1 %4653 }
 0x508   : > { %13726 = vst [vmem:[#allocation37_spill] sm:$0xff] %v12279_v41  ;;  %v6431_v21 = vsel %vm4630_vm3, %v12279_v41, -inf  ;;  %v4734_v25 = vsub.f32 %v10985_v13, %v4654_v1 }
 0x509   : > { %6432 = vmax.xlane.f32.xlu0 %v6431_v21  ;;  %v4642_v12 = vpop.xlane.xlu0 %4641 }
 0x50a   : > { %v12340_v1 = vpop.eup %9856 }
 0x50b   : > { %6465 = vmax.xlane.f32.xlu1 %v6464_v10 }
 0x50c   : > { %v12287_v45 = vpop.f32.mrb[34].mxu1 }
 0x50d   : > { %v12291_v27 = vpop.f32.mrb[35].mxu1  ;;  %6435 = vmax.xlane.f32.xlu0 %v6434_v9  ;;  %v6476_v37 = vsel %vm4630_vm3, %v12287_v45, -inf  ;;  %v4663_v9 = vpop.xlane.xlu1 %4662 }
 0x50e   : > { %v12293_v6 = vpop.f32.mrb[46].mxu0  ;;  %v6473_v21 = vsel %vm4630_vm3, %v12291_v27, -inf  ;;  %v4645_v46 = vpop.xlane.xlu0 %4644  ;;  %v4737_v13 = vsub.f32 %v11099_v42, %v4663_v9 }
 0x50f   : > { %v12297_v18 = vpop.f32.mrb[47].mxu0  ;;  %6474 = vmax.xlane.f32.xlu1 %v6473_v21  ;;  %v6446_v0 = vsel %vm4630_vm3, %v12293_v6, -inf  ;;  %v4730_v21 = vsub.f32 %v10926_v26, %v4642_v12 }
 0x510   : > { %13727 = vst [vmem:[#allocation8_spill] sm:$0xff] %v12297_v18  ;;  %v6443_v10 = vsel %vm4630_vm3, %v12297_v18, -inf  ;;  %v4779_v4 = vmul.f32 1.442695, %v4737_v13 }
 0x511   : > { %6444 = vmax.xlane.f32.xlu0 %v6443_v10  ;;  %v4765_v10 = vmul.f32 1.442695, %v4730_v21  ;;  %v4666_v26 = vpop.xlane.xlu1 %4665 }
 0x512   : > { %v4648_v53 = vpop.xlane.xlu0 %4647 }
 0x513   : > { %6477 = vmax.xlane.f32.xlu1 %v6476_v37  ;;  %9858 = vpow2.f32 %v4765_v10  ;;  %v4773_v10 = vmul.f32 1.442695, %v4734_v25  ;;  %v4738_v25 = vsub.f32 %v11097_v51, %v4666_v26 }
 0x514   : > { %v12304_v33 = vpop.f32.mrb[36].mxu1 }
 0x515   : > { %13728 = vst [vmem:[#allocation13_spill] sm:$0xff] %v12304_v33  ;;  %v12309_v38 = vpop.f32.mrb[37].mxu1  ;;  %6447 = vmax.xlane.f32.xlu0 %v6446_v0  ;;  %v6488_v0 = vsel %vm4630_vm3, %v12304_v33, -inf  ;;  %v4781_v51 = vmul.f32 1.442695, %v4738_v25  ;;  %v13735_v25 = vld [vmem:[#allocation65_spill] sm:$0xff] }
 0x516   : > { %13729 = vst [vmem:[#allocation26_spill] sm:$0xff] %v12309_v38  ;;  %v12311_v18 = vpop.f32.mrb[48].mxu0  ;;  %v6485_v16 = vsel %vm4630_vm3, %v12309_v38, -inf  ;;  %v4657_v13 = vpop.xlane.xlu0 %4656 }
 0x517   : > { %v12315_v29 = vpop.f32.mrb[49].mxu0  ;;  %6486 = vmax.xlane.f32.xlu1 %v6485_v16  ;;  %v6458_v31 = vsel %vm4630_vm3, %v12311_v18, -inf  ;;  %v4771_v16 = vmul.f32 1.442695, %v4733_v23  ;;  %v13732_v23 = vld [vmem:[#allocation22_spill] sm:$0xff] }
 0x518   : > { %v6455_v37 = vsel %vm4630_vm3, %v12315_v29, -inf  ;;  %v4727_v3 = vsub.f32 %v13732_v23, %v12273_v20  ;;  %v4729_v20 = vsub.f32 %v10929_v62, %v12285_v63  ;;  %v4731_v62 = vsub.f32 %v10958_v5, %v4645_v46  ;;  %v13738_v5 = vld [vmem:[#allocation25_spill] sm:$0xff] }
 0x519   : > { %6456 = vmax.xlane.f32.xlu0 %v6455_v37  ;;  %v4675_v37 = vpop.xlane.xlu1 %4674  ;;  %9860 = vpow2.f32 %v4771_v16  ;;  %v4826_v16 = vsel %vm4630_vm3, %v12340_v1, 0.0  ;;  %v4732_v46 = vsub.f32 %v13738_v5, %v4648_v53 }
 0x51a   : > { %9862 = vpow2.f32 %v4773_v10  ;;  %v4759_v15 = vmul.f32 1.442695, %v4727_v3  ;;  %v4741_v26 = vsub.f32 %v11446_v40, %v4675_v37  ;;  %v4763_v3 = vmul.f32 1.442695, %v4729_v20 }
 0x51b   : > { %6489 = vmax.xlane.f32.xlu1 %v6488_v0  ;;  %9864 = vpow2.f32 %v4779_v4  ;;  %v4769_v53 = vmul.f32 1.442695, %v4732_v46 }
 0x51c   : > { %v12322_v12 = vpop.f32.mrb[38].mxu1  ;;  %9866 = vpow2.f32 %v4759_v15  ;;  %v4787_v4 = vmul.f32 1.442695, %v4741_v26  ;;  %v4767_v15 = vmul.f32 1.442695, %v4731_v62  ;;  %v13740_v26 = vld [vmem:[#allocation78_spill] sm:$0xff] }
 0x51d   : > { %13730 = vst [vmem:[#allocation38_spill] sm:$0xff] %v12322_v12  ;;  %v12327_v54 = vpop.f32.mrb[39].mxu1  ;;  %6459 = vmax.xlane.f32.xlu0 %v6458_v31  ;;  %v6500_v31 = vsel %vm4630_vm3, %v12322_v12, -inf  ;;  %v4678_v42 = vpop.xlane.xlu1 %4677  ;;  %9868 = vpow2.f32 %v4781_v51  ;;  %v13742_v62 = vld [vmem:[#allocation31_spill] sm:$0xff] }
 0x51e   : > { %13731 = vst [vmem:[#allocation55_spill] sm:$0xff] %v12327_v54  ;;  %v12329_v8 = vpop.f32.mrb[50].mxu0  ;;  %v6497_v59 = vsel %vm4630_vm3, %v12327_v54, -inf  ;;  %v4742_v40 = vsub.f32 %v13735_v25, %v4678_v42  ;;  %9870 = vpow2.f32 %v4763_v3  ;;  %v4735_v5 = vsub.f32 %v13742_v62, %v4657_v13  ;;  %v13745_v13 = vld [vmem:[#allocation30_spill] sm:$0xff] }
 0x51f   : > { %v12333_v21 = vpop.f32.mrb[51].mxu0  ;;  %6498 = vmax.xlane.f32.xlu1 %v6497_v59  ;;  %v6470_v59 = vsel %vm4630_vm3, %v12329_v8, -inf  ;;  %9872 = vpow2.f32 %v4787_v4 }
 0x520   : > { %v6467_v0 = vsel %vm4630_vm3, %v12333_v21, -inf  ;;  %v4789_v42 = vmul.f32 1.442695, %v4742_v40  ;;  %9874 = vpow2.f32 %v4767_v15  ;;  %v4775_v15 = vmul.f32 1.442695, %v4735_v5 }
 0x521   : > { %6468 = vmax.xlane.f32.xlu0 %v6467_v0  ;;  %v12351_v0 = vpop.eup %9858  ;;  %v4687_v63 = vpop.xlane.xlu1 %4686 }
 0x522   : > { %v4832_v23 = vsel %vm4630_vm3, %v12351_v0, 0.0  ;;  %9876 = vpow2.f32 %v4789_v42 }
 0x523   : > { %6501 = vmax.xlane.f32.xlu1 %v6500_v31  ;;  %9878 = vpow2.f32 %v4769_v53  ;;  %v13747_v53 = vld [vmem:[#allocation48_spill] sm:$0xff] }
 0x525   : > { %6471 = vmax.xlane.f32.xlu0 %v6470_v59  ;;  %v12362_v59 = vpop.eup %9860  ;;  %v4690_v25 = vpop.xlane.xlu1 %4689 }
 0x526   : > { %v12347_v9 = vpop.f32.mrb[52].mxu0  ;;  %v12372_v41 = vpop.eup %9862 }
 0x527   : > { %13733 = vst [vmem:[#allocation14_spill] sm:$0xff] %v12347_v9  ;;  %v12355_v31 = vpop.f32.mrb[53].mxu0  ;;  %4827 = vadd.xlane.f32.xlu1 %v4826_v16  ;;  %v6482_v16 = vsel %vm4630_vm3, %v12347_v9, -inf  ;;  %13737 = vst [vmem:[#allocation70_spill] sm:$0xff] %v12372_v41  ;;  %v4844_v39 = vsel %vm4630_vm3, %v12372_v41, 0.0  ;;  %v12382_v3 = vpop.eup %9864 }
 0x528   : > { %13734 = vst [vmem:[#allocation19_spill] sm:$0xff] %v12355_v31  ;;  %v6479_v10 = vsel %vm4630_vm3, %v12355_v31, -inf  ;;  %13741 = vst [vmem:[#allocation35_spill] sm:$0xff] %v12382_v3  ;;  %v12387_v30 = vpop.eup %9866 }
 0x529   : > { %6480 = vmax.xlane.f32.xlu0 %v6479_v10  ;;  %v4841_v10 = vsel %vm4630_vm3, %v12362_v59, 0.0  ;;  %v12392_v52 = vpop.eup %9868  ;;  %v4823_v46 = vsel %vm4630_vm3, %v12387_v30, 0.0 }
 0x52a   : > { %13744 = vst [vmem:[#allocation69_spill] sm:$0xff] %v12392_v52  ;;  %v12397_v62 = vpop.eup %9870 }
 0x52b   : > { %4833 = vadd.xlane.f32.xlu1 %v4832_v23  ;;  %v4660_v23 = vpop.xlane.xlu0 %4659 }
 0x52d   : > { %6483 = vmax.xlane.f32.xlu0 %v6482_v16  ;;  %v4745_v16 = vsub.f32 %v13740_v26, %v4687_v63  ;;  %v13743_v63 = vld [vmem:[#allocation77_spill] sm:$0xff]  ;;  %v4853_v26 = vsel %vm4630_vm3, %v12382_v3, 0.0 }
 0x52e   : > { %v12368_v37 = vpop.f32.mrb[54].mxu0  ;;  %v4746_v40 = vsub.f32 %v13743_v63, %v4690_v25  ;;  %v12401_v25 = vpop.eup %9872  ;;  %v4829_v63 = vsel %vm4630_vm3, %v12397_v62, 0.0 }
 0x52f   : > { %13736 = vst [vmem:[#allocation54_spill] sm:$0xff] %v12368_v37  ;;  %v12375_v20 = vpop.f32.mrb[55].mxu0  ;;  %4842 = vadd.xlane.f32.xlu1 %v4841_v10  ;;  %v6494_v10 = vsel %vm4630_vm3, %v12368_v37, -inf  ;;  %v4795_v4 = vmul.f32 1.442695, %v4745_v16  ;;  %v4856_v16 = vsel %vm4630_vm3, %v12392_v52, 0.0 }
 0x530   : > { %13739 = vst [vmem:[#allocation20_spill] sm:$0xff] %v12375_v20  ;;  %v6491_v51 = vsel %vm4630_vm3, %v12375_v20, -inf  ;;  %v4797_v42 = vmul.f32 1.442695, %v4746_v40  ;;  %13746 = vst [vmem:[#allocation36_spill] sm:$0xff] %v12401_v25 }
 0x531   : > { %6492 = vmax.xlane.f32.xlu0 %v6491_v51  ;;  %v4669_v51 = vpop.xlane.xlu0 %4668  ;;  %9880 = vpow2.f32 %v4795_v4  ;;  %v4865_v4 = vsel %vm4630_vm3, %v12401_v25, 0.0 }
 0x532   : > { %9882 = vpow2.f32 %v4775_v15  ;;  %v4739_v5 = vsub.f32 %v13747_v53, %v4669_v51  ;;  %v13749_v15 = vld [vmem:[#allocation47_spill] sm:$0xff] }
 0x533   : > { %4845 = vadd.xlane.f32.xlu1 %v4844_v39  ;;  %v4736_v39 = vsub.f32 %v13745_v13, %v4660_v23  ;;  %9884 = vpow2.f32 %v4797_v42 }
 0x534   : > { %v4783_v13 = vmul.f32 1.442695, %v4739_v5 }
 0x535   : > { %6495 = vmax.xlane.f32.xlu0 %v6494_v10  ;;  %v4777_v10 = vmul.f32 1.442695, %v4736_v39  ;;  %v4672_v23 = vpop.xlane.xlu0 %4671 }
 0x536   : > { %v4740_v39 = vsub.f32 %v13749_v15, %v4672_v23 }
 0x537   : > { %4854 = vadd.xlane.f32.xlu1 %v4853_v26  ;;  %v12406_v26 = vpop.eup %9874  ;;  %9886 = vpow2.f32 %v4777_v10 }
 0x538   : > { %v12410_v40 = vpop.eup %9876  ;;  %v4835_v51 = vsel %vm4630_vm3, %v12406_v26, 0.0  ;;  %9888 = vpow2.f32 %v4783_v13  ;;  %v4785_v53 = vmul.f32 1.442695, %v4740_v39 }
 0x539   : > { %4824 = vadd.xlane.f32.xlu0 %v4823_v46  ;;  %13748 = vst [vmem:[#allocation52_spill] sm:$0xff] %v12410_v40  ;;  %v12415_v46 = vpop.eup %9878  ;;  %v4868_v42 = vsel %vm4630_vm3, %v12410_v40, 0.0 }
 0x53a   : > { %13750 = vst [vmem:[#allocation51_spill] sm:$0xff] %v12415_v46  ;;  %v4838_v10 = vsel %vm4630_vm3, %v12415_v46, 0.0  ;;  %9890 = vpow2.f32 %v4785_v53 }
 0x53b   : > { %4857 = vadd.xlane.f32.xlu1 %v4856_v16  ;;  %v12419_v16 = vpop.eup %9880 }
 0x53c   : > { %13751 = vst [vmem:[#allocation22_spill] sm:$0xff] %v12419_v16  ;;  %v12423_v5 = vpop.eup %9882  ;;  %v4877_v23 = vsel %vm4630_vm3, %v12419_v16, 0.0 }
 0x53d   : > { %4830 = vadd.xlane.f32.xlu0 %v4829_v63  ;;  %13752 = vst [vmem:[#allocation65_spill] sm:$0xff] %v12423_v5  ;;  %v12427_v63 = vpop.eup %9884 }
 0x53e   : > { %13753 = vst [vmem:[#allocation25_spill] sm:$0xff] %v12427_v63  ;;  %v4880_v13 = vsel %vm4630_vm3, %v12427_v63, 0.0 }
 0x53f   : > { %4866 = vadd.xlane.f32.xlu1 %v4865_v4  ;;  %v4847_v4 = vsel %vm4630_vm3, %v12423_v5, 0.0  ;;  %v13768_v5 = vld [vmem:[#allocation28_spill] sm:$0xff] }
 0x541   : > { %4836 = vadd.xlane.f32.xlu0 %v4835_v51  ;;  %v12431_v15 = vpop.eup %9886 }
 0x542   : > { %13754 = vst [vmem:[#allocation78_spill] sm:$0xff] %v12431_v15  ;;  %v4850_v39 = vsel %vm4630_vm3, %v12431_v15, 0.0  ;;  %v12437_v51 = vpop.eup %9888 }
 0x543   : > { %4869 = vadd.xlane.f32.xlu1 %v4868_v42  ;;  %13755 = vst [vmem:[#allocation31_spill] sm:$0xff] %v12437_v51  ;;  %v4859_v42 = vsel %vm4630_vm3, %v12437_v51, 0.0 }
 0x544   : > { %v12441_v53 = vpop.eup %9890 }
 0x545   : > { %4839 = vadd.xlane.f32.xlu0 %v4838_v10  ;;  %13756 = vst [vmem:[#allocation77_spill] sm:$0xff] %v12441_v53  ;;  %v4862_v10 = vsel %vm4630_vm3, %v12441_v53, 0.0 }
 0x547   : > { %4878 = vadd.xlane.f32.xlu1 %v4877_v23  ;;  %v4699_v23 = vpop.xlane.xlu1 %4698 }
 0x549   : > { %4848 = vadd.xlane.f32.xlu0 %v4847_v4 }
 0x54b   : > { %4881 = vadd.xlane.f32.xlu1 %v4880_v13  ;;  %v4702_v4 = vpop.xlane.xlu1 %4701 }
 0x54d   : > { %4851 = vadd.xlane.f32.xlu0 %v4850_v39 }
 0x54f   : > { %v12445_v63 = vpop.xlane.xlu1 %4710 }
 0x551   : > { %4860 = vadd.xlane.f32.xlu0 %v4859_v42  ;;  %v4749_v42 = vsub.f32 %v11958_v36, %v4699_v23  ;;  %v4750_v36 = vsub.f32 %v11955_v60, %v4702_v4 }
 0x553   : > { %v12448_v40 = vpop.xlane.xlu1 %4713  ;;  %v4803_v41 = vmul.f32 1.442695, %v4749_v42  ;;  %v4805_v23 = vmul.f32 1.442695, %v4750_v36 }
 0x555   : > { %4863 = vadd.xlane.f32.xlu0 %v4862_v10 }
 0x566   : > { %v4681_v13 = vpop.xlane.xlu0 %4680 }
 0x567   : > { %v4743_v16 = vsub.f32 %v12183_v22, %v4681_v13 }
 0x569   : > { %v4791_v39 = vmul.f32 1.442695, %v4743_v16 }
 0x56a   : > { %v4684_v25 = vpop.xlane.xlu0 %4683 }
 0x56b   : > { %9892 = vpow2.f32 %v4791_v39  ;;  %v4744_v51 = vsub.f32 %v12181_v61, %v4684_v25 }
 0x56c   : > { %v12451_v15 = vpop.xlane.xlu1 %4722 }
 0x56d   : > { %v4793_v53 = vmul.f32 1.442695, %v4744_v51 }
 0x56e   : > { %v4693_v10 = vpop.xlane.xlu0 %4692 }
 0x56f   : > { %9894 = vpow2.f32 %v4793_v53  ;;  %v4747_v52 = vsub.f32 %v12197_v35, %v4693_v10 }
 0x570   : > { %v12455_v3 = vpop.xlane.xlu1 %4725 }
 0x571   : > { %v4799_v22 = vmul.f32 1.442695, %v4747_v52 }
 0x572   : > { %v4696_v13 = vpop.xlane.xlu0 %4695 }
 0x573   : > { %9896 = vpow2.f32 %v4799_v22  ;;  %v4748_v16 = vsub.f32 %v12193_v55, %v4696_v13 }
 0x574   : > { %v12458_v39 = vpop.xlane.xlu1 %6414  ;;  %9898 = vpow2.f32 %v4803_v41 }
 0x575   : > { %v12460_v61 = vpop.eup %9892  ;;  %v4801_v25 = vmul.f32 1.442695, %v4748_v16 }
 0x576   : > { %13757 = vst [vmem:[#allocation30_spill] sm:$0xff] %v12460_v61  ;;  %v4705_v51 = vpop.xlane.xlu0 %4704  ;;  %v4871_v35 = vsel %vm4630_vm3, %v12460_v61, 0.0 }
 0x577   : > { %4872 = vadd.xlane.f32.xlu0 %v4871_v35  ;;  %9900 = vpow2.f32 %v4801_v25 }
 0x578   : > { %v12465_v53 = vpop.xlane.xlu1 %6417  ;;  %9902 = vpow2.f32 %v4805_v23 }
 0x579   : > { %v12467_v52 = vpop.eup %9894 }
 0x57a   : > { %13758 = vst [vmem:[#allocation48_spill] sm:$0xff] %v12467_v52  ;;  %v4708_v55 = vpop.xlane.xlu0 %4707  ;;  %v4874_v42 = vsel %vm4630_vm3, %v12467_v52, 0.0 }
 0x57b   : > { %4875 = vadd.xlane.f32.xlu0 %v4874_v42  ;;  %v4752_v49 = vsub.f32 %v12209_v32, %v4708_v55 }
 0x57c   : > { %v12471_v41 = vpop.xlane.xlu1 %6426 }
 0x57d   : > { %v12473_v60 = vpop.eup %9896 }
 0x57e   : > { %13759 = vst [vmem:[#allocation47_spill] sm:$0xff] %v12473_v60  ;;  %v12475_v4 = vpop.xlane.xlu0 %4716  ;;  %v4883_v10 = vsel %vm4630_vm3, %v12473_v60, 0.0  ;;  %v12479_v22 = vpop.eup %9898 }
 0x57f   : > { %13760 = vst [vmem:[#allocation82_spill] sm:$0xff] %v12479_v22  ;;  %4884 = vadd.xlane.f32.xlu1 %v4883_v10  ;;  %v4889_v36 = vsel %vm4630_vm3, %v12479_v22, 0.0 }
 0x580   : > { %v12481_v13 = vpop.xlane.xlu1 %6429 }
 0x581   : > { %v12487_v25 = vpop.eup %9900 }
 0x582   : > { %v12483_v16 = vpop.xlane.xlu0 %4719  ;;  %13761 = vst [vmem:[#allocation83_spill] sm:$0xff] %v12487_v25  ;;  %v4886_v42 = vsel %vm4630_vm3, %v12487_v25, 0.0  ;;  %v12495_v60 = vpop.eup %9902 }
 0x583   : > { %4890 = vadd.xlane.f32.xlu1 %v4889_v36  ;;  %13763 = vst [vmem:[#allocation85_spill] sm:$0xff] %v12495_v60  ;;  %v4892_v22 = vsel %vm4630_vm3, %v12495_v60, 0.0 }
 0x584   : > { %v12489_v35 = vpop.xlane.xlu1 %6438 }
 0x585   : > { %13762 = vst [vmem:[#allocation84_spill] sm:$0xff] %v12489_v35 }
 0x586   : > { %v12491_v23 = vpop.xlane.xlu0 %6408 }
 0x587   : > { %4887 = vadd.xlane.f32.xlu1 %v4886_v42  ;;  %v13767_v42 = vld [vmem:[#allocation27_spill] sm:$0xff] }
 0x588   : > { %v12497_v10 = vpop.xlane.xlu1 %6441 }
 0x589   : > { %13764 = vst [vmem:[#allocation86_spill] sm:$0xff] %v12497_v10  ;;  %v13769_v10 = vpack.i.bf16 %v13767_v42, %v13768_v5  ;;  %v13775_v42 = vld [vmem:[#allocation33_spill] sm:$0xff] }
 0x58a   : > { %v12499_v52 = vpop.xlane.xlu0 %6411 }
 0x58b   : > { %4893 = vadd.xlane.f32.xlu1 %v4892_v22 }
 0x58c   : > { %v12503_v61 = vpop.xlane.xlu1 %6450 }
 0x58d   : > { %13765 = vst [vmem:[#allocation87_spill] sm:$0xff] %v12503_v61 }
 0x58e   : > { %v12505_v36 = vpop.xlane.xlu0 %6420 }
 0x590   : > { %v12507_v35 = vpop.xlane.xlu1 %6453 }
 0x591   : > { %13766 = vst [vmem:[#allocation88_spill] sm:$0xff] %v12507_v35  ;;  %9649 = vrot.lane.b32.xlu0 %v13769_v10, %s10216_s13  ;;  %v4751_v35 = vsub.f32 %v12213_v48, %v4705_v51  ;;  %v13774_v10 = vld [vmem:[#allocation32_spill] sm:$0xff]  ;;  %v4754_v51 = vsub.f32 %v12137_v28, %v12448_v40  ;;  %v4753_v40 = vsub.f32 %v12139_v57, %v12445_v63 }
 0x592   : > { %v12515_v2 = vpop.xlane.xlu0 %6423 }
 0x593   : > { %13770 = vst [vmem:[#allocation27_spill] sm:$0xff] %v12515_v2  ;;  %v13776_v2 = vpack.i.bf16 %v13774_v10, %v13775_v42  ;;  %v4813_v55 = vmul.f32 1.442695, %v4754_v51  ;;  %v4811_v48 = vmul.f32 1.442695, %v4753_v40  ;;  %v13790_v40 = vld [vmem:[#allocation40_spill] sm:$0xff] }
 0x594   : > { %v12517_v46 = vpop.xlane.xlu1 %6462 }
 0x595   : > { %13771 = vst [vmem:[#allocation28_spill] sm:$0xff] %v12517_v46  ;;  %v4807_v46 = vmul.f32 1.442695, %v4751_v35 }
 0x596   : > { %v12521_v60 = vpop.xlane.xlu0 %6432 }
 0x597   : > { %13772 = vst [vmem:[#allocation89_spill] sm:$0xff] %v12521_v60  ;;  %9904 = vpow2.f32 %v4807_v46 }
 0x598   : > { %v12523_v61 = vpop.xlane.xlu1 %6465 }
 0x599   : > { %13773 = vst [vmem:[#allocation90_spill] sm:$0xff] %v12523_v61  ;;  %v4809_v61 = vmul.f32 1.442695, %v4752_v49 }
 0x59a   : > { %v12528_v17 = vpop.xlane.xlu0 %6435 }
 0x59b   : > { %9906 = vpow2.f32 %v4809_v61 }
 0x59c   : > { %v12530_v5 = vpop.xlane.xlu1 %6474  ;;  %9654 = vrot.lane.b32.xlu1 %v13776_v2, %s10216_s13  ;;  %9908 = vpow2.f32 %v4813_v55 }
 0x59d   : > { %9910 = vpow2.f32 %v4811_v48 }
 0x59e   : > { %v12539_v60 = vpop.xlane.xlu0 %6444 }
 0x5a0   : > { %v12541_v25 = vpop.xlane.xlu1 %6477 }
 0x5a1   : > { %v12569_v61 = vpop.eup %9904 }
 0x5a2   : > { %v12547_v10 = vpop.xlane.xlu0 %6447  ;;  %13779 = vst [vmem:[#allocation91_spill] sm:$0xff] %v12569_v61  ;;  %v4895_v57 = vsel %vm4630_vm3, %v12569_v61, 0.0 }
 0x5a4   : > { %v12551_v35 = vpop.xlane.xlu1 %6486 }
 0x5a5   : > { %13777 = vst [vmem:[#allocation32_spill] sm:$0xff] %v12551_v35  ;;  %v12581_v63 = vpop.eup %9906 }
 0x5a6   : > { %v12555_v42 = vpop.xlane.xlu0 %6456  ;;  %13781 = vst [vmem:[#allocation93_spill] sm:$0xff] %v12581_v63  ;;  %v4898_v22 = vsel %vm4630_vm3, %v12581_v63, 0.0  ;;  %v12593_v49 = vpop.eup %9908 }
 0x5a7   : > { %13784 = vst [vmem:[#allocation96_spill] sm:$0xff] %v12593_v49  ;;  %v4904_v51 = vsel %vm4630_vm3, %v12593_v49, 0.0 }
 0x5a8   : > { %v12559_v28 = vpop.xlane.xlu1 %6489 }
 0x5a9   : > { %13778 = vst [vmem:[#allocation33_spill] sm:$0xff] %v12559_v28 }
 0x5aa   : > { %v12565_v46 = vpop.xlane.xlu0 %6459 }
 0x5ac   : > { %v12571_v32 = vpop.xlane.xlu1 %6498 }
 0x5ad   : > { %13780 = vst [vmem:[#allocation92_spill] sm:$0xff] %v12571_v32 }
 0x5ae   : > { %v12575_v2 = vpop.xlane.xlu0 %6468 }
 0x5b0   : > { %v12583_v55 = vpop.xlane.xlu1 %6501  ;;  %4896 = vadd.xlane.f32.xlu0 %v4895_v57 }
 0x5b1   : > { %13782 = vst [vmem:[#allocation94_spill] sm:$0xff] %v12583_v55  ;;  %v12605_v55 = vpop.eup %9910 }
 0x5b2   : > { %v12587_v28 = vpop.xlane.xlu0 %6471  ;;  %13787 = vst [vmem:[#allocation99_spill] sm:$0xff] %v12605_v55  ;;  %v4901_v12 = vsel %vm4630_vm3, %v12605_v55, 0.0 }
 0x5b3   : > { %13783 = vst [vmem:[#allocation95_spill] sm:$0xff] %v12587_v28 }
 0x5b4   : > { %4899 = vadd.xlane.f32.xlu0 %v4898_v22  ;;  %v13793_v22 = vld [vmem:[#allocation43_spill] sm:$0xff] }
 0x5b6   : > { %v12595_v32 = vpop.xlane.xlu0 %6480 }
 0x5b7   : > { %13785 = vst [vmem:[#allocation97_spill] sm:$0xff] %v12595_v32  ;;  %v4828_v32 = vpop.xlane.xlu1 %4827 }
 0x5b8   : > { %4905 = vadd.xlane.f32.xlu0 %v4904_v51 }
 0x5ba   : > { %v12601_v48 = vpop.xlane.xlu0 %6483 }
 0x5bb   : > { %13786 = vst [vmem:[#allocation98_spill] sm:$0xff] %v12601_v48  ;;  %v13791_v48 = vld [vmem:[#allocation41_spill] sm:$0xff]  ;;  %v4834_v51 = vpop.xlane.xlu1 %4833 }
 0x5bc   : > { %v13792_v9 = vpack.i.bf16 %v13790_v40, %v13791_v48 }
 0x5be   : > { %v12607_v63 = vpop.xlane.xlu0 %6492 }
 0x5bf   : > { %13788 = vst [vmem:[#allocation100_spill] sm:$0xff] %v12607_v63  ;;  %v13794_v63 = vld [vmem:[#allocation44_spill] sm:$0xff] }
 0x5c0   : > { %4902 = vadd.xlane.f32.xlu1 %v4901_v12  ;;  %v13795_v20 = vpack.i.bf16 %v13793_v22, %v13794_v63  ;;  %v4843_v63 = vpop.xlane.xlu1 %4842 }
 0x5c2   : > { %v12613_v57 = vpop.xlane.xlu0 %6495 }
 0x5c3   : > { %13789 = vst [vmem:[#allocation101_spill] sm:$0xff] %v12613_v57 }
 0x5c4   : > { %v12637_v48 = vpop.xlane.xlu1 %4845 }
 0x5c6   : > { %v4825_v49 = vpop.xlane.xlu0 %4824 }
 0x5c7   : > { %9912 = vrcp.f32 %v4825_v49  ;;  %v4755_v49 = vsub.f32 %v12229_v44, %v12475_v4 }
 0x5c9   : > { %v4815_v40 = vmul.f32 1.442695, %v4755_v49 }
 0x5ca   : > { %v4831_v54 = vpop.xlane.xlu0 %4830 }
 0x5ce   : > { %9659 = vrot.lane.b32.xlu0 %v13792_v9, %s10216_s13  ;;  %v4837_v33 = vpop.xlane.xlu0 %4836 }
 0x5cf   : > { %9914 = vrcp.f32 %v4837_v33  ;;  %v4756_v33 = vsub.f32 %v12225_v43, %v12483_v16  ;;  %v12643_v16 = vpop.xlane.xlu1 %4854 }
 0x5d0   : > { %9916 = vpow2.f32 %v4815_v40 }
 0x5d1   : > { %9664 = vrot.lane.b32.xlu1 %v13795_v20, %s10216_s13  ;;  %v9913_v12 = vpop.eup %9912  ;;  %v4757_v20 = vsub.f32 %v12191_v7, %v12451_v15 }
 0x5d2   : > { %v4920_v31 = vmul.f32 %v9913_v12, %v12387_v30  ;;  %v4758_v30 = vsub.f32 %v12187_v50, %v12455_v3 }
 0x5d3   : > { %v4819_v44 = vmul.f32 1.442695, %v4757_v20 }
 0x5d4   : > { %9098 = vmatprep.mubr.msk.f32.mxu0 %vm4630_vm3, %v4920_v31  ;;  %v4817_v31 = vmul.f32 1.442695, %v4756_v33  ;;  %v4821_v4 = vmul.f32 1.442695, %v4758_v30 }
 0x5d6   : > { %9918 = vpow2.f32 %v4817_v31 }
 0x5d7   : > { %9920 = vpow2.f32 %v4819_v44 }
 0x5d8   : > { %9922 = vpow2.f32 %v4821_v4 }
 0x5d9   : > { %v9915_v57 = vpop.eup %9914  ;;  %9924 = vrcp.f32 %v4828_v32 }
 0x5da   : > { %v4928_v9 = vmul.f32 %v9915_v57, %v12406_v26  ;;  %v12639_v26 = vpop.xlane.xlu0 %4839  ;;  %v12641_v43 = vpop.eup %9916  ;;  %9926 = vrcp.f32 %v4831_v54  ;;  %v6505_v54 = vsub.f32 %v12207_v56, %v12458_v39 }
 0x5db   : > { %13796 = vst [vmem:[#allocation40_spill] sm:$0xff] %v12641_v43  ;;  %v4907_v7 = vsel %vm4630_vm3, %v12641_v43, 0.0  ;;  %v12653_v57 = vpop.xlane.xlu1 %4857  ;;  %9928 = vrcp.f32 %v4834_v51 }
 0x5dc   : > { %9112 = vmatprep.mubr.msk.f32.mxu1 %vm4630_vm3, %v4928_v9  ;;  %9930 = vrcp.f32 %v4843_v63 }
 0x5de   : > { %v12649_v50 = vpop.xlane.xlu0 %4848 }
 0x5df   : > { %v12665_v33 = vpop.xlane.xlu1 %4866 }
 0x5e0   : > { %v12647_v15 = vpop.eup %9918 }
 0x5e1   : > { %13797 = vst [vmem:[#allocation41_spill] sm:$0xff] %v12647_v15  ;;  %v12651_v3 = vpop.eup %9920  ;;  %v4910_v22 = vsel %vm4630_vm3, %v12647_v15, 0.0 }
 0x5e2   : > { %13798 = vst [vmem:[#allocation43_spill] sm:$0xff] %v12651_v3  ;;  %v12657_v12 = vpop.eup %9922  ;;  %v12659_v49 = vpop.xlane.xlu0 %4851  ;;  %v4913_v9 = vsel %vm4630_vm3, %v12651_v3, 0.0  ;;  %v13804_v3 = vld [vmem:[#allocation57_spill] sm:$0xff] }
 0x5e3   : > { %13799 = vst [vmem:[#allocation44_spill] sm:$0xff] %v12657_v12  ;;  %v4916_v40 = vsel %vm4630_vm3, %v12657_v12, 0.0  ;;  %v12669_v30 = vpop.xlane.xlu1 %4869  ;;  %v13803_v12 = vld [vmem:[#allocation56_spill] sm:$0xff]  ;;  %v9925_v61 = vpop.eup %9924 }
 0x5e4   : > { %v13805_v43 = vpack.i.bf16 %v13803_v12, %v13804_v3 }
 0x5e6   : > { %v12667_v20 = vpop.xlane.xlu0 %4860 }
 0x5e7   : > { %v12673_v44 = vpop.xlane.xlu1 %4878 }
 0x5ea   : > { %v12671_v31 = vpop.xlane.xlu0 %4863 }
 0x5ed   : > { %4908 = vadd.xlane.f32.xlu0 %v4907_v7  ;;  %v13800_v7 = vld [vmem:[#allocation62_spill] sm:$0xff] }
 0x5f1   : > { %4911 = vadd.xlane.f32.xlu0 %v4910_v22  ;;  %v13801_v22 = vld [vmem:[#allocation63_spill] sm:$0xff] }
 0x5f2   : > { %v13802_v15 = vpack.i.bf16 %v13800_v7, %v13801_v22  ;;  %v4922_v7 = vmul.f32 %v9925_v61, %v12340_v1  ;;  %v6504_v1 = vsub.f32 %v12241_v24, %v12499_v52 }
 0x5f5   : > { %4914 = vadd.xlane.f32.xlu1 %v4913_v9  ;;  %4917 = vadd.xlane.f32.xlu0 %v4916_v40  ;;  %v12681_v9 = vpop.xlane.xlu1 %4881 }
 0x604   : > { %v12675_v4 = vpop.xlane.xlu0 %4872 }
 0x606   : > { %9674 = vrot.lane.b32.xlu1 %v13802_v15, %s10216_s13  ;;  %v9927_v15 = vpop.eup %9926 }
 0x607   : > { %v4924_v12 = vmul.f32 %v9927_v15, %v12397_v62  ;;  %v6537_v62 = vmul.f32 1.442695, %v6504_v1  ;;  %v9929_v22 = vpop.eup %9928  ;;  %v13809_v1 = vld [vmem:[#allocation71_spill] sm:$0xff] }
 0x608   : > { %v12683_v40 = vpop.xlane.xlu0 %4875 }
 0x60b   : > { %9669 = vrot.lane.b32.xlu0 %v13805_v43, %s10216_s13  ;;  %v6503_v43 = vsub.f32 %v12245_v19, %v12491_v23 }
 0x60c   : > { %v12689_v37 = vpop.xlane.xlu1 %4884  ;;  %v9650_v35 = vpop.permute.xlu0 %9649 }
 0x60d   : > { %v9652_v38 = vunpack.i.h.bf16 %v9650_v35  ;;  %v9651_v32 = vunpack.i.l.bf16 %v9650_v35  ;;  %v6506_v35 = vsub.f32 %v12203_v58, %v12465_v53  ;;  %v6535_v56 = vmul.f32 1.442695, %v6503_v43 }
 0x60e   : > { %v4926_v58 = vmul.f32 %v9929_v22, %v12351_v0  ;;  %v6509_v22 = vsub.f32 %v12223_v34, %v12471_v41  ;;  %v13813_v34 = vld [vmem:[#allocation27_spill] sm:$0xff] }
 0x60f   : > { %v9510_v55 = vpack.c.bf16 %v9652_v38, %v9651_v32  ;;  %v6539_v38 = vmul.f32 1.442695, %v6505_v54  ;;  %v6541_v19 = vmul.f32 1.442695, %v6506_v35  ;;  %v9931_v32 = vpop.eup %9930  ;;  %v13814_v41 = vld [vmem:[#allocation7_spill] sm:$0xff] }
 0x610   : > { %v12691_v28 = vpop.xlane.xlu1 %4890  ;;  %v4932_v24 = vmul.f32 %v9931_v32, %v12362_v59 }
 0x611   : > { %9511 = vmatprep.subr.bf16.mxu0 %v9510_v55  ;;  %9932 = vpow2.f32 %v6539_v38  ;;  %v13807_v38 = vld [vmem:[#allocation75_spill] sm:$0xff] }
 0x612   : > { %9513 = vmatpush3.bf16.msra.mxu0 %v9510_v55  ;;  %9934 = vpow2.f32 %v6535_v56 }
 0x613   : > { %9936 = vpow2.f32 %v6541_v19  ;;  %v13810_v19 = vld [vmem:[#allocation72_spill] sm:$0xff] }
 0x614   : > { %v12698_v3 = vpop.xlane.xlu1 %4887  ;;  %9938 = vpow2.f32 %v6537_v62  ;;  %v13811_v62 = vpack.i.bf16 %v13809_v1, %v13810_v19 }
 0x615   : > { %9099 = vmatmul.mubr.msk.f32.vlgmr.msra.gmra.mrb[56].mxu0 %vm4630_vm3, %v4922_v7  ;;  %9940 = vrcp.f32 %v12639_v26 }
 0x616   : > { %9105 = vmatprep.mubr.msk.f32.mxu0 %vm4630_vm3, %v4924_v12  ;;  %v13806_v12 = vld [vmem:[#allocation74_spill] sm:$0xff]  ;;  %9942 = vrcp.f32 %v12649_v50  ;;  %v6507_v50 = vsub.f32 %v12261_v47, %v12505_v36 }
 0x617   : > { %v13808_v35 = vpack.i.bf16 %v13806_v12, %v13807_v38  ;;  %9944 = vrcp.f32 %v12637_v48  ;;  %v13812_v48 = vld [vmem:[#allocation51_spill] sm:$0xff]  ;;  %v13815_v38 = vld [vmem:[#allocation65_spill] sm:$0xff] }
 0x618   : > { %v12707_v39 = vpop.xlane.xlu1 %4893  ;;  %9946 = vrcp.f32 %v12643_v16  ;;  %v6508_v16 = vsub.f32 %v13814_v41, %v13813_v34  ;;  %v13820_v34 = vld [vmem:[#allocation46_spill] sm:$0xff] }
 0x61b   : > { %v12711_v53 = vpop.eup %9932 }
 0x61c   : > { %v9655_v23 = vpop.permute.xlu1 %9654  ;;  %v12714_v52 = vpop.eup %9934  ;;  %v6605_v15 = vsel %vm4630_vm3, %v12711_v53, 0.0 }
 0x61d   : > { %v9657_v61 = vunpack.i.h.bf16 %v9655_v23  ;;  %v9656_v55 = vunpack.i.l.bf16 %v9655_v23  ;;  %v12717_v63 = vpop.eup %9936  ;;  %v6599_v54 = vsel %vm4630_vm3, %v12714_v52, 0.0 }
 0x61e   : > { %v12723_v7 = vpop.eup %9938  ;;  %v6608_v0 = vsel %vm4630_vm3, %v12717_v63, 0.0 }
 0x61f   : > { %v9514_v51 = vpack.c.bf16 %v9657_v61, %v9656_v55  ;;  %v6602_v59 = vsel %vm4630_vm3, %v12723_v7, 0.0  ;;  %v9941_v32 = vpop.eup %9940 }
 0x621   : > { %9515 = vmatprep.subr.bf16.mxu0 %v9514_v51 }
 0x622   : > { %9517 = vmatpush3.bf16.msra.mxu0 %v9514_v51 }
 0x625   : > { %9106 = vmatmul.mubr.msk.f32.vlgmr.msra.gmra.mrb[58].mxu0 %vm4630_vm3, %v4926_v58 }
 0x626   : > { %9119 = vmatprep.mubr.msk.f32.mxu0 %vm4630_vm3, %v4932_v24  ;;  %v9943_v24 = vpop.eup %9942 }
 0x62a   : > { %6606 = vadd.xlane.f32.xlu0 %v6605_v15  ;;  %6600 = vadd.xlane.f32.xlu1 %v6599_v54  ;;  %v6547_v15 = vmul.f32 1.442695, %v6509_v22  ;;  %v6510_v54 = vsub.f32 %v12219_v14, %v12481_v13  ;;  %v6545_v14 = vmul.f32 1.442695, %v6508_v16 }
 0x62c   : > { %9948 = vpow2.f32 %v6547_v15  ;;  %v6549_v36 = vmul.f32 1.442695, %v6510_v54 }
 0x62e   : > { %6609 = vadd.xlane.f32.xlu1 %v6608_v0  ;;  %6603 = vadd.xlane.f32.xlu0 %v6602_v59  ;;  %v4930_v0 = vmul.f32 %v9941_v32, %v13812_v48  ;;  %v6543_v59 = vmul.f32 1.442695, %v6507_v50 }
 0x630   : > { %9950 = vpow2.f32 %v6543_v59  ;;  %v13819_v59 = vld [vmem:[#allocation9_spill] sm:$0xff] }
 0x631   : > { %9952 = vpow2.f32 %v6549_v36  ;;  %v13821_v41 = vpack.i.bf16 %v13819_v59, %v13820_v34  ;;  %v13830_v59 = vld [vmem:[#allocation17_spill] sm:$0xff] }
 0x632   : > { %9954 = vpow2.f32 %v6545_v14 }
 0x633   : > { %9956 = vrcp.f32 %v12653_v57 }
 0x634   : > { %9958 = vrcp.f32 %v12665_v33 }
 0x635   : > { %9960 = vrcp.f32 %v12659_v49 }
 0x636   : > { %9962 = vrcp.f32 %v12667_v20  ;;  %v13829_v20 = vld [vmem:[#allocation86_spill] sm:$0xff] }
 0x637   : > { %v6514_v34 = vsub.f32 %v13830_v59, %v13829_v20 }
 0x63d   : > { %v12729_v43 = vpop.xlane.xlu0 %4896 }
 0x63f   : > { %9684 = vrot.lane.b32.xlu1 %v13808_v35, %s10216_s13  ;;  %v4936_v35 = vmul.f32 %v9943_v24, %v13815_v38  ;;  %v13823_v38 = vld [vmem:[#allocation80_spill] sm:$0xff] }
 0x641   : > { %v12735_v56 = vpop.xlane.xlu0 %4899 }
 0x644   : > { %9679 = vrot.lane.b32.xlu0 %v13811_v62, %s10216_s13  ;;  %v9945_v62 = vpop.eup %9944 }
 0x645   : > { %v12743_v23 = vpop.xlane.xlu0 %4905  ;;  %v9947_v13 = vpop.eup %9946 }
 0x649   : > { %v9660_v61 = vpop.permute.xlu0 %9659 }
 0x64a   : > { %v9662_v55 = vunpack.i.h.bf16 %v9660_v61  ;;  %v9661_v51 = vunpack.i.l.bf16 %v9660_v61  ;;  %v13816_v61 = vld [vmem:[#allocation70_spill] sm:$0xff] }
 0x64c   : > { %v9518_v26 = vpack.c.bf16 %v9662_v55, %v9661_v51  ;;  %v4934_v55 = vmul.f32 %v9945_v62, %v13816_v61  ;;  %v13817_v51 = vld [vmem:[#allocation35_spill] sm:$0xff]  ;;  %v13828_v61 = vld [vmem:[#allocation37_spill] sm:$0xff] }
 0x64d   : > { %v12751_v58 = vpop.xlane.xlu1 %4902  ;;  %v4940_v22 = vmul.f32 %v9947_v13, %v13817_v51  ;;  %v13826_v62 = vld [vmem:[#allocation23_spill] sm:$0xff]  ;;  %v13827_v13 = vld [vmem:[#allocation89_spill] sm:$0xff] }
 0x64e   : > { %9519 = vmatprep.subr.bf16.mxu1 %v9518_v26 }
 0x64f   : > { %9521 = vmatpush3.bf16.msra.mxu1 %v9518_v26  ;;  %v12765_v26 = vpop.eup %9948 }
 0x650   : > { %v12767_v32 = vpop.eup %9950  ;;  %v6617_v24 = vsel %vm4630_vm3, %v12765_v26, 0.0 }
 0x651   : > { %v9665_v12 = vpop.permute.xlu1 %9664  ;;  %v12769_v50 = vpop.eup %9952  ;;  %v6611_v15 = vsel %vm4630_vm3, %v12767_v32, 0.0 }
 0x652   : > { %v9667_v1 = vunpack.i.h.bf16 %v9665_v12  ;;  %v9666_v47 = vunpack.i.l.bf16 %v9665_v12  ;;  %9113 = vmatmul.mubr.msk.f32.vlgmr.msra.gmra.mrb[40].mxu1 %vm4630_vm3, %v4930_v0  ;;  %13818 = vst [vmem:[#allocation62_spill] sm:$0xff] %v12769_v50  ;;  %v12775_v54 = vpop.eup %9954  ;;  %v6620_v48 = vsel %vm4630_vm3, %v12769_v50, 0.0  ;;  %v13822_v12 = vld [vmem:[#allocation79_spill] sm:$0xff] }
 0x653   : > { %9126 = vmatprep.mubr.msk.f32.mxu1 %vm4630_vm3, %v4936_v35  ;;  %v6614_v0 = vsel %vm4630_vm3, %v12775_v54, 0.0  ;;  %v13824_v35 = vpack.i.bf16 %v13822_v12, %v13823_v38 }
 0x654   : > { %v9522_v19 = vpack.c.bf16 %v9667_v1, %v9666_v47 }
 0x656   : > { %9523 = vmatprep.subr.bf16.mxu0 %v9522_v19 }
 0x657   : > { %9525 = vmatpush3.bf16.msra.mxu0 %v9522_v19  ;;  %v13825_v19 = vld [vmem:[#allocation84_spill] sm:$0xff] }
 0x658   : > { %v6513_v14 = vsub.f32 %v13826_v62, %v13825_v19  ;;  %v13831_v19 = vld [vmem:[#allocation24_spill] sm:$0xff] }
 0x659   : > { %v6512_v62 = vsub.f32 %v13831_v19, %v12528_v17  ;;  %v13841_v19 = vld [vmem:[#allocation60_spill] sm:$0xff] }
 0x65a   : > { %9120 = vmatmul.mubr.msk.f32.vlgmr.msra.gmra.mrb[60].mxu0 %vm4630_vm3, %v4934_v55  ;;  %v6511_v55 = vsub.f32 %v13828_v61, %v13827_v13  ;;  %v6557_v61 = vmul.f32 1.442695, %v6514_v34 }
 0x65b   : > { %9133 = vmatprep.mubr.msk.f32.mxu0 %vm4630_vm3, %v4940_v22  ;;  %v6553_v20 = vmul.f32 1.442695, %v6512_v62 }
 0x663   : > { %6618 = vadd.xlane.f32.xlu0 %v6617_v24  ;;  %6612 = vadd.xlane.f32.xlu1 %v6611_v15 }
 0x667   : > { %6621 = vadd.xlane.f32.xlu1 %v6620_v48  ;;  %6615 = vadd.xlane.f32.xlu0 %v6614_v0  ;;  %v9957_v48 = vpop.eup %9956  ;;  %v6555_v0 = vmul.f32 1.442695, %v6513_v14  ;;  %v13833_v14 = vld [vmem:[#allocation78_spill] sm:$0xff] }
 0x668   : > { %v9959_v49 = vpop.eup %9958 }
 0x669   : > { %v9961_v38 = vpop.eup %9960  ;;  %9964 = vpow2.f32 %v6555_v0 }
 0x66a   : > { %v9963_v13 = vpop.eup %9962  ;;  %v4938_v50 = vmul.f32 %v9961_v38, %v13833_v14  ;;  %v13843_v14 = vld [vmem:[#allocation87_spill] sm:$0xff] }
 0x673   : > { %v12817_v17 = vpop.eup %9964 }
 0x674   : > { %v6629_v0 = vsel %vm4630_vm3, %v12817_v17, 0.0 }
 0x678   : > { %9694 = vrot.lane.b32.xlu1 %v13821_v41, %s10216_s13 }
 0x67a   : > { %v12785_v16 = vpop.xlane.xlu0 %4908 }
 0x67d   : > { %9689 = vrot.lane.b32.xlu0 %v13824_v35, %s10216_s13  ;;  %v6551_v35 = vmul.f32 1.442695, %v6511_v55 }
 0x67e   : > { %v12792_v1 = vpop.xlane.xlu0 %4911 }
 0x67f   : > { %9966 = vpow2.f32 %v6551_v35  ;;  %v13840_v35 = vld [vmem:[#allocation49_spill] sm:$0xff] }
 0x680   : > { %9968 = vpow2.f32 %v6557_v61  ;;  %v13842_v62 = vpack.i.bf16 %v13840_v35, %v13841_v19 }
 0x681   : > { %9970 = vpow2.f32 %v6553_v20  ;;  %v13844_v20 = vld [vmem:[#allocation59_spill] sm:$0xff] }
 0x682   : > { %v12797_v47 = vpop.xlane.xlu1 %4914  ;;  %v12799_v36 = vpop.xlane.xlu0 %4917  ;;  %9972 = vrcp.f32 %v12669_v30 }
 0x683   : > { %9974 = vrcp.f32 %v12673_v44 }
 0x684   : > { %9976 = vrcp.f32 %v12671_v31 }
 0x685   : > { %9978 = vrcp.f32 %v12675_v4 }
 0x686   : > { %v9675_v51 = vpop.permute.xlu1 %9674  ;;  %v9670_v57 = vpop.permute.xlu0 %9669 }
 0x687   : > { %v9677_v22 = vunpack.i.h.bf16 %v9675_v51  ;;  %v9676_v24 = vunpack.i.l.bf16 %v9675_v51  ;;  %v9672_v15 = vunpack.i.h.bf16 %v9670_v57  ;;  %v9671_v33 = vunpack.i.l.bf16 %v9670_v57  ;;  %v13832_v51 = vld [vmem:[#allocation69_spill] sm:$0xff] }
 0x688   : > { %v4942_v57 = vmul.f32 %v9957_v48, %v13832_v51 }
 0x689   : > { %v9530_v41 = vpack.c.bf16 %v9677_v22, %v9676_v24  ;;  %v9526_v12 = vpack.c.bf16 %v9672_v15, %v9671_v33  ;;  %v13834_v22 = vld [vmem:[#allocation31_spill] sm:$0xff]  ;;  %v13835_v15 = vld [vmem:[#allocation36_spill] sm:$0xff]  ;;  %v12819_v33 = vpop.eup %9966 }
 0x68a   : > { %v4944_v24 = vmul.f32 %v9963_v13, %v13834_v22  ;;  %v4948_v55 = vmul.f32 %v9959_v49, %v13835_v15  ;;  %v12821_v48 = vpop.eup %9968  ;;  %v6517_v22 = vsub.f32 %v13844_v20, %v13843_v14 }
 0x68b   : > { %9527 = vmatprep.subr.bf16.mxu1 %v9526_v12  ;;  %9531 = vmatprep.subr.bf16.mxu0 %v9530_v41  ;;  %13836 = vst [vmem:[#allocation63_spill] sm:$0xff] %v12821_v48  ;;  %v12827_v49 = vpop.eup %9970  ;;  %v6632_v59 = vsel %vm4630_vm3, %v12821_v48, 0.0 }
 0x68c   : > { %9529 = vmatpush3.bf16.msra.mxu1 %v9526_v12  ;;  %9533 = vmatpush3.bf16.msra.mxu0 %v9530_v41  ;;  %v6626_v34 = vsel %vm4630_vm3, %v12827_v49, 0.0  ;;  %v13837_v41 = vld [vmem:[#allocation68_spill] sm:$0xff]  ;;  %v13838_v12 = vld [vmem:[#allocation66_spill] sm:$0xff] }
 0x68d   : > { %v13839_v38 = vpack.i.bf16 %v13837_v41, %v13838_v12  ;;  %v6563_v41 = vmul.f32 1.442695, %v6517_v22  ;;  %v13851_v22 = vsub.f32 %v12293_v6, %v12547_v10 }
 0x68f   : > { %9127 = vmatmul.mubr.msk.f32.vlgmr.msra.gmra.mrb[42].mxu1 %vm4630_vm3, %v4938_v50  ;;  %9134 = vmatmul.mubr.msk.f32.vlgmr.msra.gmra.mrb[62].mxu0 %vm4630_vm3, %v4942_v57  ;;  %v6623_v50 = vsel %vm4630_vm3, %v12819_v33, 0.0  ;;  %9980 = vpow2.f32 %v6563_v41 }
 0x690   : > { %9140 = vmatprep.mubr.msk.f32.mxu1 %vm4630_vm3, %v4944_v24  ;;  %9147 = vmatprep.mubr.msk.f32.mxu0 %vm4630_vm3, %v4948_v55  ;;  %v13845_v24 = vld [vmem:[#allocation8_spill] sm:$0xff] }
 0x691   : > { %v6515_v30 = vsub.f32 %v13845_v24, %v12539_v60  ;;  %v13846_v60 = vld [vmem:[#allocation3_spill] sm:$0xff]  ;;  %v13849_v24 = vld [vmem:[#allocation52_spill] sm:$0xff] }
 0x693   : > { %v6559_v35 = vmul.f32 1.442695, %v6515_v30  ;;  %v13852_v30 = vld [vmem:[#allocation30_spill] sm:$0xff] }
 0x695   : > { %9982 = vpow2.f32 %v6559_v35  ;;  %v10143_v35 = vld [vmem:[%s10310_s17 + $0x8] sm:$0xff] }
 0x69c   : > { %6630 = vadd.xlane.f32.xlu0 %v6629_v0  ;;  %6624 = vadd.xlane.f32.xlu1 %v6623_v50 }
 0x6a0   : > { %6633 = vadd.xlane.f32.xlu1 %v6632_v59  ;;  %6627 = vadd.xlane.f32.xlu0 %v6626_v34  ;;  %v9973_v34 = vpop.eup %9972 }
 0x6a1   : > { %v9975_v31 = vpop.eup %9974 }
 0x6b1   : > { %9704 = vrot.lane.b32.xlu1 %v13839_v38, %s10216_s13  ;;  %v9977_v38 = vpop.eup %9976 }
 0x6b2   : > { %v9979_v19 = vpop.eup %9978 }
 0x6b6   : > { %9699 = vrot.lane.b32.xlu0 %v13842_v62, %s10216_s13  ;;  %v13847_v62 = vld [vmem:[#allocation88_spill] sm:$0xff] }
 0x6b7   : > { %v12842_v13 = vpop.xlane.xlu1 %6600  ;;  %v12844_v61 = vpop.xlane.xlu0 %6606  ;;  %v13848_v14 = vsub.f32 %v13846_v60, %v13847_v62  ;;  %v10144_v62 = vld [vmem:[%s10310_s17] sm:$0xff] }
 0x6b9   : > { %v6565_v20 = vmul.f32 1.442695, %v13848_v14 }
 0x6bb   : > { %v12849_v51 = vpop.xlane.xlu1 %6609  ;;  %v12851_v57 = vpop.xlane.xlu0 %6603  ;;  %9984 = vpow2.f32 %v6565_v20  ;;  %v13856_v20 = vld [vmem:[#allocation5_spill] sm:$0xff] }
 0x6bf   : > { %v9685_v15 = vpop.permute.xlu1 %9684  ;;  %v9680_v55 = vpop.permute.xlu0 %9679 }
 0x6c0   : > { %v9687_v0 = vunpack.i.h.bf16 %v9685_v15  ;;  %v9686_v50 = vunpack.i.l.bf16 %v9685_v15  ;;  %v9682_v59 = vunpack.i.h.bf16 %v9680_v55  ;;  %v9681_v44 = vunpack.i.l.bf16 %v9680_v55  ;;  %v13850_v55 = vld [vmem:[#allocation77_spill] sm:$0xff] }
 0x6c1   : > { %v4950_v15 = vmul.f32 %v9973_v34, %v13849_v24  ;;  %v4946_v48 = vmul.f32 %v9977_v38, %v13850_v55  ;;  %v12871_v34 = vpop.eup %9980  ;;  %v13857_v24 = vld [vmem:[#allocation10_spill] sm:$0xff]  ;;  %v13859_v55 = vld [vmem:[#allocation53_spill] sm:$0xff] }
 0x6c2   : > { %v9538_v4 = vpack.c.bf16 %v9687_v0, %v9686_v50  ;;  %v9534_v12 = vpack.c.bf16 %v9682_v59, %v9681_v44  ;;  %v6561_v0 = vmul.f32 1.442695, %v13851_v22  ;;  %v4952_v50 = vmul.f32 %v9979_v19, %v13852_v30  ;;  %v13853_v59 = vld [vmem:[#allocation22_spill] sm:$0xff]  ;;  %v12873_v6 = vpop.eup %9982  ;;  %v13860_v22 = vld [vmem:[#allocation4_spill] sm:$0xff] }
 0x6c3   : > { %v4956_v44 = vmul.f32 %v9975_v31, %v13853_v59  ;;  %v6635_v31 = vsel %vm4630_vm3, %v12873_v6, 0.0 }
 0x6c4   : > { %9535 = vmatprep.subr.bf16.mxu1 %v9534_v12  ;;  %9539 = vmatprep.subr.bf16.mxu0 %v9538_v4  ;;  %9986 = vpow2.f32 %v6561_v0  ;;  %v13861_v0 = vpack.i.bf16 %v13859_v55, %v13860_v22  ;;  %v10146_v22 = vld [vmem:[%s10310_s17 + $0x10] sm:$0xff] }
 0x6c5   : > { %9537 = vmatpush3.bf16.msra.mxu1 %v9534_v12  ;;  %9541 = vmatpush3.bf16.msra.mxu0 %v9538_v4  ;;  %v12875_v10 = vpop.eup %9984  ;;  %9988 = vrcp.f32 %v12681_v9 }
 0x6c6   : > { %13854 = vst [vmem:[#allocation56_spill] sm:$0xff] %v12875_v10  ;;  %v6644_v4 = vsel %vm4630_vm3, %v12875_v10, 0.0  ;;  %9990 = vrcp.f32 %v12683_v40  ;;  %v10145_v40 = vld [vmem:[%s10310_s17 + $0x18] sm:$0xff] }
 0x6c7   : > { %9992 = vrcp.f32 %v12689_v37 }
 0x6c8   : > { %9141 = vmatmul.mubr.msk.f32.vlgmr.msra.gmra.mrb[44].mxu1 %vm4630_vm3, %v4946_v48  ;;  %9148 = vmatmul.mubr.msk.f32.vlgmr.msra.gmra.mrb[64].mxu0 %vm4630_vm3, %v4950_v15  ;;  %v6641_v48 = vsel %vm4630_vm3, %v12871_v34, 0.0  ;;  %v13858_v15 = vpack.i.bf16 %v13856_v20, %v13857_v24  ;;  %9994 = vrcp.f32 %v12691_v28  ;;  %v13862_v28 = vld [vmem:[#allocation18_spill] sm:$0xff] }
 0x6c9   : > { %9154 = vmatprep.mubr.msk.f32.mxu1 %vm4630_vm3, %v4952_v50  ;;  %9161 = vmatprep.mubr.msk.f32.mxu0 %vm4630_vm3, %v4956_v44 }
 0x6ce   : > { %v12881_v41 = vpop.eup %9986 }
 0x6cf   : > { %13855 = vst [vmem:[#allocation57_spill] sm:$0xff] %v12881_v41  ;;  %v6638_v12 = vsel %vm4630_vm3, %v12881_v41, 0.0 }
 0x6d5   : > { %6642 = vadd.xlane.f32.xlu0 %v6641_v48  ;;  %6636 = vadd.xlane.f32.xlu1 %v6635_v31 }
 0x6d9   : > { %6645 = vadd.xlane.f32.xlu1 %v6644_v4  ;;  %6639 = vadd.xlane.f32.xlu0 %v6638_v12 }
 0x6e8   : > { %v9100_v38 = vpop.f32.mrb[56].mxu0 }
 0x6e9   : > { %v8056_v19 = vadd.f32 %v10143_v35, %v9100_v38  ;;  %v5063_v60 = vpop.f32.mrb[57].mxu0 }
 0x6ea   : > { %v8055_v14 = vadd.f32 %v10144_v62, %v5063_v60  ;;  %9714 = vrot.lane.b32.xlu1 %v13858_v15, %s10216_s13 }
 0x6eb   : > { %8088 = vst.msk [vmem:[%s12891_s19 + $0x8] sm:$0xff] %vm432_vm0, %v8056_v19  ;;  %v9989_v19 = vpop.eup %9988 }
 0x6ec   : > { %8087 = vst.msk [vmem:[%s12891_s19] sm:$0xff] %vm432_vm0, %v8055_v14  ;;  %v9991_v62 = vpop.eup %9990  ;;  %v13863_v14 = vld [vmem:[#allocation28_spill] sm:$0xff] }
 0x6ed   : > { %v13864_v20 = vsub.f32 %v13862_v28, %v13863_v14  ;;  %v9993_v10 = vpop.eup %9992  ;;  %v13872_v14 = vld [vmem:[#allocation82_spill] sm:$0xff] }
 0x6ee   : > { %v9995_v41 = vpop.eup %9994 }
 0x6ef   : > { %9709 = vrot.lane.b32.xlu0 %v13861_v0, %s10216_s13  ;;  %v6571_v24 = vmul.f32 1.442695, %v13864_v20  ;;  %v4964_v20 = vmul.f32 %v9995_v41, %v13872_v14  ;;  %v10149_v14 = vld [vmem:[%s10310_s17 + $0x38] sm:$0xff] }
 0x6f0   : > { %v12908_v30 = vpop.xlane.xlu1 %6612  ;;  %v12910_v50 = vpop.xlane.xlu0 %6618 }
 0x6f1   : > { %9996 = vpow2.f32 %v6571_v24 }
 0x6f4   : > { %v12915_v59 = vpop.xlane.xlu1 %6621  ;;  %v12917_v44 = vpop.xlane.xlu0 %6615 }
 0x6f8   : > { %v9695_v48 = vpop.permute.xlu1 %9694  ;;  %v9690_v31 = vpop.permute.xlu0 %9689 }
 0x6f9   : > { %v9697_v4 = vunpack.i.h.bf16 %v9695_v48  ;;  %v9696_v9 = vunpack.i.l.bf16 %v9695_v48  ;;  %v9692_v12 = vunpack.i.h.bf16 %v9690_v31  ;;  %v9691_v38 = vunpack.i.l.bf16 %v9690_v31  ;;  %v9107_v35 = vpop.f32.mrb[58].mxu0 }
 0x6fa   : > { %v8058_v60 = vadd.f32 %v10145_v40, %v9107_v35  ;;  %v5152_v37 = vpop.f32.mrb[59].mxu0  ;;  %v13865_v48 = vsub.f32 %v12315_v29, %v12555_v42  ;;  %v13869_v40 = vld [vmem:[#allocation48_spill] sm:$0xff]  ;;  %v13870_v29 = vsub.f32 %v12311_v18, %v12565_v46 }
 0x6fb   : > { %v9546_v15 = vpack.c.bf16 %v9697_v4, %v9696_v9  ;;  %v9542_v55 = vpack.c.bf16 %v9692_v12, %v9691_v38  ;;  %v8057_v0 = vadd.f32 %v10146_v22, %v5152_v37  ;;  %v13866_v4 = vld [vmem:[#allocation90_spill] sm:$0xff]  ;;  %v13868_v38 = vld [vmem:[#allocation25_spill] sm:$0xff]  ;;  %v4954_v37 = vmul.f32 %v9991_v62, %v13869_v40 }
 0x6fc   : > { %v6567_v31 = vmul.f32 1.442695, %v13865_v48  ;;  %8090 = vst.msk [vmem:[%s12891_s19 + $0x18] sm:$0xff] %vm432_vm0, %v8058_v60  ;;  %v13867_v9 = vsub.f32 %v12267_v11, %v13866_v4  ;;  %v4958_v35 = vmul.f32 %v9989_v19, %v13868_v38  ;;  %v6569_v42 = vmul.f32 1.442695, %v13870_v29  ;;  %v13871_v60 = vld [vmem:[#allocation47_spill] sm:$0xff]  ;;  %v12945_v11 = vpop.eup %9996 }
 0x6fd   : > { %8089 = vst.msk [vmem:[%s12891_s19 + $0x10] sm:$0xff] %vm432_vm0, %v8057_v0  ;;  %9543 = vmatprep.subr.bf16.mxu1 %v9542_v55  ;;  %9547 = vmatprep.subr.bf16.mxu0 %v9546_v15  ;;  %v4960_v28 = vmul.f32 %v9993_v10, %v13871_v60  ;;  %v6653_v46 = vsel %vm4630_vm3, %v12945_v11, 0.0  ;;  %v10147_v48 = vld [vmem:[%s10310_s17 + $0x28] sm:$0xff]  ;;  %v13876_v38 = vld [vmem:[#allocation6_spill] sm:$0xff] }
 0x6fe   : > { %9545 = vmatpush3.bf16.msra.mxu1 %v9542_v55  ;;  %9549 = vmatpush3.bf16.msra.mxu0 %v9546_v15  ;;  %v6573_v12 = vmul.f32 1.442695, %v13867_v9  ;;  %9998 = vpow2.f32 %v6567_v31  ;;  %v13873_v15 = vld [vmem:[#allocation39_spill] sm:$0xff]  ;;  %v13874_v55 = vld [vmem:[#allocation2_spill] sm:$0xff] }
 0x6ff   : > { %v13875_v22 = vpack.i.bf16 %v13873_v15, %v13874_v55  ;;  %v10148_v9 = vld [vmem:[%s10310_s17 + $0x20] sm:$0xff] }
 0x700   : > { %10000 = vpow2.f32 %v6573_v12 }
 0x701   : > { %9155 = vmatmul.mubr.msk.f32.vlgmr.msra.gmra.mrb[46].mxu1 %vm4630_vm3, %v4954_v37  ;;  %9162 = vmatmul.mubr.msk.f32.vlgmr.msra.gmra.mrb[66].mxu0 %vm4630_vm3, %v4958_v35  ;;  %10002 = vpow2.f32 %v6569_v42  ;;  %v13877_v35 = vld [vmem:[#allocation11_spill] sm:$0xff] }
 0x702   : > { %9168 = vmatprep.mubr.msk.f32.mxu1 %vm4630_vm3, %v4960_v28  ;;  %9175 = vmatprep.mubr.msk.f32.mxu0 %vm4630_vm3, %v4964_v20  ;;  %v13878_v40 = vpack.i.bf16 %v13876_v38, %v13877_v35  ;;  %10004 = vrcp.f32 %v12698_v3 }
 0x703   : > { %10006 = vrcp.f32 %v12707_v39 }
 0x704   : > { %10008 = vrcp.f32 %v12729_v43 }
 0x705   : > { %10010 = vrcp.f32 %v12751_v58 }
 0x708   : > { %v12947_v19 = vpop.eup %9998 }
 0x709   : > { %v6647_v10 = vsel %vm4630_vm3, %v12947_v19, 0.0 }
 0x70a   : > { %v12949_v18 = vpop.eup %10000 }
 0x70b   : > { %v12955_v41 = vpop.eup %10002  ;;  %v6656_v62 = vsel %vm4630_vm3, %v12949_v18, 0.0 }
 0x70c   : > { %v6650_v24 = vsel %vm4630_vm3, %v12955_v41, 0.0  ;;  %v10005_v55 = vpop.eup %10004 }
 0x70e   : > { %6654 = vadd.xlane.f32.xlu0 %v6653_v46  ;;  %6648 = vadd.xlane.f32.xlu1 %v6647_v10  ;;  %v10150_v46 = vld [vmem:[%s10310_s17 + $0x30] sm:$0xff] }
 0x712   : > { %6657 = vadd.xlane.f32.xlu1 %v6656_v62  ;;  %6651 = vadd.xlane.f32.xlu0 %v6650_v24 }
 0x723   : > { %9724 = vrot.lane.b32.xlu1 %v13875_v22, %s10216_s13  ;;  %v10007_v22 = vpop.eup %10006 }
 0x725   : > { %v9114_v0 = vpop.f32.mrb[40].mxu1 }
 0x726   : > { %v8060_v31 = vadd.f32 %v10147_v48, %v9114_v0  ;;  %v5241_v4 = vpop.f32.mrb[41].mxu1  ;;  %v13879_v0 = vsub.f32 %v12291_v27, %v12530_v5  ;;  %v13883_v5 = vld [vmem:[#allocation85_spill] sm:$0xff] }
 0x727   : > { %v8059_v12 = vadd.f32 %v10148_v9, %v5241_v4  ;;  %v10009_v9 = vpop.eup %10008 }
 0x728   : > { %8092 = vst.msk [vmem:[%s12891_s19 + $0x28] sm:$0xff] %vm432_vm0, %v8060_v31  ;;  %9719 = vrot.lane.b32.xlu0 %v13878_v40, %s10216_s13  ;;  %v6579_v48 = vmul.f32 1.442695, %v13879_v0  ;;  %v10011_v35 = vpop.eup %10010  ;;  %v13881_v40 = vsub.f32 %v12287_v45, %v12541_v25  ;;  %v13888_v45 = vld [vmem:[#allocation26_spill] sm:$0xff]  ;;  %v13889_v25 = vld [vmem:[#allocation32_spill] sm:$0xff]  ;;  %v13895_v0 = vld [vmem:[#allocation33_spill] sm:$0xff] }
 0x729   : > { %8091 = vst.msk [vmem:[%s12891_s19 + $0x20] sm:$0xff] %vm432_vm0, %v8059_v12  ;;  %v12976_v37 = vpop.xlane.xlu1 %6624  ;;  %v12978_v29 = vpop.xlane.xlu0 %6630  ;;  %v13880_v12 = vsub.f32 %v12333_v21, %v12575_v2  ;;  %v13886_v2 = vld [vmem:[#allocation91_spill] sm:$0xff] }
 0x72a   : > { %10012 = vpow2.f32 %v6579_v48 }
 0x72b   : > { %v6575_v38 = vmul.f32 1.442695, %v13880_v12 }
 0x72d   : > { %v12983_v42 = vpop.xlane.xlu1 %6633  ;;  %v12985_v60 = vpop.xlane.xlu0 %6627  ;;  %10014 = vpow2.f32 %v6575_v38 }
 0x72e   : > { %v9121_v28 = vpop.f32.mrb[60].mxu0 }
 0x72f   : > { %v8062_v3 = vadd.f32 %v10149_v14, %v9121_v28  ;;  %v5330_v20 = vpop.f32.mrb[61].mxu0  ;;  %v6581_v28 = vmul.f32 1.442695, %v13881_v40  ;;  %v13882_v14 = vld [vmem:[#allocation83_spill] sm:$0xff] }
 0x730   : > { %v8061_v10 = vadd.f32 %v10150_v46, %v5330_v20  ;;  %v4962_v27 = vmul.f32 %v10005_v55, %v13882_v14  ;;  %v13884_v20 = vld [vmem:[#allocation95_spill] sm:$0xff]  ;;  %v13901_v14 = vld [vmem:[#allocation92_spill] sm:$0xff] }
 0x731   : > { %8094 = vst.msk [vmem:[%s12891_s19 + $0x38] sm:$0xff] %vm432_vm0, %v8062_v3  ;;  %v9705_v62 = vpop.permute.xlu1 %9704  ;;  %v9700_v24 = vpop.permute.xlu0 %9699  ;;  %v4966_v3 = vmul.f32 %v10007_v22, %v13883_v5  ;;  %v13885_v46 = vsub.f32 %v12329_v8, %v13884_v20  ;;  %10016 = vpow2.f32 %v6581_v28  ;;  %v13891_v8 = vld [vmem:[#allocation19_spill] sm:$0xff]  ;;  %v13894_v22 = vld [vmem:[#allocation13_spill] sm:$0xff]  ;;  %v13904_v20 = vld [vmem:[#allocation100_spill] sm:$0xff] }
 0x732   : > { %8093 = vst.msk [vmem:[%s12891_s19 + $0x30] sm:$0xff] %vm432_vm0, %v8061_v10  ;;  %v9707_v39 = vunpack.i.h.bf16 %v9705_v62  ;;  %v9706_v43 = vunpack.i.l.bf16 %v9705_v62  ;;  %v9702_v15 = vunpack.i.h.bf16 %v9700_v24  ;;  %v9701_v58 = vunpack.i.l.bf16 %v9700_v24  ;;  %v13887_v62 = vld [vmem:[#allocation99_spill] sm:$0xff] }
 0x733   : > { %v6577_v21 = vmul.f32 1.442695, %v13885_v46  ;;  %v4968_v10 = vmul.f32 %v10009_v9, %v13886_v2  ;;  %v4972_v24 = vmul.f32 %v10011_v35, %v13887_v62  ;;  %v13896_v48 = vsub.f32 %v13894_v22, %v13895_v0  ;;  %v13898_v9 = vld [vmem:[#allocation98_spill] sm:$0xff]  ;;  %v13900_v28 = vld [vmem:[#allocation55_spill] sm:$0xff] }
 0x734   : > { %v9554_v31 = vpack.c.bf16 %v9707_v39, %v9706_v43  ;;  %v9550_v4 = vpack.c.bf16 %v9702_v15, %v9701_v58  ;;  %v13890_v39 = vsub.f32 %v13888_v45, %v13889_v25  ;;  %v13892_v15 = vld [vmem:[#allocation97_spill] sm:$0xff]  ;;  %v13025_v35 = vpop.eup %10012  ;;  %v13906_v45 = vld [vmem:[#allocation38_spill] sm:$0xff] }
 0x735   : > { %10018 = vpow2.f32 %v6577_v21  ;;  %v13893_v58 = vsub.f32 %v13891_v8, %v13892_v15  ;;  %v13907_v25 = vld [vmem:[#allocation94_spill] sm:$0xff]  ;;  %v13910_v15 = vld [vmem:[#allocation101_spill] sm:$0xff] }
 0x736   : > { %9551 = vmatprep.subr.bf16.mxu1 %v9550_v4  ;;  %9555 = vmatprep.subr.bf16.mxu0 %v9554_v31  ;;  %v6587_v43 = vmul.f32 1.442695, %v13890_v39  ;;  %v13908_v39 = vsub.f32 %v13906_v45, %v13907_v25  ;;  %v13909_v8 = vld [vmem:[#allocation54_spill] sm:$0xff] }
 0x737   : > { %9553 = vmatpush3.bf16.msra.mxu1 %v9550_v4  ;;  %9557 = vmatpush3.bf16.msra.mxu0 %v9554_v31  ;;  %v6583_v55 = vmul.f32 1.442695, %v13893_v58  ;;  %v6589_v31 = vmul.f32 1.442695, %v13896_v48  ;;  %v13897_v4 = vld [vmem:[#allocation14_spill] sm:$0xff]  ;;  %v13027_v40 = vpop.eup %10014  ;;  %v13911_v58 = vsub.f32 %v13909_v8, %v13910_v15  ;;  %v10151_v8 = vld [vmem:[%s10310_s17 + $0x48] sm:$0xff] }
 0x738   : > { %10020 = vpow2.f32 %v6587_v43  ;;  %v13899_v12 = vsub.f32 %v13897_v4, %v13898_v9  ;;  %v6659_v62 = vsel %vm4630_vm3, %v13027_v40, 0.0  ;;  %v6597_v43 = vmul.f32 1.442695, %v13908_v39 }
 0x739   : > { %10022 = vpow2.f32 %v6583_v55  ;;  %v6593_v55 = vmul.f32 1.442695, %v13911_v58  ;;  %v10152_v58 = vld [vmem:[%s10310_s17 + $0x58] sm:$0xff] }
 0x73a   : > { %9169 = vmatmul.mubr.msk.f32.vlgmr.msra.gmra.mrb[48].mxu1 %vm4630_vm3, %v4962_v27  ;;  %9176 = vmatmul.mubr.msk.f32.vlgmr.msra.gmra.mrb[68].mxu0 %vm4630_vm3, %v4966_v3  ;;  %v6585_v38 = vmul.f32 1.442695, %v13899_v12  ;;  %10024 = vpow2.f32 %v6589_v31  ;;  %v13902_v27 = vsub.f32 %v13900_v28, %v13901_v14  ;;  %v13903_v3 = vld [vmem:[#allocation20_spill] sm:$0xff] }
 0x73b   : > { %9182 = vmatprep.mubr.msk.f32.mxu1 %vm4630_vm3, %v4968_v10  ;;  %9189 = vmatprep.mubr.msk.f32.mxu0 %vm4630_vm3, %v4972_v24  ;;  %v13905_v46 = vsub.f32 %v13903_v3, %v13904_v20  ;;  %v13035_v2 = vpop.eup %10016  ;;  %v6665_v10 = vsel %vm4630_vm3, %v13025_v35, 0.0 }
 0x73c   : > { %v6595_v5 = vmul.f32 1.442695, %v13902_v27  ;;  %10026 = vpow2.f32 %v6585_v38  ;;  %v6668_v0 = vsel %vm4630_vm3, %v13035_v2, 0.0 }
 0x73d   : > { %v6591_v21 = vmul.f32 1.442695, %v13905_v46 }
 0x73e   : > { %10028 = vpow2.f32 %v6595_v5 }
 0x73f   : > { %v13041_v24 = vpop.eup %10018  ;;  %10030 = vpow2.f32 %v6591_v21 }
 0x740   : > { %v6662_v48 = vsel %vm4630_vm3, %v13041_v24, 0.0  ;;  %10032 = vpow2.f32 %v6597_v43 }
 0x741   : > { %10034 = vpow2.f32 %v6593_v55 }
 0x742   : > { %v13049_v22 = vpop.eup %10020  ;;  %10036 = vrcp.f32 %v12735_v56 }
 0x743   : > { %v13055_v31 = vpop.eup %10022  ;;  %v6677_v9 = vsel %vm4630_vm3, %v13049_v22, 0.0  ;;  %10038 = vrcp.f32 %v12743_v23 }
 0x744   : > { %v13057_v4 = vpop.eup %10024  ;;  %v6671_v12 = vsel %vm4630_vm3, %v13055_v31, 0.0  ;;  %10040 = vrcp.f32 %v12785_v16 }
 0x745   : > { %v6680_v14 = vsel %vm4630_vm3, %v13057_v4, 0.0  ;;  %10042 = vrcp.f32 %v12797_v47 }
 0x746   : > { %v13063_v38 = vpop.eup %10026  ;;  %10044 = vrcp.f32 %v12792_v1 }
 0x747   : > { %6666 = vadd.xlane.f32.xlu0 %v6665_v10  ;;  %6660 = vadd.xlane.f32.xlu1 %v6659_v62  ;;  %v6674_v27 = vsel %vm4630_vm3, %v13063_v38, 0.0  ;;  %10046 = vrcp.f32 %v12799_v36 }
 0x748   : > { %v13065_v28 = vpop.eup %10028  ;;  %10048 = vrcp.f32 %v12842_v13 }
 0x749   : > { %v13071_v5 = vpop.eup %10030  ;;  %v6689_v20 = vsel %vm4630_vm3, %v13065_v28, 0.0  ;;  %10050 = vrcp.f32 %v12844_v61 }
 0x74a   : > { %v13073_v3 = vpop.eup %10032  ;;  %v6683_v46 = vsel %vm4630_vm3, %v13071_v5, 0.0  ;;  %10052 = vrcp.f32 %v12849_v51 }
 0x74b   : > { %6669 = vadd.xlane.f32.xlu1 %v6668_v0  ;;  %6663 = vadd.xlane.f32.xlu0 %v6662_v48  ;;  %v13079_v21 = vpop.eup %10034  ;;  %v6692_v10 = vsel %vm4630_vm3, %v13073_v3, 0.0  ;;  %v10153_v48 = vld [vmem:[%s10310_s17 + $0x40] sm:$0xff]  ;;  %10054 = vrcp.f32 %v12851_v57 }
 0x74c   : > { %v6686_v62 = vsel %vm4630_vm3, %v13079_v21, 0.0  ;;  %10056 = vrcp.f32 %v12908_v30 }
 0x74d   : > { %10058 = vrcp.f32 %v12910_v50 }
 0x74e   : > { %10060 = vrcp.f32 %v12917_v44  ;;  %v13916_v44 = vld [vmem:[#allocation41_spill] sm:$0xff] }
 0x74f   : > { %6678 = vadd.xlane.f32.xlu1 %v6677_v9  ;;  %6672 = vadd.xlane.f32.xlu0 %v6671_v12  ;;  %v10154_v12 = vld [vmem:[%s10310_s17 + $0x50] sm:$0xff]  ;;  %10062 = vrcp.f32 %v12915_v59 }
 0x750   : > { %10064 = vrcp.f32 %v12976_v37  ;;  %v13919_v37 = vld [vmem:[#allocation34_spill] sm:$0xff] }
 0x751   : > { %10066 = vrcp.f32 %v12978_v29 }
 0x753   : > { %6681 = vadd.xlane.f32.xlu1 %v6680_v14  ;;  %6675 = vadd.xlane.f32.xlu0 %v6674_v27 }
 0x757   : > { %6690 = vadd.xlane.f32.xlu1 %v6689_v20  ;;  %6684 = vadd.xlane.f32.xlu0 %v6683_v46 }
 0x75b   : > { %6693 = vadd.xlane.f32.xlu1 %v6692_v10  ;;  %6687 = vadd.xlane.f32.xlu0 %v6686_v62 }
 0x762   : > { %v13086_v45 = vpop.xlane.xlu1 %6636  ;;  %v13088_v25 = vpop.xlane.xlu0 %6642 }
 0x763   : > { %v9128_v39 = vpop.f32.mrb[42].mxu1  ;;  %v9135_v43 = vpop.f32.mrb[62].mxu0 }
 0x764   : > { %v8064_v15 = vadd.f32 %v10151_v8, %v9128_v39  ;;  %v8066_v55 = vadd.f32 %v10152_v58, %v9135_v43  ;;  %v5419_v56 = vpop.f32.mrb[43].mxu1  ;;  %v5508_v0 = vpop.f32.mrb[63].mxu0 }
 0x765   : > { %v8063_v9 = vadd.f32 %v10153_v48, %v5419_v56  ;;  %v8065_v14 = vadd.f32 %v10154_v12, %v5508_v0  ;;  %v10037_v39 = vpop.eup %10036  ;;  %v13912_v56 = vld [vmem:[#allocation93_spill] sm:$0xff]  ;;  %v13913_v48 = vld [vmem:[#allocation96_spill] sm:$0xff]  ;;  %10068 = vrcp.f32 %v12985_v60 }
 0x766   : > { %8096 = vst.msk [vmem:[%s12891_s19 + $0x48] sm:$0xff] %vm432_vm0, %v8064_v15  ;;  %8098 = vst.msk [vmem:[%s12891_s19 + $0x58] sm:$0xff] %vm432_vm0, %v8066_v55  ;;  %v13101_v23 = vpop.xlane.xlu1 %6645  ;;  %v13103_v16 = vpop.xlane.xlu0 %6639  ;;  %v4970_v0 = vmul.f32 %v10037_v39, %v13912_v56  ;;  %v13914_v12 = vld [vmem:[#allocation40_spill] sm:$0xff]  ;;  %v10155_v39 = vld [vmem:[%s10310_s17 + $0x68] sm:$0xff] }
 0x767   : > { %8095 = vst.msk [vmem:[%s12891_s19 + $0x40] sm:$0xff] %vm432_vm0, %v8063_v9  ;;  %8097 = vst.msk [vmem:[%s12891_s19 + $0x50] sm:$0xff] %vm432_vm0, %v8065_v14  ;;  %v10039_v43 = vpop.eup %10038  ;;  %v10157_v56 = vld [vmem:[%s10310_s17 + $0x60] sm:$0xff]  ;;  %10070 = vrcp.f32 %v12983_v42 }
 0x768   : > { %v10041_v58 = vpop.eup %10040  ;;  %v4974_v9 = vmul.f32 %v10039_v43, %v13913_v48  ;;  %v10158_v48 = vld [vmem:[%s10310_s17 + $0x70] sm:$0xff]  ;;  %10072 = vrcp.f32 %v13086_v45 }
 0x769   : > { %v10043_v55 = vpop.eup %10042  ;;  %v4976_v14 = vmul.f32 %v10041_v58, %v13914_v12  ;;  %10074 = vrcp.f32 %v13088_v25  ;;  %v13921_v25 = vld [vmem:[#allocation45_spill] sm:$0xff] }
 0x76a   : > { %v9715_v27 = vpop.permute.xlu1 %9714  ;;  %v9710_v20 = vpop.permute.xlu0 %9709 }
 0x76b   : > { %v9717_v46 = vunpack.i.h.bf16 %v9715_v27  ;;  %v9716_v47 = vunpack.i.l.bf16 %v9715_v27  ;;  %v9712_v10 = vunpack.i.h.bf16 %v9710_v20  ;;  %v9711_v62 = vunpack.i.l.bf16 %v9710_v20  ;;  %v13915_v27 = vld [vmem:[#allocation43_spill] sm:$0xff] }
 0x76c   : > { %v4980_v20 = vmul.f32 %v10043_v55, %v13915_v27 }
 0x76d   : > { %v9562_v8 = vpack.c.bf16 %v9717_v46, %v9716_v47  ;;  %v9558_v15 = vpack.c.bf16 %v9712_v10, %v9711_v62 }
 0x76f   : > { %9559 = vmatprep.subr.bf16.mxu1 %v9558_v15  ;;  %9563 = vmatprep.subr.bf16.mxu0 %v9562_v8 }
 0x770   : > { %9561 = vmatpush3.bf16.msra.mxu1 %v9558_v15  ;;  %9565 = vmatpush3.bf16.msra.mxu0 %v9562_v8  ;;  %v10156_v8 = vld [vmem:[%s10310_s17 + $0x78] sm:$0xff] }
 0x773   : > { %9183 = vmatmul.mubr.msk.f32.vlgmr.msra.gmra.mrb[50].mxu1 %vm4630_vm3, %v4970_v0  ;;  %9190 = vmatmul.mubr.msk.f32.vlgmr.msra.gmra.mrb[70].mxu0 %vm4630_vm3, %v4974_v9 }
 0x774   : > { %9196 = vmatprep.mubr.msk.f32.mxu1 %vm4630_vm3, %v4976_v14  ;;  %9203 = vmatprep.mubr.msk.f32.mxu0 %vm4630_vm3, %v4980_v20 }
 0x79b   : > { %v13117_v46 = vpop.xlane.xlu1 %6648  ;;  %v13119_v47 = vpop.xlane.xlu0 %6654 }
 0x79c   : > { %v9142_v10 = vpop.f32.mrb[44].mxu1  ;;  %v9149_v62 = vpop.f32.mrb[64].mxu0 }
 0x79d   : > { %v8068_v43 = vadd.f32 %v10155_v39, %v9142_v10  ;;  %v8070_v15 = vadd.f32 %v10156_v8, %v9149_v62  ;;  %v5597_v58 = vpop.f32.mrb[45].mxu1  ;;  %v5686_v55 = vpop.f32.mrb[65].mxu0  ;;  %v13917_v8 = vld [vmem:[#allocation44_spill] sm:$0xff] }
 0x79e   : > { %v8067_v0 = vadd.f32 %v10157_v56, %v5597_v58  ;;  %v8069_v1 = vadd.f32 %v10158_v48, %v5686_v55  ;;  %v10045_v10 = vpop.eup %10044  ;;  %10076 = vrcp.f32 %v13103_v16  ;;  %v13922_v48 = vld [vmem:[#allocation62_spill] sm:$0xff] }
 0x79f   : > { %8100 = vst.msk [vmem:[%s12891_s19 + $0x68] sm:$0xff] %vm432_vm0, %v8068_v43  ;;  %8102 = vst.msk [vmem:[%s12891_s19 + $0x78] sm:$0xff] %vm432_vm0, %v8070_v15  ;;  %v13133_v36 = vpop.xlane.xlu1 %6657  ;;  %v6652_v9 = vpop.xlane.xlu0 %6651  ;;  %v4978_v43 = vmul.f32 %v10045_v10, %v13916_v44  ;;  %v13918_v15 = vld [vmem:[#allocation29_spill] sm:$0xff]  ;;  %v13929_v44 = vld [vmem:[#allocation56_spill] sm:$0xff] }
 0x7a0   : > { %8099 = vst.msk [vmem:[%s12891_s19 + $0x60] sm:$0xff] %vm432_vm0, %v8067_v0  ;;  %8101 = vst.msk [vmem:[%s12891_s19 + $0x70] sm:$0xff] %vm432_vm0, %v8069_v1  ;;  %v10047_v39 = vpop.eup %10046  ;;  %10078 = vrcp.f32 %v13101_v23  ;;  %v13923_v1 = vld [vmem:[#allocation58_spill] sm:$0xff] }
 0x7a1   : > { %v10049_v57 = vpop.eup %10048  ;;  %v4982_v59 = vmul.f32 %v10047_v39, %v13917_v8  ;;  %10080 = vrcp.f32 %v13117_v46 }
 0x7a2   : > { %v10051_v30 = vpop.eup %10050  ;;  %v6696_v29 = vmul.f32 %v10049_v57, %v12714_v52  ;;  %10082 = vrcp.f32 %v13119_v47  ;;  %v13928_v57 = vld [vmem:[#allocation57_spill] sm:$0xff] }
 0x7a3   : > { %v9725_v13 = vpop.permute.xlu1 %9724  ;;  %v9720_v61 = vpop.permute.xlu0 %9719  ;;  %v6700_v60 = vmul.f32 %v10051_v30, %v12711_v53  ;;  %v13920_v53 = vld [vmem:[#allocation42_spill] sm:$0xff] }
 0x7a4   : > { %v9727_v12 = vunpack.i.h.bf16 %v9725_v13  ;;  %v9726_v14 = vunpack.i.l.bf16 %v9725_v13  ;;  %v9722_v27 = vunpack.i.h.bf16 %v9720_v61  ;;  %v9721_v20 = vunpack.i.l.bf16 %v9720_v61  ;;  %v10053_v50 = vpop.eup %10052  ;;  %v13924_v13 = vld [vmem:[#allocation64_spill] sm:$0xff] }
 0x7a5   : > { %v10055_v58 = vpop.eup %10054  ;;  %v6702_v45 = vmul.f32 %v10053_v50, %v12717_v63  ;;  %10084 = vrcp.f32 %v6652_v9 }
 0x7a6   : > { %v9570_v51 = vpack.c.bf16 %v9727_v12, %v9726_v14  ;;  %v9566_v62 = vpack.c.bf16 %v9722_v27, %v9721_v20  ;;  %v10057_v55 = vpop.eup %10056  ;;  %v6698_v42 = vmul.f32 %v10055_v58, %v12723_v7  ;;  %10086 = vrcp.f32 %v13133_v36  ;;  %v13925_v27 = vld [vmem:[#allocation63_spill] sm:$0xff] }
 0x7a7   : > { %v10059_v56 = vpop.eup %10058  ;;  %v6704_v7 = vmul.f32 %v10057_v55, %v12767_v32 }
 0x7a8   : > { %9567 = vmatprep.subr.bf16.mxu1 %v9566_v62  ;;  %9571 = vmatprep.subr.bf16.mxu0 %v9570_v51  ;;  %v10061_v52 = vpop.eup %10060  ;;  %v6708_v63 = vmul.f32 %v10059_v56, %v12765_v26 }
 0x7a9   : > { %9569 = vmatpush3.bf16.msra.mxu1 %v9566_v62  ;;  %9573 = vmatpush3.bf16.msra.mxu0 %v9570_v51  ;;  %v10063_v16 = vpop.eup %10062  ;;  %v6706_v0 = vmul.f32 %v10061_v52, %v12775_v54  ;;  %v13927_v51 = vld [vmem:[#allocation76_spill] sm:$0xff] }
 0x7aa   : > { %9575 = vmatprep.subr.bf16.mxu1 %v13918_v15  ;;  %9579 = vmatprep.subr.bf16.mxu0 %v13919_v37  ;;  %v10065_v23 = vpop.eup %10064  ;;  %v6710_v32 = vmul.f32 %v10063_v16, %v13922_v48 }
 0x7ab   : > { %v10067_v46 = vpop.eup %10066  ;;  %v6712_v26 = vmul.f32 %v10065_v23, %v12819_v33  ;;  %v13926_v33 = vld [vmem:[#allocation73_spill] sm:$0xff] }
 0x7ac   : > { %9197 = vmatmul.mubr.msk.f32.vlgmr.msra.gmra.mrb[52].mxu1 %vm4630_vm3, %v4978_v43  ;;  %9204 = vmatmul.mubr.msk.f32.vlgmr.msra.gmra.mrb[72].mxu0 %vm4630_vm3, %v4982_v59  ;;  %v10069_v47 = vpop.eup %10068  ;;  %v6716_v36 = vmul.f32 %v10067_v46, %v12817_v17  ;;  %v13931_v59 = vld [vmem:[#allocation61_spill] sm:$0xff] }
 0x7ad   : > { %9577 = vmatpush3.bf16.msra.mxu1 %v13918_v15  ;;  %9210 = vmatprep.mubr.msk.f32.mxu1 %vm4630_vm3, %v6696_v29  ;;  %v10071_v9 = vpop.eup %10070  ;;  %v6714_v12 = vmul.f32 %v10069_v47, %v12827_v49  ;;  %v13932_v29 = vld [vmem:[#allocation67_spill] sm:$0xff] }
 0x7ae   : > { %9581 = vmatpush3.bf16.msra.mxu0 %v13919_v37  ;;  %9217 = vmatprep.mubr.msk.f32.mxu0 %vm4630_vm3, %v6700_v60  ;;  %v10073_v54 = vpop.eup %10072  ;;  %v6718_v20 = vmul.f32 %v10071_v9, %v13925_v27 }
 0x7af   : > { %9583 = vmatprep.subr.bf16.mxu1 %v13920_v53  ;;  %9587 = vmatprep.subr.bf16.mxu0 %v13921_v25  ;;  %v10075_v61 = vpop.eup %10074  ;;  %v6720_v17 = vmul.f32 %v10073_v54, %v12873_v6  ;;  %v13930_v6 = vld [vmem:[#allocation81_spill] sm:$0xff] }
 0x7b0   : > { %9211 = vmatmul.mubr.msk.f32.vlgmr.msra.gmra.mrb[54].mxu1 %vm4630_vm3, %v6698_v42  ;;  %v10077_v14 = vpop.eup %10076  ;;  %v6724_v49 = vmul.f32 %v10075_v61, %v12871_v34  ;;  %v10159_v42 = vld [vmem:[%s10310_s17 + $0x88] sm:$0xff] }
 0x7b1   : > { %9218 = vmatmul.mubr.msk.f32.vlgmr.msra.gmra.mrb[74].mxu0 %vm4630_vm3, %v6702_v45  ;;  %9585 = vmatpush3.bf16.msra.mxu1 %v13920_v53  ;;  %v10079_v10 = vpop.eup %10078  ;;  %v6722_v30 = vmul.f32 %v10077_v14, %v13928_v57  ;;  %v10160_v45 = vld [vmem:[%s10310_s17 + $0x98] sm:$0xff] }
 0x7b2   : > { %9224 = vmatprep.mubr.msk.f32.mxu1 %vm4630_vm3, %v6704_v7  ;;  %9589 = vmatpush3.bf16.msra.mxu0 %v13921_v25  ;;  %v10081_v62 = vpop.eup %10080  ;;  %v6726_v43 = vmul.f32 %v10079_v10, %v13929_v44  ;;  %v10161_v7 = vld [vmem:[%s10310_s17 + $0x80] sm:$0xff]  ;;  %v13936_v10 = vld [vmem:[#allocation12_spill] sm:$0xff] }
 0x7b3   : > { %9231 = vmatprep.mubr.msk.f32.mxu0 %vm4630_vm3, %v6708_v63  ;;  %9591 = vmatprep.subr.bf16.mxu1 %v13923_v1  ;;  %v10083_v39 = vpop.eup %10082  ;;  %v6728_v34 = vmul.f32 %v10081_v62, %v12947_v19  ;;  %v13933_v19 = vld [vmem:[#allocation50_spill] sm:$0xff]  ;;  %v10162_v63 = vld [vmem:[%s10310_s17 + $0x90] sm:$0xff] }
 0x7b4   : > { %9595 = vmatprep.subr.bf16.mxu0 %v13924_v13  ;;  %9225 = vmatmul.mubr.msk.f32.vlgmr.msra.gmra.mrb[56].mxu1 %vm4630_vm3, %v6706_v0  ;;  %v10085_v50 = vpop.eup %10084  ;;  %v6732_v15 = vmul.f32 %v10083_v39, %v12945_v11  ;;  %v13934_v11 = vld [vmem:[#allocation15_spill] sm:$0xff]  ;;  %v13937_v62 = vld [vmem:[#allocation16_spill] sm:$0xff] }
 0x7b5   : > { %9232 = vmatmul.mubr.msk.f32.vlgmr.msra.gmra.mrb[76].mxu0 %vm4630_vm3, %v6710_v32  ;;  %9593 = vmatpush3.bf16.msra.mxu1 %v13923_v1  ;;  %v10087_v8 = vpop.eup %10086  ;;  %v6730_v37 = vmul.f32 %v10085_v50, %v12955_v41 }
 0x7b6   : > { %9238 = vmatprep.mubr.msk.f32.mxu1 %vm4630_vm3, %v6712_v26  ;;  %9597 = vmatpush3.bf16.msra.mxu0 %v13924_v13  ;;  %v6734_v58 = vmul.f32 %v10087_v8, %v12949_v18  ;;  %v13935_v18 = vld [vmem:[#allocation21_spill] sm:$0xff]  ;;  %v10163_v8 = vld [vmem:[%s10310_s17 + $0xa8] sm:$0xff] }
 0x7b7   : > { %9245 = vmatprep.mubr.msk.f32.mxu0 %vm4630_vm3, %v6716_v36  ;;  %9599 = vmatprep.subr.bf16.mxu1 %v13926_v33 }
 0x7b8   : > { %9603 = vmatprep.subr.bf16.mxu0 %v13927_v51  ;;  %9239 = vmatmul.mubr.msk.f32.vlgmr.msra.gmra.mrb[58].mxu1 %vm4630_vm3, %v6714_v12 }
 0x7b9   : > { %9246 = vmatmul.mubr.msk.f32.vlgmr.msra.gmra.mrb[78].mxu0 %vm4630_vm3, %v6718_v20  ;;  %9601 = vmatpush3.bf16.msra.mxu1 %v13926_v33 }
 0x7ba   : > { %9252 = vmatprep.mubr.msk.f32.mxu1 %vm4630_vm3, %v6720_v17  ;;  %9605 = vmatpush3.bf16.msra.mxu0 %v13927_v51 }
 0x7bb   : > { %9259 = vmatprep.mubr.msk.f32.mxu0 %vm4630_vm3, %v6724_v49  ;;  %9607 = vmatprep.subr.bf16.mxu1 %v13930_v6 }
 0x7bc   : > { %9611 = vmatprep.subr.bf16.mxu0 %v13931_v59  ;;  %9253 = vmatmul.mubr.msk.f32.vlgmr.msra.gmra.mrb[60].mxu1 %vm4630_vm3, %v6722_v30 }
 0x7bd   : > { %9260 = vmatmul.mubr.msk.f32.vlgmr.msra.gmra.mrb[80].mxu0 %vm4630_vm3, %v6726_v43  ;;  %9609 = vmatpush3.bf16.msra.mxu1 %v13930_v6 }
 0x7be   : > { %9266 = vmatprep.mubr.msk.f32.mxu1 %vm4630_vm3, %v6728_v34  ;;  %9613 = vmatpush3.bf16.msra.mxu0 %v13931_v59  ;;  %v10164_v34 = vld [vmem:[%s10310_s17 + $0xb8] sm:$0xff] }
 0x7bf   : > { %9273 = vmatprep.mubr.msk.f32.mxu0 %vm4630_vm3, %v6732_v15  ;;  %9615 = vmatprep.subr.bf16.mxu1 %v13932_v29 }
 0x7c0   : > { %9619 = vmatprep.subr.bf16.mxu0 %v13933_v19  ;;  %9267 = vmatmul.mubr.msk.f32.vlgmr.msra.gmra.mrb[62].mxu1 %vm4630_vm3, %v6730_v37 }
 0x7c1   : > { %9274 = vmatmul.mubr.msk.f32.vlgmr.msra.gmra.mrb[82].mxu0 %vm4630_vm3, %v6734_v58  ;;  %9617 = vmatpush3.bf16.msra.mxu1 %v13932_v29  ;;  %v10165_v58 = vld [vmem:[%s10310_s17 + $0xa0] sm:$0xff]  ;;  %v10166_v29 = vld [vmem:[%s10310_s17 + $0xb0] sm:$0xff] }
 0x7c2   : > { %9621 = vmatpush3.bf16.msra.mxu0 %v13933_v19  ;;  %9623 = vmatprep.subr.bf16.mxu1 %v13934_v11 }
 0x7c3   : > { %9627 = vmatprep.subr.bf16.mxu0 %v13935_v18 }
 0x7d4   : > { %v6661_v41 = vpop.xlane.xlu1 %6660  ;;  %v6667_v55 = vpop.xlane.xlu0 %6666 }
 0x7d5   : > { %10088 = vrcp.f32 %v6661_v41  ;;  %v9156_v60 = vpop.f32.mrb[46].mxu1  ;;  %v9163_v56 = vpop.f32.mrb[66].mxu0  ;;  %v10167_v41 = vld [vmem:[%s10310_s17 + $0xc8] sm:$0xff] }
 0x7d6   : > { %10090 = vrcp.f32 %v6667_v55  ;;  %v8072_v52 = vadd.f32 %v10159_v42, %v9156_v60  ;;  %v8074_v53 = vadd.f32 %v10160_v45, %v9163_v56  ;;  %v5775_v25 = vpop.f32.mrb[47].mxu1  ;;  %v5864_v16 = vpop.f32.mrb[67].mxu0  ;;  %v10168_v60 = vld [vmem:[%s10310_s17 + $0xd8] sm:$0xff]  ;;  %v10169_v45 = vld [vmem:[%s10310_s17 + $0xc0] sm:$0xff] }
 0x7d7   : > { %v8071_v23 = vadd.f32 %v10161_v7, %v5775_v25  ;;  %v8073_v46 = vadd.f32 %v10162_v63, %v5864_v16  ;;  %v10170_v25 = vld [vmem:[%s10310_s17 + $0xd0] sm:$0xff]  ;;  %v10171_v63 = vld [vmem:[%s10310_s17 + $0xe8] sm:$0xff] }
 0x7d8   : > { %8104 = vst.msk [vmem:[%s12891_s19 + $0x88] sm:$0xff] %vm432_vm0, %v8072_v52  ;;  %8106 = vst.msk [vmem:[%s12891_s19 + $0x98] sm:$0xff] %vm432_vm0, %v8074_v53  ;;  %v6670_v0 = vpop.xlane.xlu1 %6669  ;;  %v6664_v47 = vpop.xlane.xlu0 %6663 }
 0x7d9   : > { %8103 = vst.msk [vmem:[%s12891_s19 + $0x80] sm:$0xff] %vm432_vm0, %v8071_v23  ;;  %8105 = vst.msk [vmem:[%s12891_s19 + $0x90] sm:$0xff] %vm432_vm0, %v8073_v46  ;;  %10092 = vrcp.f32 %v6670_v0  ;;  %v10172_v0 = vld [vmem:[%s10310_s17 + $0xf8] sm:$0xff] }
 0x7da   : > { %10094 = vrcp.f32 %v6664_v47 }
 0x7dc   : > { %v6679_v48 = vpop.xlane.xlu1 %6678  ;;  %v6673_v32 = vpop.xlane.xlu0 %6672 }
 0x7dd   : > { %10096 = vrcp.f32 %v6679_v48 }
 0x7de   : > { %10098 = vrcp.f32 %v6673_v32 }
 0x7df   : > { %v10089_v1 = vpop.eup %10088 }
 0x7e0   : > { %v10091_v9 = vpop.eup %10090  ;;  %v6682_v13 = vpop.xlane.xlu1 %6681  ;;  %v6736_v54 = vmul.f32 %v10089_v1, %v13027_v40  ;;  %v10173_v1 = vld [vmem:[%s10310_s17 + $0xe0] sm:$0xff] }
 0x7e1   : > { %v6676_v26 = vpop.xlane.xlu0 %6675  ;;  %10100 = vrcp.f32 %v6682_v13  ;;  %v6740_v36 = vmul.f32 %v10091_v9, %v13025_v35  ;;  %v10174_v13 = vld [vmem:[%s10310_s17 + $0xf0] sm:$0xff] }
 0x7e2   : > { %10102 = vrcp.f32 %v6676_v26  ;;  %9280 = vmatprep.mubr.msk.f32.mxu1 %vm4630_vm3, %v6736_v54 }
 0x7e3   : > { %v10093_v61 = vpop.eup %10092  ;;  %9287 = vmatprep.mubr.msk.f32.mxu0 %vm4630_vm3, %v6740_v36  ;;  %v10175_v36 = vld [vmem:[%s10281_s14 + $0x8] sm:$0xff] }
 0x7e4   : > { %v10095_v12 = vpop.eup %10094  ;;  %v6742_v14 = vmul.f32 %v10093_v61, %v13035_v2  ;;  %v6691_v27 = vpop.xlane.xlu1 %6690 }
 0x7e5   : > { %v6685_v20 = vpop.xlane.xlu0 %6684  ;;  %v6738_v33 = vmul.f32 %v10095_v12, %v13041_v24  ;;  %10104 = vrcp.f32 %v6691_v27  ;;  %v10176_v27 = vld [vmem:[%s10281_s14 + $0x18] sm:$0xff] }
 0x7e6   : > { %10106 = vrcp.f32 %v6685_v20  ;;  %9288 = vmatmul.mubr.msk.f32.vlgmr.msra.gmra.mrb[84].mxu0 %vm4630_vm3, %v6742_v14 }
 0x7e7   : > { %v10097_v40 = vpop.eup %10096  ;;  %9281 = vmatmul.mubr.msk.f32.vlgmr.msra.gmra.mrb[64].mxu1 %vm4630_vm3, %v6738_v33  ;;  %9629 = vmatpush3.bf16.msra.mxu0 %v13935_v18  ;;  %v10177_v33 = vld [vmem:[%s10281_s14] sm:$0xff] }
 0x7e8   : > { %v10099_v35 = vpop.eup %10098  ;;  %9625 = vmatpush3.bf16.msra.mxu1 %v13934_v11  ;;  %9635 = vmatprep.subr.bf16.mxu0 %v13936_v10  ;;  %v6694_v51 = vpop.xlane.xlu1 %6693  ;;  %v6748_v17 = vmul.f32 %v10097_v40, %v13049_v22 }
 0x7e9   : > { %v6688_v2 = vpop.xlane.xlu0 %6687  ;;  %9631 = vmatprep.subr.bf16.mxu1 %v13937_v62  ;;  %10108 = vrcp.f32 %v6694_v51  ;;  %v6744_v24 = vmul.f32 %v10099_v35, %v13055_v31 }
 0x7ea   : > { %10110 = vrcp.f32 %v6688_v2  ;;  %9301 = vmatprep.mubr.msk.f32.mxu0 %vm4630_vm3, %v6748_v17  ;;  %v10179_v17 = vld [vmem:[%s10281_s14 + $0x28] sm:$0xff] }
 0x7eb   : > { %v10101_v49 = vpop.eup %10100  ;;  %9294 = vmatprep.mubr.msk.f32.mxu1 %vm4630_vm3, %v6744_v24 }
 0x7ec   : > { %v10103_v39 = vpop.eup %10102  ;;  %v6750_v57 = vmul.f32 %v10101_v49, %v13057_v4 }
 0x7ed   : > { %v6746_v30 = vmul.f32 %v10103_v39, %v13063_v38  ;;  %v10180_v39 = vld [vmem:[%s10281_s14 + $0x38] sm:$0xff] }
 0x7ee   : > { %9302 = vmatmul.mubr.msk.f32.vlgmr.msra.gmra.mrb[86].mxu0 %vm4630_vm3, %v6750_v57 }
 0x7ef   : > { %v10105_v50 = vpop.eup %10104  ;;  %9295 = vmatmul.mubr.msk.f32.vlgmr.msra.gmra.mrb[66].mxu1 %vm4630_vm3, %v6746_v30  ;;  %9637 = vmatpush3.bf16.msra.mxu0 %v13936_v10  ;;  %v10178_v10 = vld [vmem:[%s10281_s14 + $0x10] sm:$0xff]  ;;  %v10181_v30 = vld [vmem:[%s10281_s14 + $0x20] sm:$0xff] }
 0x7f0   : > { %v10107_v22 = vpop.eup %10106  ;;  %9633 = vmatpush3.bf16.msra.mxu1 %v13937_v62  ;;  %v6756_v31 = vmul.f32 %v10105_v50, %v13065_v28 }
 0x7f1   : > { %v6752_v44 = vmul.f32 %v10107_v22, %v13071_v5 }
 0x7f2   : > { %9315 = vmatprep.mubr.msk.f32.mxu0 %vm4630_vm3, %v6756_v31  ;;  %v10182_v31 = vld [vmem:[%s10281_s14 + $0x30] sm:$0xff] }
 0x7f3   : > { %v10109_v4 = vpop.eup %10108  ;;  %9308 = vmatprep.mubr.msk.f32.mxu1 %vm4630_vm3, %v6752_v44 }
 0x7f4   : > { %v10111_v38 = vpop.eup %10110  ;;  %v6758_v43 = vmul.f32 %v10109_v4, %v13073_v3 }
 0x7f5   : > { %v6754_v6 = vmul.f32 %v10111_v38, %v13079_v21  ;;  %v10183_v38 = vld [vmem:[%s10281_s14 + $0x48] sm:$0xff] }
 0x7f6   : > { %9316 = vmatmul.mubr.msk.f32.vlgmr.msra.gmra.mrb[88].mxu0 %vm4630_vm3, %v6758_v43 }
 0x7f7   : > { %9309 = vmatmul.mubr.msk.f32.vlgmr.msra.gmra.mrb[68].mxu1 %vm4630_vm3, %v6754_v6 }
 0x80d   : > { %v9170_v28 = vpop.f32.mrb[48].mxu1  ;;  %v9177_v5 = vpop.f32.mrb[68].mxu0 }
 0x80e   : > { %v8076_v59 = vadd.f32 %v10163_v8, %v9170_v28  ;;  %v8078_v15 = vadd.f32 %v10164_v34, %v9177_v5  ;;  %v5953_v37 = vpop.f32.mrb[49].mxu1  ;;  %v6042_v3 = vpop.f32.mrb[69].mxu0  ;;  %v10184_v5 = vld [vmem:[%s10281_s14 + $0x58] sm:$0xff] }
 0x80f   : > { %v8075_v21 = vadd.f32 %v10165_v58, %v5953_v37  ;;  %v8077_v19 = vadd.f32 %v10166_v29, %v6042_v3  ;;  %v10186_v37 = vld [vmem:[%s10281_s14 + $0x50] sm:$0xff] }
 0x810   : > { %8108 = vst.msk [vmem:[%s12891_s19 + $0xa8] sm:$0xff] %vm432_vm0, %v8076_v59  ;;  %8110 = vst.msk [vmem:[%s12891_s19 + $0xb8] sm:$0xff] %vm432_vm0, %v8078_v15  ;;  %v10185_v59 = vld [vmem:[%s10281_s14 + $0x40] sm:$0xff] }
 0x811   : > { %8107 = vst.msk [vmem:[%s12891_s19 + $0xa0] sm:$0xff] %vm432_vm0, %v8075_v21  ;;  %8109 = vst.msk [vmem:[%s12891_s19 + $0xb0] sm:$0xff] %vm432_vm0, %v8077_v19  ;;  %v10187_v21 = vld [vmem:[%s10281_s14 + $0x68] sm:$0xff] }
 0x846   : > { %v9184_v11 = vpop.f32.mrb[50].mxu1  ;;  %v9191_v18 = vpop.f32.mrb[70].mxu0 }
 0x847   : > { %v8080_v55 = vadd.f32 %v10167_v41, %v9184_v11  ;;  %v8082_v56 = vadd.f32 %v10168_v60, %v9191_v18  ;;  %v6131_v42 = vpop.f32.mrb[51].mxu1  ;;  %v6220_v52 = vpop.f32.mrb[71].mxu0  ;;  %v10188_v18 = vld [vmem:[%s10281_s14 + $0x78] sm:$0xff] }
 0x848   : > { %v8079_v53 = vadd.f32 %v10169_v45, %v6131_v42  ;;  %v8081_v16 = vadd.f32 %v10170_v25, %v6220_v52  ;;  %v10190_v42 = vld [vmem:[%s10281_s14 + $0x70] sm:$0xff] }
 0x849   : > { %8112 = vst.msk [vmem:[%s12891_s19 + $0xc8] sm:$0xff] %vm432_vm0, %v8080_v55  ;;  %8114 = vst.msk [vmem:[%s12891_s19 + $0xd8] sm:$0xff] %vm432_vm0, %v8082_v56  ;;  %v10189_v55 = vld [vmem:[%s10281_s14 + $0x60] sm:$0xff] }
 0x84a   : > { %8111 = vst.msk [vmem:[%s12891_s19 + $0xc0] sm:$0xff] %vm432_vm0, %v8079_v53  ;;  %8113 = vst.msk [vmem:[%s12891_s19 + $0xd0] sm:$0xff] %vm432_vm0, %v8081_v16  ;;  %v10191_v53 = vld [vmem:[%s10281_s14 + $0x88] sm:$0xff] }
 0x87f   : > { %v9198_v7 = vpop.f32.mrb[52].mxu1  ;;  %v9205_v23 = vpop.f32.mrb[72].mxu0 }
 0x880   : > { %v8084_v46 = vadd.f32 %v10171_v63, %v9198_v7  ;;  %v8086_v47 = vadd.f32 %v10172_v0, %v9205_v23  ;;  %v6309_v48 = vpop.f32.mrb[53].mxu1  ;;  %v6398_v32 = vpop.f32.mrb[73].mxu0  ;;  %v10192_v23 = vld [vmem:[%s10281_s14 + $0x98] sm:$0xff] }
 0x881   : > { %v8083_v9 = vadd.f32 %v10173_v1, %v6309_v48  ;;  %v8085_v26 = vadd.f32 %v10174_v13, %v6398_v32  ;;  %v10194_v48 = vld [vmem:[%s10281_s14 + $0x90] sm:$0xff]  ;;  %v10195_v13 = vld [vmem:[%s10281_s14 + $0xb8] sm:$0xff] }
 0x882   : > { %8116 = vst.msk [vmem:[%s12891_s19 + $0xe8] sm:$0xff] %vm432_vm0, %v8084_v46  ;;  %8118 = vst.msk [vmem:[%s12891_s19 + $0xf8] sm:$0xff] %vm432_vm0, %v8086_v47  ;;  %v10193_v46 = vld [vmem:[%s10281_s14 + $0x80] sm:$0xff] }
 0x883   : > { %8115 = vst.msk [vmem:[%s12891_s19 + $0xe0] sm:$0xff] %vm432_vm0, %v8083_v9  ;;  %8117 = vst.msk [vmem:[%s12891_s19 + $0xf0] sm:$0xff] %vm432_vm0, %v8085_v26  ;;  %v9212_v54 = vpop.f32.mrb[54].mxu1 }
 0x884   : > { %v8120_v61 = vadd.f32 %v10175_v36, %v9212_v54  ;;  %v9219_v12 = vpop.f32.mrb[74].mxu0  ;;  %v6831_v14 = vpop.f32.mrb[55].mxu1  ;;  %v10196_v36 = vld [vmem:[%s10281_s14 + $0xa8] sm:$0xff] }
 0x885   : > { %v8122_v20 = vadd.f32 %v10176_v27, %v9219_v12  ;;  %v8119_v40 = vadd.f32 %v10177_v33, %v6831_v14  ;;  %v6912_v35 = vpop.f32.mrb[75].mxu0  ;;  %v10197_v14 = vld [vmem:[%s10281_s14 + $0xb0] sm:$0xff] }
 0x886   : > { %8152 = vst.msk [vmem:[%s13308_s22 + $0x8] sm:$0xff] %vm432_vm0, %v8120_v61  ;;  %v8121_v51 = vadd.f32 %v10178_v10, %v6912_v35  ;;  %v10199_v10 = vld [vmem:[%s10281_s14 + $0xd8] sm:$0xff] }
 0x887   : > { %8154 = vst.msk [vmem:[%s13308_s22 + $0x18] sm:$0xff] %vm432_vm0, %v8122_v20  ;;  %8151 = vst.msk [vmem:[%s13308_s22] sm:$0xff] %vm432_vm0, %v8119_v40  ;;  %v9226_v2 = vpop.f32.mrb[56].mxu1  ;;  %v10198_v20 = vld [vmem:[%s10281_s14 + $0xa0] sm:$0xff] }
 0x888   : > { %8153 = vst.msk [vmem:[%s13308_s22 + $0x10] sm:$0xff] %vm432_vm0, %v8121_v51  ;;  %v8124_v62 = vadd.f32 %v10179_v17, %v9226_v2  ;;  %v9233_v24 = vpop.f32.mrb[76].mxu0  ;;  %v6993_v49 = vpop.f32.mrb[57].mxu1  ;;  %v10200_v17 = vld [vmem:[%s10281_s14 + $0xc8] sm:$0xff] }
 0x889   : > { %v8126_v57 = vadd.f32 %v10180_v39, %v9233_v24  ;;  %v8123_v50 = vadd.f32 %v10181_v30, %v6993_v49  ;;  %v7074_v22 = vpop.f32.mrb[77].mxu0  ;;  %v10201_v49 = vld [vmem:[%s10281_s14 + $0xd0] sm:$0xff] }
 0x88a   : > { %8156 = vst.msk [vmem:[%s13308_s22 + $0x28] sm:$0xff] %vm432_vm0, %v8124_v62  ;;  %v8125_v44 = vadd.f32 %v10182_v31, %v7074_v22  ;;  %v10203_v31 = vld [vmem:[%s10281_s14 + $0xf8] sm:$0xff] }
 0x88b   : > { %8158 = vst.msk [vmem:[%s13308_s22 + $0x38] sm:$0xff] %vm432_vm0, %v8126_v57  ;;  %8155 = vst.msk [vmem:[%s13308_s22 + $0x20] sm:$0xff] %vm432_vm0, %v8123_v50  ;;  %v9240_v4 = vpop.f32.mrb[58].mxu1  ;;  %v10202_v57 = vld [vmem:[%s10281_s14 + $0xc0] sm:$0xff] }
 0x88c   : > { %8157 = vst.msk [vmem:[%s13308_s22 + $0x30] sm:$0xff] %vm432_vm0, %v8125_v44  ;;  %v8128_v43 = vadd.f32 %v10183_v38, %v9240_v4  ;;  %v9247_v6 = vpop.f32.mrb[78].mxu0  ;;  %v7155_v28 = vpop.f32.mrb[59].mxu1  ;;  %v10204_v38 = vld [vmem:[%s10281_s14 + $0xe8] sm:$0xff] }
 0x88d   : > { %v8130_v8 = vadd.f32 %v10184_v5, %v9247_v6  ;;  %v8127_v34 = vadd.f32 %v10185_v59, %v7155_v28  ;;  %v7236_v15 = vpop.f32.mrb[79].mxu0  ;;  %v10205_v28 = vld [vmem:[%s10281_s14 + $0xf0] sm:$0xff] }
 0x88e   : > { %8160 = vst.msk [vmem:[%s13308_s22 + $0x48] sm:$0xff] %vm432_vm0, %v8128_v43  ;;  %v8129_v3 = vadd.f32 %v10186_v37, %v7236_v15 }
 0x88f   : > { %8162 = vst.msk [vmem:[%s13308_s22 + $0x58] sm:$0xff] %vm432_vm0, %v8130_v8  ;;  %8159 = vst.msk [vmem:[%s13308_s22 + $0x40] sm:$0xff] %vm432_vm0, %v8127_v34  ;;  %v9254_v58 = vpop.f32.mrb[60].mxu1  ;;  %v10206_v8 = vld [vmem:[%s10281_s14 + $0xe0] sm:$0xff] }
 0x890   : > { %8161 = vst.msk [vmem:[%s13308_s22 + $0x50] sm:$0xff] %vm432_vm0, %v8129_v3  ;;  %v8132_v29 = vadd.f32 %v10187_v21, %v9254_v58  ;;  %v9261_v19 = vpop.f32.mrb[80].mxu0  ;;  %v7317_v11 = vpop.f32.mrb[61].mxu1 }
 0x891   : > { %v8134_v41 = vadd.f32 %v10188_v18, %v9261_v19  ;;  %v8131_v60 = vadd.f32 %v10189_v55, %v7317_v11  ;;  %v7398_v56 = vpop.f32.mrb[81].mxu0 }
 0x892   : > { %8164 = vst.msk [vmem:[%s13308_s22 + $0x68] sm:$0xff] %vm432_vm0, %v8132_v29  ;;  %v8133_v52 = vadd.f32 %v10190_v42, %v7398_v56 }
 0x893   : > { %8166 = vst.msk [vmem:[%s13308_s22 + $0x78] sm:$0xff] %vm432_vm0, %v8134_v41  ;;  %8163 = vst.msk [vmem:[%s13308_s22 + $0x60] sm:$0xff] %vm432_vm0, %v8131_v60  ;;  %v9268_v45 = vpop.f32.mrb[62].mxu1 }
 0x894   : > { %8165 = vst.msk [vmem:[%s13308_s22 + $0x70] sm:$0xff] %vm432_vm0, %v8133_v52  ;;  %v8136_v25 = vadd.f32 %v10191_v53, %v9268_v45  ;;  %v9275_v16 = vpop.f32.mrb[82].mxu0  ;;  %v7479_v7 = vpop.f32.mrb[63].mxu1 }
 0x895   : > { %v8138_v63 = vadd.f32 %v10192_v23, %v9275_v16  ;;  %v8135_v0 = vadd.f32 %v10193_v46, %v7479_v7  ;;  %v7560_v47 = vpop.f32.mrb[83].mxu0 }
 0x896   : > { %8168 = vst.msk [vmem:[%s13308_s22 + $0x88] sm:$0xff] %vm432_vm0, %v8136_v25  ;;  %v8137_v32 = vadd.f32 %v10194_v48, %v7560_v47 }
 0x897   : > { %8170 = vst.msk [vmem:[%s13308_s22 + $0x98] sm:$0xff] %vm432_vm0, %v8138_v63  ;;  %8167 = vst.msk [vmem:[%s13308_s22 + $0x80] sm:$0xff] %vm432_vm0, %v8135_v0 }
 0x898   : > { %8169 = vst.msk [vmem:[%s13308_s22 + $0x90] sm:$0xff] %vm432_vm0, %v8137_v32 }
 0x8b9   : > { %v9289_v1 = vpop.f32.mrb[84].mxu0 }
 0x8ba   : > { %v9282_v9 = vpop.f32.mrb[64].mxu1  ;;  %v8142_v26 = vadd.f32 %v10195_v13, %v9289_v1  ;;  %v7722_v54 = vpop.f32.mrb[85].mxu0 }
 0x8bb   : > { %v8140_v61 = vadd.f32 %v10196_v36, %v9282_v9  ;;  %v7641_v12 = vpop.f32.mrb[65].mxu1  ;;  %v8141_v27 = vadd.f32 %v10197_v14, %v7722_v54 }
 0x8bc   : > { %8174 = vst.msk [vmem:[%s13308_s22 + $0xb8] sm:$0xff] %vm432_vm0, %v8142_v26  ;;  %v8139_v33 = vadd.f32 %v10198_v20, %v7641_v12 }
 0x8bd   : > { %8172 = vst.msk [vmem:[%s13308_s22 + $0xa8] sm:$0xff] %vm432_vm0, %v8140_v61  ;;  %8173 = vst.msk [vmem:[%s13308_s22 + $0xb0] sm:$0xff] %vm432_vm0, %v8141_v27 }
 0x8be   : > { %8171 = vst.msk [vmem:[%s13308_s22 + $0xa0] sm:$0xff] %vm432_vm0, %v8139_v33 }
 0x8c1   : > { %v9303_v40 = vpop.f32.mrb[86].mxu0 }
 0x8c2   : > { %v9296_v35 = vpop.f32.mrb[66].mxu1  ;;  %v8146_v51 = vadd.f32 %v10199_v10, %v9303_v40  ;;  %v7884_v2 = vpop.f32.mrb[87].mxu0 }
 0x8c3   : > { %v8144_v62 = vadd.f32 %v10200_v17, %v9296_v35  ;;  %v7803_v24 = vpop.f32.mrb[67].mxu1  ;;  %v8145_v39 = vadd.f32 %v10201_v49, %v7884_v2 }
 0x8c4   : > { %8178 = vst.msk [vmem:[%s13308_s22 + $0xd8] sm:$0xff] %vm432_vm0, %v8146_v51  ;;  %v8143_v30 = vadd.f32 %v10202_v57, %v7803_v24 }
 0x8c5   : > { %8176 = vst.msk [vmem:[%s13308_s22 + $0xc8] sm:$0xff] %vm432_vm0, %v8144_v62  ;;  %8177 = vst.msk [vmem:[%s13308_s22 + $0xd0] sm:$0xff] %vm432_vm0, %v8145_v39 }
 0x8c6   : > { %8175 = vst.msk [vmem:[%s13308_s22 + $0xc0] sm:$0xff] %vm432_vm0, %v8143_v30 }
 0x8c9   : > { %v9317_v50 = vpop.f32.mrb[88].mxu0 }
 0x8ca   : > { %v9310_v22 = vpop.f32.mrb[68].mxu1  ;;  %v8150_v44 = vadd.f32 %v10203_v31, %v9317_v50  ;;  %v8046_v4 = vpop.f32.mrb[89].mxu0 }
 0x8cb   : > { %v8148_v43 = vadd.f32 %v10204_v38, %v9310_v22  ;;  %v7965_v6 = vpop.f32.mrb[69].mxu1  ;;  %v8149_v5 = vadd.f32 %v10205_v28, %v8046_v4 }
 0x8cc   : > { %8182 = vst.msk [vmem:[%s13308_s22 + $0xf8] sm:$0xff] %vm432_vm0, %v8150_v44  ;;  %v8147_v59 = vadd.f32 %v10206_v8, %v7965_v6 }
 0x8cd   : > { %8180 = vst.msk [vmem:[%s13308_s22 + $0xe8] sm:$0xff] %vm432_vm0, %v8148_v43  ;;  %8181 = vst.msk [vmem:[%s13308_s22 + $0xf0] sm:$0xff] %vm432_vm0, %v8149_v5 }
 0x8ce   : > { %8179 = vst.msk [vmem:[%s13308_s22 + $0xe0] sm:$0xff] %vm432_vm0, %v8147_v59 }
 0x8cf PF: > { %s20_s30 = sadd.s32 1, %s10213_s30  }
 0x8d0   : > { %p17_p4 = scmp.ge.s32.totalorder %s20_s30, 4  }
 0x8d2   :  { %19 = sbr.rel (!%p17_p4) target bundleno = 1 (0x1), region = 97 }

</bundles_post_ra>
